<compile_context>
chip_gen: v5e
topology: v5e:2x2
jax: 0.10.0
libtpu: 0.0.40
codegen_flags: <defaults>
</compile_context>

<pallas_src>
import numpy as np
import jax
import jax.numpy as jnp
from jax import lax
from jax.experimental import pallas as pl
from jax.experimental.pallas import tpu as pltpu


# -----------------------------------------------------------------------------
# Pallas kernel
# -----------------------------------------------------------------------------
def movie_rnn_kernel(
    x2d_ref,        # (T*B, F)   time-major flattened input
    wi_all_ref,     # (F, 6H)    [fwd r|z|n, bwd r|z|n] input weights
    bx_all_ref,     # (1, 6H)    bi (+ bh for r,z) folded input biases
    wh_f_ref,       # (H, 3H)    fwd hidden weights (gates fused)
    wh_b_ref,       # (H, 3H)    bwd hidden weights (gates fused)
    bhn_f_ref,      # (1, H)     fwd hidden bias for the n gate
    bhn_b_ref,      # (1, H)     bwd hidden bias for the n gate
    w1_ref, b1_ref,                   # Linear-1 (un-split): (2T+2H, mid), (1, mid)
    w2_ref, b2_ref,                   # Linear-2
    w3_ref, b3_ref,                   # Linear-3
    out_ref,        # (B, C)
    gx_scr,         # VMEM (T*B, 6H)  hoisted input-gate projections
    sum_f_scr, max_f_scr, sum_b_scr, max_b_scr,   # VMEM (T, B, 1) pooling stats
    last_b_scr,     # VMEM (B, H)     bwd hidden at t = T-1  (gru_res[:, -1, H:])
):
    H = wh_f_ref.shape[0]
    T = sum_f_scr.shape[0]
    B = sum_f_scr.shape[1]

    # ---- hoisted input projections: ONE MXU pass for all timesteps & dirs ---
    gx_scr[...] = (
        jnp.dot(x2d_ref[...], wi_all_ref[...], preferred_element_type=jnp.float32)
        + bx_all_ref[...]
    )

    wh_f = wh_f_ref[...]
    wh_b = wh_b_ref[...]
    bhn_f = bhn_f_ref[...]
    bhn_b = bhn_b_ref[...]

    def gru_step(gx, h, wh, bhn):
        # single fused (B, H) @ (H, 3H) hidden projection; gate order r, z, n
        gh = jnp.dot(h, wh, preferred_element_type=jnp.float32)
        r = jax.nn.sigmoid(gx[:, 0:H] + gh[:, 0:H])
        z = jax.nn.sigmoid(gx[:, H:2 * H] + gh[:, H:2 * H])
        n = jnp.tanh(gx[:, 2 * H:3 * H] + r * (gh[:, 2 * H:3 * H] + bhn))
        return n + z * (h - n)          # == (1 - z) * n + z * h

    h0 = jnp.zeros((B, H), dtype=jnp.float32)

    # ---- fwd & bwd recurrences interleaved in one fully-unrolled loop -------
    def body(i, carry):
        h_f, h_b = carry
        tb = T - 1 - i
        gx_f = gx_scr[pl.ds(i * B, B), pl.ds(0, 3 * H)]        # (B, 3H)
        gx_b = gx_scr[pl.ds(tb * B, B), pl.ds(3 * H, 3 * H)]   # (B, 3H)

        h_f = gru_step(gx_f, h_f, wh_f, bhn_f)
        h_b = gru_step(gx_b, h_b, wh_b, bhn_b)

        # per-timestep pooling stats (XLU reductions, off the carried chain)
        sum_f_scr[i] = jnp.sum(h_f, axis=-1, keepdims=True)
        max_f_scr[i] = jnp.max(h_f, axis=-1, keepdims=True)
        sum_b_scr[tb] = jnp.sum(h_b, axis=-1, keepdims=True)
        max_b_scr[tb] = jnp.max(h_b, axis=-1, keepdims=True)

        @pl.when(i == 0)
        def _():
            # bwd hidden after its first step (timestep T-1) = gru_res[:, -1, H:]
            last_b_scr[...] = h_b

        return (h_f, h_b)

    h_f_last, _ = lax.fori_loop(0, T, body, (h0, h0), unroll=True)

    # ---- AdaptiveAvg/MaxPool1d(1) over the concatenated 2H hidden dim -------
    avg_tb = jnp.sum(sum_f_scr[...] + sum_b_scr[...], axis=-1) * (1.0 / (2.0 * H))
    max_tb = jnp.max(jnp.maximum(max_f_scr[...], max_b_scr[...]), axis=-1)
    avg_bt = avg_tb.T        # (B, T)
    max_bt = max_tb.T        # (B, T)

    # ---- classifier (Dropout layers are identity in eval mode) --------------
    conc = jnp.concatenate([avg_bt, max_bt, h_f_last, last_b_scr[...]], axis=-1)
    h1 = jnp.tanh(jnp.dot(conc, w1_ref[...], preferred_element_type=jnp.float32)
                  + b1_ref[...])
    h2 = jnp.tanh(jnp.dot(h1, w2_ref[...], preferred_element_type=jnp.float32)
                  + b2_ref[...])
    out_ref[...] = (jnp.dot(h2, w3_ref[...], preferred_element_type=jnp.float32)
                    + b3_ref[...])


# -----------------------------------------------------------------------------
# Wrapper (parameter plumbing in plain JAX, compute in the kernel)
# -----------------------------------------------------------------------------
def movie_rnn_forward(x, params, pool_count=1):
    assert pool_count == 1, "only pool_count=1 implemented"
    B, T, F = x.shape
    H = params["w_hh_f"].shape[1]
    C = params["w3"].shape[0]
    mid = params["w1"].shape[0]
    mid2 = params["w2"].shape[0]

    # time-major, flattened to (T*B, F) so the kernel's gx precompute is 1 matmul
    x2d = jnp.transpose(x, (1, 0, 2)).reshape(T * B, F).astype(jnp.float32)

    def prep_dir(w_ih, w_hh, b_ih, b_hh):
        # (3H, F) -> (F, 3H) and (3H, H) -> (H, 3H) with gates concatenated
        wi = jnp.transpose(w_ih.reshape(3, H, F), (2, 0, 1)).reshape(F, 3 * H)
        wh = jnp.transpose(w_hh.reshape(3, H, H), (2, 0, 1)).reshape(H, 3 * H)
        bi = b_ih.reshape(3, H)
        bh = b_hh.reshape(3, H)
        # fold bh into the hoisted gx for r and z; keep bh_n separate (r * (. + bh_n))
        bx = jnp.concatenate([bi[0] + bh[0], bi[1] + bh[1], bi[2]]).reshape(1, 3 * H)
        bhn = bh[2].reshape(1, H)
        return wi, wh, bx, bhn

    wi_f, wh_f, bx_f, bhn_f = prep_dir(params["w_ih_f"], params["w_hh_f"],
                                       params["b_ih_f"], params["b_hh_f"])
    wi_b, wh_b, bx_b, bhn_b = prep_dir(params["w_ih_b"], params["w_hh_b"],
                                       params["b_ih_b"], params["b_hh_b"])
    wi_all = jnp.concatenate([wi_f, wi_b], axis=1)    # (F, 6H)
    bx_all = jnp.concatenate([bx_f, bx_b], axis=1)    # (1, 6H)

    w1t = params["w1"].T                 # (2T+2H, mid)  -- un-split (fused Linear-1)
    b1 = params["b1"].reshape(1, mid)
    w2t = params["w2"].T                 # (mid, mid2)
    b2 = params["b2"].reshape(1, mid2)
    w3t = params["w3"].T                 # (mid2, C)
    b3 = params["b3"].reshape(1, C)

    out = pl.pallas_call(
        movie_rnn_kernel,
        out_shape=jax.ShapeDtypeStruct((B, C), jnp.float32),
        in_specs=[pl.BlockSpec(memory_space=pltpu.MemorySpace.VMEM)] * 13,
        out_specs=pl.BlockSpec(memory_space=pltpu.MemorySpace.VMEM),
        scratch_shapes=[
            pltpu.VMEM((T * B, 6 * H), jnp.float32),   # hoisted gate projections
            pltpu.VMEM((T, B, 1), jnp.float32),        # fwd per-t sum
            pltpu.VMEM((T, B, 1), jnp.float32),        # fwd per-t max
            pltpu.VMEM((T, B, 1), jnp.float32),        # bwd per-t sum
            pltpu.VMEM((T, B, 1), jnp.float32),        # bwd per-t max
            pltpu.VMEM((B, H), jnp.float32),           # bwd hidden at t = T-1
        ],
    )(x2d, wi_all, bx_all, wh_f, wh_b, bhn_f, bhn_b,
      w1t, b1, w2t, b2, w3t, b3)
    return out


# -----------------------------------------------------------------------------
# Deterministic parameter init (PyTorch-style layouts)
# -----------------------------------------------------------------------------
def init_params(key, seq_len, features_dim, result_classes,
                rnn_units=32, mid_dim=16, mid_dim2=16, pool_count=1):
    H = rnn_units
    dense_first = seq_len * pool_count * 2 + 2 * H
    ks = jax.random.split(key, 14)

    def u(k, shape, bound):
        return jax.random.uniform(k, shape, jnp.float32, -bound, bound)

    kg = 1.0 / float(np.sqrt(H))
    k1 = 1.0 / float(np.sqrt(dense_first))
    k2 = 1.0 / float(np.sqrt(mid_dim))
    k3 = 1.0 / float(np.sqrt(mid_dim2))
    return {
        "w_ih_f": u(ks[0], (3 * H, features_dim), kg),
        "w_hh_f": u(ks[1], (3 * H, H), kg),
        "b_ih_f": u(ks[2], (3 * H,), kg),
        "b_hh_f": u(ks[3], (3 * H,), kg),
        "w_ih_b": u(ks[4], (3 * H, features_dim), kg),
        "w_hh_b": u(ks[5], (3 * H, H), kg),
        "b_ih_b": u(ks[6], (3 * H,), kg),
        "b_hh_b": u(ks[7], (3 * H,), kg),
        "w1": u(ks[8], (mid_dim, dense_first), k1),
        "b1": u(ks[9], (mid_dim,), k1),
        "w2": u(ks[10], (mid_dim2, mid_dim), k2),
        "b2": u(ks[11], (mid_dim2,), k2),
        "w3": u(ks[12], (result_classes, mid_dim2), k3),
        "b3": u(ks[13], (result_classes,), k3),
    }


# -----------------------------------------------------------------------------
# Pure-JAX reference (same math as the PyTorch module) for a sanity check
# -----------------------------------------------------------------------------
def reference_forward(x, p):
    B, T, F = x.shape
    H = p["w_hh_f"].shape[1]

    def cell(x_t, h, w_ih, w_hh, b_ih, b_hh):
        gx = x_t @ w_ih.T + b_ih
        gh = h @ w_hh.T + b_hh
        r = jax.nn.sigmoid(gx[:, :H] + gh[:, :H])
        z = jax.nn.sigmoid(gx[:, H:2 * H] + gh[:, H:2 * H])
        n = jnp.tanh(gx[:, 2 * H:] + r * gh[:, 2 * H:])
        return (1.0 - z) * n + z * h

    h = jnp.zeros((B, H), jnp.float32)
    fwd = []
    for t in range(T):
        h = cell(x[:, t], h, p["w_ih_f"], p["w_hh_f"], p["b_ih_f"], p["b_hh_f"])
        fwd.append(h)
    h = jnp.zeros((B, H), jnp.float32)
    bwd = [None] * T
    for t in range(T - 1, -1, -1):
        h = cell(x[:, t], h, p["w_ih_b"], p["w_hh_b"], p["b_ih_b"], p["b_hh_b"])
        bwd[t] = h
    gru_res = jnp.concatenate(
        [jnp.stack(fwd, axis=1), jnp.stack(bwd, axis=1)], axis=-1)  # (B,T,2H)

    avg = gru_res.mean(axis=-1)          # AdaptiveAvgPool1d(1) -> (B, T)
    mx = gru_res.max(axis=-1)            # AdaptiveMaxPool1d(1) -> (B, T)
    last = gru_res[:, -1]                # (B, 2H)
    conc = jnp.concatenate([avg, mx, last], axis=-1)
    h1 = jnp.tanh(conc @ p["w1"].T + p["b1"])
    h2 = jnp.tanh(h1 @ p["w2"].T + p["b2"])
    return h2 @ p["w3"].T + p["b3"]


# -----------------------------------------------------------------------------
if __name__ == "__main__":
    B, T, F = 2, 8, 16            # batch, seq_len, features_dim
    C, H, MID, MID2 = 5, 32, 16, 16

    key = jax.random.PRNGKey(0)
    pkey, xkey = jax.random.split(key)
    params = init_params(pkey, T, F, C, rnn_units=H, mid_dim=MID, mid_dim2=MID2)
    x = jax.random.normal(xkey, (B, T, F), dtype=jnp.float32)

    out = jax.block_until_ready(movie_rnn_forward(x, params))
    ref = jax.block_until_ready(reference_forward(x, params))

    if out.shape != (B, C):
        raise AssertionError(f"bad output shape {out.shape}")
    if not np.allclose(np.asarray(out), np.asarray(ref), rtol=2e-3, atol=2e-3):
        raise AssertionError("Pallas kernel output mismatches pure-JAX reference")

    print("KERNEL_OK")
</pallas_src>

<mosaic_0001>
module attributes {stable_mosaic.version = 11 : i64} {
  func.func @movie_rnn_kernel(%arg0: memref<16x16xf32, #tpu.memory_space<vmem>>, %arg1: memref<16x192xf32, #tpu.memory_space<vmem>>, %arg2: memref<1x192xf32, #tpu.memory_space<vmem>>, %arg3: memref<32x96xf32, #tpu.memory_space<vmem>>, %arg4: memref<32x96xf32, #tpu.memory_space<vmem>>, %arg5: memref<1x32xf32, #tpu.memory_space<vmem>>, %arg6: memref<1x32xf32, #tpu.memory_space<vmem>>, %arg7: memref<80x16xf32, #tpu.memory_space<vmem>>, %arg8: memref<1x16xf32, #tpu.memory_space<vmem>>, %arg9: memref<16x16xf32, #tpu.memory_space<vmem>>, %arg10: memref<1x16xf32, #tpu.memory_space<vmem>>, %arg11: memref<16x5xf32, #tpu.memory_space<vmem>>, %arg12: memref<1x5xf32, #tpu.memory_space<vmem>>, %arg13: memref<2x5xf32, #tpu.memory_space<vmem>>, %arg14: memref<16x192xf32, #tpu.memory_space<vmem>>, %arg15: memref<8x2x1xf32, #tpu.memory_space<vmem>>, %arg16: memref<8x2x1xf32, #tpu.memory_space<vmem>>, %arg17: memref<8x2x1xf32, #tpu.memory_space<vmem>>, %arg18: memref<8x2x1xf32, #tpu.memory_space<vmem>>, %arg19: memref<2x32xf32, #tpu.memory_space<vmem>>) attributes {dimension_semantics = [], scalar_prefetch = 0 : i64, scratch_operands = 6 : i64, tpu.core_type = #tpu.core_type<tc>} {
    %c0 = arith.constant 0 : index
    %c0_0 = arith.constant 0 : index
    %0 = vector.load %arg0[%c0, %c0_0] : memref<16x16xf32, #tpu.memory_space<vmem>>, vector<16x16xf32>
    %c0_1 = arith.constant 0 : index
    %c0_2 = arith.constant 0 : index
    %1 = vector.load %arg1[%c0_1, %c0_2] : memref<16x192xf32, #tpu.memory_space<vmem>>, vector<16x192xf32>
    %cst = arith.constant dense<0.000000e+00> : vector<16x192xf32>
    %2 = tpu.matmul %0, %1, %cst {dimension_numbers = #tpu.dot_dimension_numbers<[1], [0], [0], [1], [0, 0, 1, 1], [], []>} : vector<16x16xf32>, vector<16x192xf32>, vector<16x192xf32> -> vector<16x192xf32>
    %c0_3 = arith.constant 0 : index
    %c0_4 = arith.constant 0 : index
    %3 = vector.load %arg2[%c0_3, %c0_4] : memref<1x192xf32, #tpu.memory_space<vmem>>, vector<1x192xf32>
    %4 = vector.broadcast %3 : vector<1x192xf32> to vector<16x192xf32>
    %5 = arith.addf %2, %4 : vector<16x192xf32>
    %c0_5 = arith.constant 0 : index
    %c0_6 = arith.constant 0 : index
    %6 = vector.load %arg14[%c0_5, %c0_6] : memref<16x192xf32, #tpu.memory_space<vmem>>, vector<16x192xf32>
    tpu.vector_store %arg14[%c0_5, %c0_6], %5 {strides = array<i32>} : memref<16x192xf32, #tpu.memory_space<vmem>>, vector<16x192xf32>,
    %c0_7 = arith.constant 0 : index
    %c0_8 = arith.constant 0 : index
    %7 = vector.load %arg3[%c0_7, %c0_8] : memref<32x96xf32, #tpu.memory_space<vmem>>, vector<32x96xf32>
    %c0_9 = arith.constant 0 : index
    %c0_10 = arith.constant 0 : index
    %8 = vector.load %arg4[%c0_9, %c0_10] : memref<32x96xf32, #tpu.memory_space<vmem>>, vector<32x96xf32>
    %c0_11 = arith.constant 0 : index
    %c0_12 = arith.constant 0 : index
    %9 = vector.load %arg5[%c0_11, %c0_12] : memref<1x32xf32, #tpu.memory_space<vmem>>, vector<1x32xf32>
    %c0_13 = arith.constant 0 : index
    %c0_14 = arith.constant 0 : index
    %10 = vector.load %arg6[%c0_13, %c0_14] : memref<1x32xf32, #tpu.memory_space<vmem>>, vector<1x32xf32>
    %cst_15 = arith.constant 0.000000e+00 : f32
    %11 = vector.broadcast %cst_15 : f32 to vector<2x32xf32>
    %c0_i32 = arith.constant 0 : i32
    %c7_i32 = arith.constant 7 : i32
    %12 = arith.subi %c7_i32, %c0_i32 : i32
    %c2_i32 = arith.constant 2 : i32
    %13 = arith.muli %c0_i32, %c2_i32 : i32
    %14 = arith.index_cast %13 : i32 to index
    %c0_16 = arith.constant 0 : index
    %15 = vector.load %arg14[%14, %c0_16] : memref<16x192xf32, #tpu.memory_space<vmem>>, vector<2x96xf32>
    %c2_i32_17 = arith.constant 2 : i32
    %16 = arith.muli %12, %c2_i32_17 : i32
    %17 = arith.index_cast %16 : i32 to index
    %c96 = arith.constant 96 : index
    %18 = vector.load %arg14[%17, %c96] : memref<16x192xf32, #tpu.memory_space<vmem>>, vector<2x96xf32>
    %cst_18 = arith.constant dense<0.000000e+00> : vector<2x96xf32>
    %19 = tpu.matmul %11, %7, %cst_18 {dimension_numbers = #tpu.dot_dimension_numbers<[1], [0], [0], [1], [0, 0, 1, 1], [], []>} : vector<2x32xf32>, vector<32x96xf32>, vector<2x96xf32> -> vector<2x96xf32>
    %20 = vector.extract_strided_slice %15 {offsets = [0, 0], sizes = [2, 32], strides = [1, 1]} : vector<2x96xf32> to vector<2x32xf32>
    %21 = vector.extract_strided_slice %19 {offsets = [0, 0], sizes = [2, 32], strides = [1, 1]} : vector<2x96xf32> to vector<2x32xf32>
    %22 = arith.addf %20, %21 : vector<2x32xf32>
    %23 = arith.negf %22 : vector<2x32xf32>
    %24 = math.exp %23 : vector<2x32xf32>
    %cst_19 = arith.constant 1.000000e+00 : f32
    %25 = vector.broadcast %cst_19 : f32 to vector<2x32xf32>
    %26 = arith.addf %25, %24 : vector<2x32xf32>
    %27 = arith.divf %25, %26 : vector<2x32xf32>
    %28 = vector.extract_strided_slice %15 {offsets = [0, 32], sizes = [2, 32], strides = [1, 1]} : vector<2x96xf32> to vector<2x32xf32>
    %29 = vector.extract_strided_slice %19 {offsets = [0, 32], sizes = [2, 32], strides = [1, 1]} : vector<2x96xf32> to vector<2x32xf32>
    %30 = arith.addf %28, %29 : vector<2x32xf32>
    %31 = arith.negf %30 : vector<2x32xf32>
    %32 = math.exp %31 : vector<2x32xf32>
    %cst_20 = arith.constant 1.000000e+00 : f32
    %33 = vector.broadcast %cst_20 : f32 to vector<2x32xf32>
    %34 = arith.addf %33, %32 : vector<2x32xf32>
    %35 = arith.divf %33, %34 : vector<2x32xf32>
    %36 = vector.extract_strided_slice %15 {offsets = [0, 64], sizes = [2, 32], strides = [1, 1]} : vector<2x96xf32> to vector<2x32xf32>
    %37 = vector.extract_strided_slice %19 {offsets = [0, 64], sizes = [2, 32], strides = [1, 1]} : vector<2x96xf32> to vector<2x32xf32>
    %38 = vector.broadcast %9 : vector<1x32xf32> to vector<2x32xf32>
    %39 = arith.addf %37, %38 : vector<2x32xf32>
    %40 = arith.mulf %27, %39 : vector<2x32xf32>
    %41 = arith.addf %36, %40 : vector<2x32xf32>
    %42 = math.tanh %41 : vector<2x32xf32>
    %43 = arith.subf %11, %42 : vector<2x32xf32>
    %44 = arith.mulf %35, %43 : vector<2x32xf32>
    %45 = arith.addf %42, %44 : vector<2x32xf32>
    %cst_21 = arith.constant dense<0.000000e+00> : vector<2x96xf32>
    %46 = tpu.matmul %11, %8, %cst_21 {dimension_numbers = #tpu.dot_dimension_numbers<[1], [0], [0], [1], [0, 0, 1, 1], [], []>} : vector<2x32xf32>, vector<32x96xf32>, vector<2x96xf32> -> vector<2x96xf32>
    %47 = vector.extract_strided_slice %18 {offsets = [0, 0], sizes = [2, 32], strides = [1, 1]} : vector<2x96xf32> to vector<2x32xf32>
    %48 = vector.extract_strided_slice %46 {offsets = [0, 0], sizes = [2, 32], strides = [1, 1]} : vector<2x96xf32> to vector<2x32xf32>
    %49 = arith.addf %47, %48 : vector<2x32xf32>
    %50 = arith.negf %49 : vector<2x32xf32>
    %51 = math.exp %50 : vector<2x32xf32>
    %cst_22 = arith.constant 1.000000e+00 : f32
    %52 = vector.broadcast %cst_22 : f32 to vector<2x32xf32>
    %53 = arith.addf %52, %51 : vector<2x32xf32>
    %54 = arith.divf %52, %53 : vector<2x32xf32>
    %55 = vector.extract_strided_slice %18 {offsets = [0, 32], sizes = [2, 32], strides = [1, 1]} : vector<2x96xf32> to vector<2x32xf32>
    %56 = vector.extract_strided_slice %46 {offsets = [0, 32], sizes = [2, 32], strides = [1, 1]} : vector<2x96xf32> to vector<2x32xf32>
    %57 = arith.addf %55, %56 : vector<2x32xf32>
    %58 = arith.negf %57 : vector<2x32xf32>
    %59 = math.exp %58 : vector<2x32xf32>
    %cst_23 = arith.constant 1.000000e+00 : f32
    %60 = vector.broadcast %cst_23 : f32 to vector<2x32xf32>
    %61 = arith.addf %60, %59 : vector<2x32xf32>
    %62 = arith.divf %60, %61 : vector<2x32xf32>
    %63 = vector.extract_strided_slice %18 {offsets = [0, 64], sizes = [2, 32], strides = [1, 1]} : vector<2x96xf32> to vector<2x32xf32>
    %64 = vector.extract_strided_slice %46 {offsets = [0, 64], sizes = [2, 32], strides = [1, 1]} : vector<2x96xf32> to vector<2x32xf32>
    %65 = vector.broadcast %10 : vector<1x32xf32> to vector<2x32xf32>
    %66 = arith.addf %64, %65 : vector<2x32xf32>
    %67 = arith.mulf %54, %66 : vector<2x32xf32>
    %68 = arith.addf %63, %67 : vector<2x32xf32>
    %69 = math.tanh %68 : vector<2x32xf32>
    %70 = arith.subf %11, %69 : vector<2x32xf32>
    %71 = arith.mulf %62, %70 : vector<2x32xf32>
    %72 = arith.addf %69, %71 : vector<2x32xf32>
    %cst_24 = arith.constant dense<0.000000e+00> : vector<2xf32>
    %73 = vector.multi_reduction <add>, %45, %cst_24 [1] : vector<2x32xf32> to vector<2xf32>
    %74 = vector.shape_cast %73 : vector<2xf32> to vector<2x1xf32>
    %75 = arith.index_cast %c0_i32 : i32 to index
    %c0_25 = arith.constant 0 : index
    %c0_26 = arith.constant 0 : index
    %76 = vector.load %arg15[%75, %c0_25, %c0_26] : memref<8x2x1xf32, #tpu.memory_space<vmem>>, vector<1x2x1xf32>
    %77 = vector.shape_cast %76 : vector<1x2x1xf32> to vector<2x1xf32>
    %78 = vector.shape_cast %74 : vector<2x1xf32> to vector<1x2x1xf32>
    tpu.vector_store %arg15[%75, %c0_25, %c0_26], %78 {strides = array<i32>} : memref<8x2x1xf32, #tpu.memory_space<vmem>>, vector<1x2x1xf32>,
    %cst_27 = arith.constant dense<0xFF800000> : vector<2xf32>
    %79 = vector.multi_reduction <maximumf>, %45, %cst_27 [1] : vector<2x32xf32> to vector<2xf32>
    %80 = vector.shape_cast %79 : vector<2xf32> to vector<2x1xf32>
    %81 = arith.index_cast %c0_i32 : i32 to index
    %c0_28 = arith.constant 0 : index
    %c0_29 = arith.constant 0 : index
    %82 = vector.load %arg16[%81, %c0_28, %c0_29] : memref<8x2x1xf32, #tpu.memory_space<vmem>>, vector<1x2x1xf32>
    %83 = vector.shape_cast %82 : vector<1x2x1xf32> to vector<2x1xf32>
    %84 = vector.shape_cast %80 : vector<2x1xf32> to vector<1x2x1xf32>
    tpu.vector_store %arg16[%81, %c0_28, %c0_29], %84 {strides = array<i32>} : memref<8x2x1xf32, #tpu.memory_space<vmem>>, vector<1x2x1xf32>,
    %cst_30 = arith.constant dense<0.000000e+00> : vector<2xf32>
    %85 = vector.multi_reduction <add>, %72, %cst_30 [1] : vector<2x32xf32> to vector<2xf32>
    %86 = vector.shape_cast %85 : vector<2xf32> to vector<2x1xf32>
    %87 = arith.index_cast %12 : i32 to index
    %c0_31 = arith.constant 0 : index
    %c0_32 = arith.constant 0 : index
    %88 = vector.load %arg17[%87, %c0_31, %c0_32] : memref<8x2x1xf32, #tpu.memory_space<vmem>>, vector<1x2x1xf32>
    %89 = vector.shape_cast %88 : vector<1x2x1xf32> to vector<2x1xf32>
    %90 = vector.shape_cast %86 : vector<2x1xf32> to vector<1x2x1xf32>
    tpu.vector_store %arg17[%87, %c0_31, %c0_32], %90 {strides = array<i32>} : memref<8x2x1xf32, #tpu.memory_space<vmem>>, vector<1x2x1xf32>,
    %cst_33 = arith.constant dense<0xFF800000> : vector<2xf32>
    %91 = vector.multi_reduction <maximumf>, %72, %cst_33 [1] : vector<2x32xf32> to vector<2xf32>
    %92 = vector.shape_cast %91 : vector<2xf32> to vector<2x1xf32>
    %93 = arith.index_cast %12 : i32 to index
    %c0_34 = arith.constant 0 : index
    %c0_35 = arith.constant 0 : index
    %94 = vector.load %arg18[%93, %c0_34, %c0_35] : memref<8x2x1xf32, #tpu.memory_space<vmem>>, vector<1x2x1xf32>
    %95 = vector.shape_cast %94 : vector<1x2x1xf32> to vector<2x1xf32>
    %96 = vector.shape_cast %92 : vector<2x1xf32> to vector<1x2x1xf32>
    tpu.vector_store %arg18[%93, %c0_34, %c0_35], %96 {strides = array<i32>} : memref<8x2x1xf32, #tpu.memory_space<vmem>>, vector<1x2x1xf32>,
    %c0_i32_36 = arith.constant 0 : i32
    %97 = arith.cmpi eq, %c0_i32, %c0_i32_36 : i32
    %98 = arith.extui %97 : i1 to i32
    %c0_i32_37 = arith.constant 0 : i32
    %99 = arith.cmpi ne, %98, %c0_i32_37 : i32
    scf.if %99 {
      %c0_249 = arith.constant 0 : index
      %c0_250 = arith.constant 0 : index
      %748 = vector.load %arg19[%c0_249, %c0_250] : memref<2x32xf32, #tpu.memory_space<vmem>>, vector<2x32xf32>
      tpu.vector_store %arg19[%c0_249, %c0_250], %72 {strides = array<i32>} : memref<2x32xf32, #tpu.memory_space<vmem>>, vector<2x32xf32>,
    } else {
    }
    %c1_i32 = arith.constant 1 : i32
    %c7_i32_38 = arith.constant 7 : i32
    %100 = arith.subi %c7_i32_38, %c1_i32 : i32
    %c2_i32_39 = arith.constant 2 : i32
    %101 = arith.muli %c1_i32, %c2_i32_39 : i32
    %102 = arith.index_cast %101 : i32 to index
    %c0_40 = arith.constant 0 : index
    %103 = vector.load %arg14[%102, %c0_40] : memref<16x192xf32, #tpu.memory_space<vmem>>, vector<2x96xf32>
    %c2_i32_41 = arith.constant 2 : i32
    %104 = arith.muli %100, %c2_i32_41 : i32
    %105 = arith.index_cast %104 : i32 to index
    %c96_42 = arith.constant 96 : index
    %106 = vector.load %arg14[%105, %c96_42] : memref<16x192xf32, #tpu.memory_space<vmem>>, vector<2x96xf32>
    %cst_43 = arith.constant dense<0.000000e+00> : vector<2x96xf32>
    %107 = tpu.matmul %45, %7, %cst_43 {dimension_numbers = #tpu.dot_dimension_numbers<[1], [0], [0], [1], [0, 0, 1, 1], [], []>} : vector<2x32xf32>, vector<32x96xf32>, vector<2x96xf32> -> vector<2x96xf32>
    %108 = vector.extract_strided_slice %103 {offsets = [0, 0], sizes = [2, 32], strides = [1, 1]} : vector<2x96xf32> to vector<2x32xf32>
    %109 = vector.extract_strided_slice %107 {offsets = [0, 0], sizes = [2, 32], strides = [1, 1]} : vector<2x96xf32> to vector<2x32xf32>
    %110 = arith.addf %108, %109 : vector<2x32xf32>
    %111 = arith.negf %110 : vector<2x32xf32>
    %112 = math.exp %111 : vector<2x32xf32>
    %cst_44 = arith.constant 1.000000e+00 : f32
    %113 = vector.broadcast %cst_44 : f32 to vector<2x32xf32>
    %114 = arith.addf %113, %112 : vector<2x32xf32>
    %115 = arith.divf %113, %114 : vector<2x32xf32>
    %116 = vector.extract_strided_slice %103 {offsets = [0, 32], sizes = [2, 32], strides = [1, 1]} : vector<2x96xf32> to vector<2x32xf32>
    %117 = vector.extract_strided_slice %107 {offsets = [0, 32], sizes = [2, 32], strides = [1, 1]} : vector<2x96xf32> to vector<2x32xf32>
    %118 = arith.addf %116, %117 : vector<2x32xf32>
    %119 = arith.negf %118 : vector<2x32xf32>
    %120 = math.exp %119 : vector<2x32xf32>
    %cst_45 = arith.constant 1.000000e+00 : f32
    %121 = vector.broadcast %cst_45 : f32 to vector<2x32xf32>
    %122 = arith.addf %121, %120 : vector<2x32xf32>
    %123 = arith.divf %121, %122 : vector<2x32xf32>
    %124 = vector.extract_strided_slice %103 {offsets = [0, 64], sizes = [2, 32], strides = [1, 1]} : vector<2x96xf32> to vector<2x32xf32>
    %125 = vector.extract_strided_slice %107 {offsets = [0, 64], sizes = [2, 32], strides = [1, 1]} : vector<2x96xf32> to vector<2x32xf32>
    %126 = vector.broadcast %9 : vector<1x32xf32> to vector<2x32xf32>
    %127 = arith.addf %125, %126 : vector<2x32xf32>
    %128 = arith.mulf %115, %127 : vector<2x32xf32>
    %129 = arith.addf %124, %128 : vector<2x32xf32>
    %130 = math.tanh %129 : vector<2x32xf32>
    %131 = arith.subf %45, %130 : vector<2x32xf32>
    %132 = arith.mulf %123, %131 : vector<2x32xf32>
    %133 = arith.addf %130, %132 : vector<2x32xf32>
    %cst_46 = arith.constant dense<0.000000e+00> : vector<2x96xf32>
    %134 = tpu.matmul %72, %8, %cst_46 {dimension_numbers = #tpu.dot_dimension_numbers<[1], [0], [0], [1], [0, 0, 1, 1], [], []>} : vector<2x32xf32>, vector<32x96xf32>, vector<2x96xf32> -> vector<2x96xf32>
    %135 = vector.extract_strided_slice %106 {offsets = [0, 0], sizes = [2, 32], strides = [1, 1]} : vector<2x96xf32> to vector<2x32xf32>
    %136 = vector.extract_strided_slice %134 {offsets = [0, 0], sizes = [2, 32], strides = [1, 1]} : vector<2x96xf32> to vector<2x32xf32>
    %137 = arith.addf %135, %136 : vector<2x32xf32>
    %138 = arith.negf %137 : vector<2x32xf32>
    %139 = math.exp %138 : vector<2x32xf32>
    %cst_47 = arith.constant 1.000000e+00 : f32
    %140 = vector.broadcast %cst_47 : f32 to vector<2x32xf32>
    %141 = arith.addf %140, %139 : vector<2x32xf32>
    %142 = arith.divf %140, %141 : vector<2x32xf32>
    %143 = vector.extract_strided_slice %106 {offsets = [0, 32], sizes = [2, 32], strides = [1, 1]} : vector<2x96xf32> to vector<2x32xf32>
    %144 = vector.extract_strided_slice %134 {offsets = [0, 32], sizes = [2, 32], strides = [1, 1]} : vector<2x96xf32> to vector<2x32xf32>
    %145 = arith.addf %143, %144 : vector<2x32xf32>
    %146 = arith.negf %145 : vector<2x32xf32>
    %147 = math.exp %146 : vector<2x32xf32>
    %cst_48 = arith.constant 1.000000e+00 : f32
    %148 = vector.broadcast %cst_48 : f32 to vector<2x32xf32>
    %149 = arith.addf %148, %147 : vector<2x32xf32>
    %150 = arith.divf %148, %149 : vector<2x32xf32>
    %151 = vector.extract_strided_slice %106 {offsets = [0, 64], sizes = [2, 32], strides = [1, 1]} : vector<2x96xf32> to vector<2x32xf32>
    %152 = vector.extract_strided_slice %134 {offsets = [0, 64], sizes = [2, 32], strides = [1, 1]} : vector<2x96xf32> to vector<2x32xf32>
    %153 = vector.broadcast %10 : vector<1x32xf32> to vector<2x32xf32>
    %154 = arith.addf %152, %153 : vector<2x32xf32>
    %155 = arith.mulf %142, %154 : vector<2x32xf32>
    %156 = arith.addf %151, %155 : vector<2x32xf32>
    %157 = math.tanh %156 : vector<2x32xf32>
    %158 = arith.subf %72, %157 : vector<2x32xf32>
    %159 = arith.mulf %150, %158 : vector<2x32xf32>
    %160 = arith.addf %157, %159 : vector<2x32xf32>
    %cst_49 = arith.constant dense<0.000000e+00> : vector<2xf32>
    %161 = vector.multi_reduction <add>, %133, %cst_49 [1] : vector<2x32xf32> to vector<2xf32>
    %162 = vector.shape_cast %161 : vector<2xf32> to vector<2x1xf32>
    %163 = arith.index_cast %c1_i32 : i32 to index
    %c0_50 = arith.constant 0 : index
    %c0_51 = arith.constant 0 : index
    %164 = vector.load %arg15[%163, %c0_50, %c0_51] : memref<8x2x1xf32, #tpu.memory_space<vmem>>, vector<1x2x1xf32>
    %165 = vector.shape_cast %164 : vector<1x2x1xf32> to vector<2x1xf32>
    %166 = vector.shape_cast %162 : vector<2x1xf32> to vector<1x2x1xf32>
    tpu.vector_store %arg15[%163, %c0_50, %c0_51], %166 {strides = array<i32>} : memref<8x2x1xf32, #tpu.memory_space<vmem>>, vector<1x2x1xf32>,
    %cst_52 = arith.constant dense<0xFF800000> : vector<2xf32>
    %167 = vector.multi_reduction <maximumf>, %133, %cst_52 [1] : vector<2x32xf32> to vector<2xf32>
    %168 = vector.shape_cast %167 : vector<2xf32> to vector<2x1xf32>
    %169 = arith.index_cast %c1_i32 : i32 to index
    %c0_53 = arith.constant 0 : index
    %c0_54 = arith.constant 0 : index
    %170 = vector.load %arg16[%169, %c0_53, %c0_54] : memref<8x2x1xf32, #tpu.memory_space<vmem>>, vector<1x2x1xf32>
    %171 = vector.shape_cast %170 : vector<1x2x1xf32> to vector<2x1xf32>
    %172 = vector.shape_cast %168 : vector<2x1xf32> to vector<1x2x1xf32>
    tpu.vector_store %arg16[%169, %c0_53, %c0_54], %172 {strides = array<i32>} : memref<8x2x1xf32, #tpu.memory_space<vmem>>, vector<1x2x1xf32>,
    %cst_55 = arith.constant dense<0.000000e+00> : vector<2xf32>
    %173 = vector.multi_reduction <add>, %160, %cst_55 [1] : vector<2x32xf32> to vector<2xf32>
    %174 = vector.shape_cast %173 : vector<2xf32> to vector<2x1xf32>
    %175 = arith.index_cast %100 : i32 to index
    %c0_56 = arith.constant 0 : index
    %c0_57 = arith.constant 0 : index
    %176 = vector.load %arg17[%175, %c0_56, %c0_57] : memref<8x2x1xf32, #tpu.memory_space<vmem>>, vector<1x2x1xf32>
    %177 = vector.shape_cast %176 : vector<1x2x1xf32> to vector<2x1xf32>
    %178 = vector.shape_cast %174 : vector<2x1xf32> to vector<1x2x1xf32>
    tpu.vector_store %arg17[%175, %c0_56, %c0_57], %178 {strides = array<i32>} : memref<8x2x1xf32, #tpu.memory_space<vmem>>, vector<1x2x1xf32>,
    %cst_58 = arith.constant dense<0xFF800000> : vector<2xf32>
    %179 = vector.multi_reduction <maximumf>, %160, %cst_58 [1] : vector<2x32xf32> to vector<2xf32>
    %180 = vector.shape_cast %179 : vector<2xf32> to vector<2x1xf32>
    %181 = arith.index_cast %100 : i32 to index
    %c0_59 = arith.constant 0 : index
    %c0_60 = arith.constant 0 : index
    %182 = vector.load %arg18[%181, %c0_59, %c0_60] : memref<8x2x1xf32, #tpu.memory_space<vmem>>, vector<1x2x1xf32>
    %183 = vector.shape_cast %182 : vector<1x2x1xf32> to vector<2x1xf32>
    %184 = vector.shape_cast %180 : vector<2x1xf32> to vector<1x2x1xf32>
    tpu.vector_store %arg18[%181, %c0_59, %c0_60], %184 {strides = array<i32>} : memref<8x2x1xf32, #tpu.memory_space<vmem>>, vector<1x2x1xf32>,
    %c0_i32_61 = arith.constant 0 : i32
    %185 = arith.cmpi eq, %c1_i32, %c0_i32_61 : i32
    %186 = arith.extui %185 : i1 to i32
    %c0_i32_62 = arith.constant 0 : i32
    %187 = arith.cmpi ne, %186, %c0_i32_62 : i32
    scf.if %187 {
      %c0_249 = arith.constant 0 : index
      %c0_250 = arith.constant 0 : index
      %748 = vector.load %arg19[%c0_249, %c0_250] : memref<2x32xf32, #tpu.memory_space<vmem>>, vector<2x32xf32>
      tpu.vector_store %arg19[%c0_249, %c0_250], %160 {strides = array<i32>} : memref<2x32xf32, #tpu.memory_space<vmem>>, vector<2x32xf32>,
    } else {
    }
    %c2_i32_63 = arith.constant 2 : i32
    %c7_i32_64 = arith.constant 7 : i32
    %188 = arith.subi %c7_i32_64, %c2_i32_63 : i32
    %c2_i32_65 = arith.constant 2 : i32
    %189 = arith.muli %c2_i32_63, %c2_i32_65 : i32
    %190 = arith.index_cast %189 : i32 to index
    %c0_66 = arith.constant 0 : index
    %191 = vector.load %arg14[%190, %c0_66] : memref<16x192xf32, #tpu.memory_space<vmem>>, vector<2x96xf32>
    %c2_i32_67 = arith.constant 2 : i32
    %192 = arith.muli %188, %c2_i32_67 : i32
    %193 = arith.index_cast %192 : i32 to index
    %c96_68 = arith.constant 96 : index
    %194 = vector.load %arg14[%193, %c96_68] : memref<16x192xf32, #tpu.memory_space<vmem>>, vector<2x96xf32>
    %cst_69 = arith.constant dense<0.000000e+00> : vector<2x96xf32>
    %195 = tpu.matmul %133, %7, %cst_69 {dimension_numbers = #tpu.dot_dimension_numbers<[1], [0], [0], [1], [0, 0, 1, 1], [], []>} : vector<2x32xf32>, vector<32x96xf32>, vector<2x96xf32> -> vector<2x96xf32>
    %196 = vector.extract_strided_slice %191 {offsets = [0, 0], sizes = [2, 32], strides = [1, 1]} : vector<2x96xf32> to vector<2x32xf32>
    %197 = vector.extract_strided_slice %195 {offsets = [0, 0], sizes = [2, 32], strides = [1, 1]} : vector<2x96xf32> to vector<2x32xf32>
    %198 = arith.addf %196, %197 : vector<2x32xf32>
    %199 = arith.negf %198 : vector<2x32xf32>
    %200 = math.exp %199 : vector<2x32xf32>
    %cst_70 = arith.constant 1.000000e+00 : f32
    %201 = vector.broadcast %cst_70 : f32 to vector<2x32xf32>
    %202 = arith.addf %201, %200 : vector<2x32xf32>
    %203 = arith.divf %201, %202 : vector<2x32xf32>
    %204 = vector.extract_strided_slice %191 {offsets = [0, 32], sizes = [2, 32], strides = [1, 1]} : vector<2x96xf32> to vector<2x32xf32>
    %205 = vector.extract_strided_slice %195 {offsets = [0, 32], sizes = [2, 32], strides = [1, 1]} : vector<2x96xf32> to vector<2x32xf32>
    %206 = arith.addf %204, %205 : vector<2x32xf32>
    %207 = arith.negf %206 : vector<2x32xf32>
    %208 = math.exp %207 : vector<2x32xf32>
    %cst_71 = arith.constant 1.000000e+00 : f32
    %209 = vector.broadcast %cst_71 : f32 to vector<2x32xf32>
    %210 = arith.addf %209, %208 : vector<2x32xf32>
    %211 = arith.divf %209, %210 : vector<2x32xf32>
    %212 = vector.extract_strided_slice %191 {offsets = [0, 64], sizes = [2, 32], strides = [1, 1]} : vector<2x96xf32> to vector<2x32xf32>
    %213 = vector.extract_strided_slice %195 {offsets = [0, 64], sizes = [2, 32], strides = [1, 1]} : vector<2x96xf32> to vector<2x32xf32>
    %214 = vector.broadcast %9 : vector<1x32xf32> to vector<2x32xf32>
    %215 = arith.addf %213, %214 : vector<2x32xf32>
    %216 = arith.mulf %203, %215 : vector<2x32xf32>
    %217 = arith.addf %212, %216 : vector<2x32xf32>
    %218 = math.tanh %217 : vector<2x32xf32>
    %219 = arith.subf %133, %218 : vector<2x32xf32>
    %220 = arith.mulf %211, %219 : vector<2x32xf32>
    %221 = arith.addf %218, %220 : vector<2x32xf32>
    %cst_72 = arith.constant dense<0.000000e+00> : vector<2x96xf32>
    %222 = tpu.matmul %160, %8, %cst_72 {dimension_numbers = #tpu.dot_dimension_numbers<[1], [0], [0], [1], [0, 0, 1, 1], [], []>} : vector<2x32xf32>, vector<32x96xf32>, vector<2x96xf32> -> vector<2x96xf32>
    %223 = vector.extract_strided_slice %194 {offsets = [0, 0], sizes = [2, 32], strides = [1, 1]} : vector<2x96xf32> to vector<2x32xf32>
    %224 = vector.extract_strided_slice %222 {offsets = [0, 0], sizes = [2, 32], strides = [1, 1]} : vector<2x96xf32> to vector<2x32xf32>
    %225 = arith.addf %223, %224 : vector<2x32xf32>
    %226 = arith.negf %225 : vector<2x32xf32>
    %227 = math.exp %226 : vector<2x32xf32>
    %cst_73 = arith.constant 1.000000e+00 : f32
    %228 = vector.broadcast %cst_73 : f32 to vector<2x32xf32>
    %229 = arith.addf %228, %227 : vector<2x32xf32>
    %230 = arith.divf %228, %229 : vector<2x32xf32>
    %231 = vector.extract_strided_slice %194 {offsets = [0, 32], sizes = [2, 32], strides = [1, 1]} : vector<2x96xf32> to vector<2x32xf32>
    %232 = vector.extract_strided_slice %222 {offsets = [0, 32], sizes = [2, 32], strides = [1, 1]} : vector<2x96xf32> to vector<2x32xf32>
    %233 = arith.addf %231, %232 : vector<2x32xf32>
    %234 = arith.negf %233 : vector<2x32xf32>
    %235 = math.exp %234 : vector<2x32xf32>
    %cst_74 = arith.constant 1.000000e+00 : f32
    %236 = vector.broadcast %cst_74 : f32 to vector<2x32xf32>
    %237 = arith.addf %236, %235 : vector<2x32xf32>
    %238 = arith.divf %236, %237 : vector<2x32xf32>
    %239 = vector.extract_strided_slice %194 {offsets = [0, 64], sizes = [2, 32], strides = [1, 1]} : vector<2x96xf32> to vector<2x32xf32>
    %240 = vector.extract_strided_slice %222 {offsets = [0, 64], sizes = [2, 32], strides = [1, 1]} : vector<2x96xf32> to vector<2x32xf32>
    %241 = vector.broadcast %10 : vector<1x32xf32> to vector<2x32xf32>
    %242 = arith.addf %240, %241 : vector<2x32xf32>
    %243 = arith.mulf %230, %242 : vector<2x32xf32>
    %244 = arith.addf %239, %243 : vector<2x32xf32>
    %245 = math.tanh %244 : vector<2x32xf32>
    %246 = arith.subf %160, %245 : vector<2x32xf32>
    %247 = arith.mulf %238, %246 : vector<2x32xf32>
    %248 = arith.addf %245, %247 : vector<2x32xf32>
    %cst_75 = arith.constant dense<0.000000e+00> : vector<2xf32>
    %249 = vector.multi_reduction <add>, %221, %cst_75 [1] : vector<2x32xf32> to vector<2xf32>
    %250 = vector.shape_cast %249 : vector<2xf32> to vector<2x1xf32>
    %251 = arith.index_cast %c2_i32_63 : i32 to index
    %c0_76 = arith.constant 0 : index
    %c0_77 = arith.constant 0 : index
    %252 = vector.load %arg15[%251, %c0_76, %c0_77] : memref<8x2x1xf32, #tpu.memory_space<vmem>>, vector<1x2x1xf32>
    %253 = vector.shape_cast %252 : vector<1x2x1xf32> to vector<2x1xf32>
    %254 = vector.shape_cast %250 : vector<2x1xf32> to vector<1x2x1xf32>
    tpu.vector_store %arg15[%251, %c0_76, %c0_77], %254 {strides = array<i32>} : memref<8x2x1xf32, #tpu.memory_space<vmem>>, vector<1x2x1xf32>,
    %cst_78 = arith.constant dense<0xFF800000> : vector<2xf32>
    %255 = vector.multi_reduction <maximumf>, %221, %cst_78 [1] : vector<2x32xf32> to vector<2xf32>
    %256 = vector.shape_cast %255 : vector<2xf32> to vector<2x1xf32>
    %257 = arith.index_cast %c2_i32_63 : i32 to index
    %c0_79 = arith.constant 0 : index
    %c0_80 = arith.constant 0 : index
    %258 = vector.load %arg16[%257, %c0_79, %c0_80] : memref<8x2x1xf32, #tpu.memory_space<vmem>>, vector<1x2x1xf32>
    %259 = vector.shape_cast %258 : vector<1x2x1xf32> to vector<2x1xf32>
    %260 = vector.shape_cast %256 : vector<2x1xf32> to vector<1x2x1xf32>
    tpu.vector_store %arg16[%257, %c0_79, %c0_80], %260 {strides = array<i32>} : memref<8x2x1xf32, #tpu.memory_space<vmem>>, vector<1x2x1xf32>,
    %cst_81 = arith.constant dense<0.000000e+00> : vector<2xf32>
    %261 = vector.multi_reduction <add>, %248, %cst_81 [1] : vector<2x32xf32> to vector<2xf32>
    %262 = vector.shape_cast %261 : vector<2xf32> to vector<2x1xf32>
    %263 = arith.index_cast %188 : i32 to index
    %c0_82 = arith.constant 0 : index
    %c0_83 = arith.constant 0 : index
    %264 = vector.load %arg17[%263, %c0_82, %c0_83] : memref<8x2x1xf32, #tpu.memory_space<vmem>>, vector<1x2x1xf32>
    %265 = vector.shape_cast %264 : vector<1x2x1xf32> to vector<2x1xf32>
    %266 = vector.shape_cast %262 : vector<2x1xf32> to vector<1x2x1xf32>
    tpu.vector_store %arg17[%263, %c0_82, %c0_83], %266 {strides = array<i32>} : memref<8x2x1xf32, #tpu.memory_space<vmem>>, vector<1x2x1xf32>,
    %cst_84 = arith.constant dense<0xFF800000> : vector<2xf32>
    %267 = vector.multi_reduction <maximumf>, %248, %cst_84 [1] : vector<2x32xf32> to vector<2xf32>
    %268 = vector.shape_cast %267 : vector<2xf32> to vector<2x1xf32>
    %269 = arith.index_cast %188 : i32 to index
    %c0_85 = arith.constant 0 : index
    %c0_86 = arith.constant 0 : index
    %270 = vector.load %arg18[%269, %c0_85, %c0_86] : memref<8x2x1xf32, #tpu.memory_space<vmem>>, vector<1x2x1xf32>
    %271 = vector.shape_cast %270 : vector<1x2x1xf32> to vector<2x1xf32>
    %272 = vector.shape_cast %268 : vector<2x1xf32> to vector<1x2x1xf32>
    tpu.vector_store %arg18[%269, %c0_85, %c0_86], %272 {strides = array<i32>} : memref<8x2x1xf32, #tpu.memory_space<vmem>>, vector<1x2x1xf32>,
    %c0_i32_87 = arith.constant 0 : i32
    %273 = arith.cmpi eq, %c2_i32_63, %c0_i32_87 : i32
    %274 = arith.extui %273 : i1 to i32
    %c0_i32_88 = arith.constant 0 : i32
    %275 = arith.cmpi ne, %274, %c0_i32_88 : i32
    scf.if %275 {
      %c0_249 = arith.constant 0 : index
      %c0_250 = arith.constant 0 : index
      %748 = vector.load %arg19[%c0_249, %c0_250] : memref<2x32xf32, #tpu.memory_space<vmem>>, vector<2x32xf32>
      tpu.vector_store %arg19[%c0_249, %c0_250], %248 {strides = array<i32>} : memref<2x32xf32, #tpu.memory_space<vmem>>, vector<2x32xf32>,
    } else {
    }
    %c3_i32 = arith.constant 3 : i32
    %c7_i32_89 = arith.constant 7 : i32
    %276 = arith.subi %c7_i32_89, %c3_i32 : i32
    %c2_i32_90 = arith.constant 2 : i32
    %277 = arith.muli %c3_i32, %c2_i32_90 : i32
    %278 = arith.index_cast %277 : i32 to index
    %c0_91 = arith.constant 0 : index
    %279 = vector.load %arg14[%278, %c0_91] : memref<16x192xf32, #tpu.memory_space<vmem>>, vector<2x96xf32>
    %c2_i32_92 = arith.constant 2 : i32
    %280 = arith.muli %276, %c2_i32_92 : i32
    %281 = arith.index_cast %280 : i32 to index
    %c96_93 = arith.constant 96 : index
    %282 = vector.load %arg14[%281, %c96_93] : memref<16x192xf32, #tpu.memory_space<vmem>>, vector<2x96xf32>
    %cst_94 = arith.constant dense<0.000000e+00> : vector<2x96xf32>
    %283 = tpu.matmul %221, %7, %cst_94 {dimension_numbers = #tpu.dot_dimension_numbers<[1], [0], [0], [1], [0, 0, 1, 1], [], []>} : vector<2x32xf32>, vector<32x96xf32>, vector<2x96xf32> -> vector<2x96xf32>
    %284 = vector.extract_strided_slice %279 {offsets = [0, 0], sizes = [2, 32], strides = [1, 1]} : vector<2x96xf32> to vector<2x32xf32>
    %285 = vector.extract_strided_slice %283 {offsets = [0, 0], sizes = [2, 32], strides = [1, 1]} : vector<2x96xf32> to vector<2x32xf32>
    %286 = arith.addf %284, %285 : vector<2x32xf32>
    %287 = arith.negf %286 : vector<2x32xf32>
    %288 = math.exp %287 : vector<2x32xf32>
    %cst_95 = arith.constant 1.000000e+00 : f32
    %289 = vector.broadcast %cst_95 : f32 to vector<2x32xf32>
    %290 = arith.addf %289, %288 : vector<2x32xf32>
    %291 = arith.divf %289, %290 : vector<2x32xf32>
    %292 = vector.extract_strided_slice %279 {offsets = [0, 32], sizes = [2, 32], strides = [1, 1]} : vector<2x96xf32> to vector<2x32xf32>
    %293 = vector.extract_strided_slice %283 {offsets = [0, 32], sizes = [2, 32], strides = [1, 1]} : vector<2x96xf32> to vector<2x32xf32>
    %294 = arith.addf %292, %293 : vector<2x32xf32>
    %295 = arith.negf %294 : vector<2x32xf32>
    %296 = math.exp %295 : vector<2x32xf32>
    %cst_96 = arith.constant 1.000000e+00 : f32
    %297 = vector.broadcast %cst_96 : f32 to vector<2x32xf32>
    %298 = arith.addf %297, %296 : vector<2x32xf32>
    %299 = arith.divf %297, %298 : vector<2x32xf32>
    %300 = vector.extract_strided_slice %279 {offsets = [0, 64], sizes = [2, 32], strides = [1, 1]} : vector<2x96xf32> to vector<2x32xf32>
    %301 = vector.extract_strided_slice %283 {offsets = [0, 64], sizes = [2, 32], strides = [1, 1]} : vector<2x96xf32> to vector<2x32xf32>
    %302 = vector.broadcast %9 : vector<1x32xf32> to vector<2x32xf32>
    %303 = arith.addf %301, %302 : vector<2x32xf32>
    %304 = arith.mulf %291, %303 : vector<2x32xf32>
    %305 = arith.addf %300, %304 : vector<2x32xf32>
    %306 = math.tanh %305 : vector<2x32xf32>
    %307 = arith.subf %221, %306 : vector<2x32xf32>
    %308 = arith.mulf %299, %307 : vector<2x32xf32>
    %309 = arith.addf %306, %308 : vector<2x32xf32>
    %cst_97 = arith.constant dense<0.000000e+00> : vector<2x96xf32>
    %310 = tpu.matmul %248, %8, %cst_97 {dimension_numbers = #tpu.dot_dimension_numbers<[1], [0], [0], [1], [0, 0, 1, 1], [], []>} : vector<2x32xf32>, vector<32x96xf32>, vector<2x96xf32> -> vector<2x96xf32>
    %311 = vector.extract_strided_slice %282 {offsets = [0, 0], sizes = [2, 32], strides = [1, 1]} : vector<2x96xf32> to vector<2x32xf32>
    %312 = vector.extract_strided_slice %310 {offsets = [0, 0], sizes = [2, 32], strides = [1, 1]} : vector<2x96xf32> to vector<2x32xf32>
    %313 = arith.addf %311, %312 : vector<2x32xf32>
    %314 = arith.negf %313 : vector<2x32xf32>
    %315 = math.exp %314 : vector<2x32xf32>
    %cst_98 = arith.constant 1.000000e+00 : f32
    %316 = vector.broadcast %cst_98 : f32 to vector<2x32xf32>
    %317 = arith.addf %316, %315 : vector<2x32xf32>
    %318 = arith.divf %316, %317 : vector<2x32xf32>
    %319 = vector.extract_strided_slice %282 {offsets = [0, 32], sizes = [2, 32], strides = [1, 1]} : vector<2x96xf32> to vector<2x32xf32>
    %320 = vector.extract_strided_slice %310 {offsets = [0, 32], sizes = [2, 32], strides = [1, 1]} : vector<2x96xf32> to vector<2x32xf32>
    %321 = arith.addf %319, %320 : vector<2x32xf32>
    %322 = arith.negf %321 : vector<2x32xf32>
    %323 = math.exp %322 : vector<2x32xf32>
    %cst_99 = arith.constant 1.000000e+00 : f32
    %324 = vector.broadcast %cst_99 : f32 to vector<2x32xf32>
    %325 = arith.addf %324, %323 : vector<2x32xf32>
    %326 = arith.divf %324, %325 : vector<2x32xf32>
    %327 = vector.extract_strided_slice %282 {offsets = [0, 64], sizes = [2, 32], strides = [1, 1]} : vector<2x96xf32> to vector<2x32xf32>
    %328 = vector.extract_strided_slice %310 {offsets = [0, 64], sizes = [2, 32], strides = [1, 1]} : vector<2x96xf32> to vector<2x32xf32>
    %329 = vector.broadcast %10 : vector<1x32xf32> to vector<2x32xf32>
    %330 = arith.addf %328, %329 : vector<2x32xf32>
    %331 = arith.mulf %318, %330 : vector<2x32xf32>
    %332 = arith.addf %327, %331 : vector<2x32xf32>
    %333 = math.tanh %332 : vector<2x32xf32>
    %334 = arith.subf %248, %333 : vector<2x32xf32>
    %335 = arith.mulf %326, %334 : vector<2x32xf32>
    %336 = arith.addf %333, %335 : vector<2x32xf32>
    %cst_100 = arith.constant dense<0.000000e+00> : vector<2xf32>
    %337 = vector.multi_reduction <add>, %309, %cst_100 [1] : vector<2x32xf32> to vector<2xf32>
    %338 = vector.shape_cast %337 : vector<2xf32> to vector<2x1xf32>
    %339 = arith.index_cast %c3_i32 : i32 to index
    %c0_101 = arith.constant 0 : index
    %c0_102 = arith.constant 0 : index
    %340 = vector.load %arg15[%339, %c0_101, %c0_102] : memref<8x2x1xf32, #tpu.memory_space<vmem>>, vector<1x2x1xf32>
    %341 = vector.shape_cast %340 : vector<1x2x1xf32> to vector<2x1xf32>
    %342 = vector.shape_cast %338 : vector<2x1xf32> to vector<1x2x1xf32>
    tpu.vector_store %arg15[%339, %c0_101, %c0_102], %342 {strides = array<i32>} : memref<8x2x1xf32, #tpu.memory_space<vmem>>, vector<1x2x1xf32>,
    %cst_103 = arith.constant dense<0xFF800000> : vector<2xf32>
    %343 = vector.multi_reduction <maximumf>, %309, %cst_103 [1] : vector<2x32xf32> to vector<2xf32>
    %344 = vector.shape_cast %343 : vector<2xf32> to vector<2x1xf32>
    %345 = arith.index_cast %c3_i32 : i32 to index
    %c0_104 = arith.constant 0 : index
    %c0_105 = arith.constant 0 : index
    %346 = vector.load %arg16[%345, %c0_104, %c0_105] : memref<8x2x1xf32, #tpu.memory_space<vmem>>, vector<1x2x1xf32>
    %347 = vector.shape_cast %346 : vector<1x2x1xf32> to vector<2x1xf32>
    %348 = vector.shape_cast %344 : vector<2x1xf32> to vector<1x2x1xf32>
    tpu.vector_store %arg16[%345, %c0_104, %c0_105], %348 {strides = array<i32>} : memref<8x2x1xf32, #tpu.memory_space<vmem>>, vector<1x2x1xf32>,
    %cst_106 = arith.constant dense<0.000000e+00> : vector<2xf32>
    %349 = vector.multi_reduction <add>, %336, %cst_106 [1] : vector<2x32xf32> to vector<2xf32>
    %350 = vector.shape_cast %349 : vector<2xf32> to vector<2x1xf32>
    %351 = arith.index_cast %276 : i32 to index
    %c0_107 = arith.constant 0 : index
    %c0_108 = arith.constant 0 : index
    %352 = vector.load %arg17[%351, %c0_107, %c0_108] : memref<8x2x1xf32, #tpu.memory_space<vmem>>, vector<1x2x1xf32>
    %353 = vector.shape_cast %352 : vector<1x2x1xf32> to vector<2x1xf32>
    %354 = vector.shape_cast %350 : vector<2x1xf32> to vector<1x2x1xf32>
    tpu.vector_store %arg17[%351, %c0_107, %c0_108], %354 {strides = array<i32>} : memref<8x2x1xf32, #tpu.memory_space<vmem>>, vector<1x2x1xf32>,
    %cst_109 = arith.constant dense<0xFF800000> : vector<2xf32>
    %355 = vector.multi_reduction <maximumf>, %336, %cst_109 [1] : vector<2x32xf32> to vector<2xf32>
    %356 = vector.shape_cast %355 : vector<2xf32> to vector<2x1xf32>
    %357 = arith.index_cast %276 : i32 to index
    %c0_110 = arith.constant 0 : index
    %c0_111 = arith.constant 0 : index
    %358 = vector.load %arg18[%357, %c0_110, %c0_111] : memref<8x2x1xf32, #tpu.memory_space<vmem>>, vector<1x2x1xf32>
    %359 = vector.shape_cast %358 : vector<1x2x1xf32> to vector<2x1xf32>
    %360 = vector.shape_cast %356 : vector<2x1xf32> to vector<1x2x1xf32>
    tpu.vector_store %arg18[%357, %c0_110, %c0_111], %360 {strides = array<i32>} : memref<8x2x1xf32, #tpu.memory_space<vmem>>, vector<1x2x1xf32>,
    %c0_i32_112 = arith.constant 0 : i32
    %361 = arith.cmpi eq, %c3_i32, %c0_i32_112 : i32
    %362 = arith.extui %361 : i1 to i32
    %c0_i32_113 = arith.constant 0 : i32
    %363 = arith.cmpi ne, %362, %c0_i32_113 : i32
    scf.if %363 {
      %c0_249 = arith.constant 0 : index
      %c0_250 = arith.constant 0 : index
      %748 = vector.load %arg19[%c0_249, %c0_250] : memref<2x32xf32, #tpu.memory_space<vmem>>, vector<2x32xf32>
      tpu.vector_store %arg19[%c0_249, %c0_250], %336 {strides = array<i32>} : memref<2x32xf32, #tpu.memory_space<vmem>>, vector<2x32xf32>,
    } else {
    }
    %c4_i32 = arith.constant 4 : i32
    %c7_i32_114 = arith.constant 7 : i32
    %364 = arith.subi %c7_i32_114, %c4_i32 : i32
    %c2_i32_115 = arith.constant 2 : i32
    %365 = arith.muli %c4_i32, %c2_i32_115 : i32
    %366 = arith.index_cast %365 : i32 to index
    %c0_116 = arith.constant 0 : index
    %367 = vector.load %arg14[%366, %c0_116] : memref<16x192xf32, #tpu.memory_space<vmem>>, vector<2x96xf32>
    %c2_i32_117 = arith.constant 2 : i32
    %368 = arith.muli %364, %c2_i32_117 : i32
    %369 = arith.index_cast %368 : i32 to index
    %c96_118 = arith.constant 96 : index
    %370 = vector.load %arg14[%369, %c96_118] : memref<16x192xf32, #tpu.memory_space<vmem>>, vector<2x96xf32>
    %cst_119 = arith.constant dense<0.000000e+00> : vector<2x96xf32>
    %371 = tpu.matmul %309, %7, %cst_119 {dimension_numbers = #tpu.dot_dimension_numbers<[1], [0], [0], [1], [0, 0, 1, 1], [], []>} : vector<2x32xf32>, vector<32x96xf32>, vector<2x96xf32> -> vector<2x96xf32>
    %372 = vector.extract_strided_slice %367 {offsets = [0, 0], sizes = [2, 32], strides = [1, 1]} : vector<2x96xf32> to vector<2x32xf32>
    %373 = vector.extract_strided_slice %371 {offsets = [0, 0], sizes = [2, 32], strides = [1, 1]} : vector<2x96xf32> to vector<2x32xf32>
    %374 = arith.addf %372, %373 : vector<2x32xf32>
    %375 = arith.negf %374 : vector<2x32xf32>
    %376 = math.exp %375 : vector<2x32xf32>
    %cst_120 = arith.constant 1.000000e+00 : f32
    %377 = vector.broadcast %cst_120 : f32 to vector<2x32xf32>
    %378 = arith.addf %377, %376 : vector<2x32xf32>
    %379 = arith.divf %377, %378 : vector<2x32xf32>
    %380 = vector.extract_strided_slice %367 {offsets = [0, 32], sizes = [2, 32], strides = [1, 1]} : vector<2x96xf32> to vector<2x32xf32>
    %381 = vector.extract_strided_slice %371 {offsets = [0, 32], sizes = [2, 32], strides = [1, 1]} : vector<2x96xf32> to vector<2x32xf32>
    %382 = arith.addf %380, %381 : vector<2x32xf32>
    %383 = arith.negf %382 : vector<2x32xf32>
    %384 = math.exp %383 : vector<2x32xf32>
    %cst_121 = arith.constant 1.000000e+00 : f32
    %385 = vector.broadcast %cst_121 : f32 to vector<2x32xf32>
    %386 = arith.addf %385, %384 : vector<2x32xf32>
    %387 = arith.divf %385, %386 : vector<2x32xf32>
    %388 = vector.extract_strided_slice %367 {offsets = [0, 64], sizes = [2, 32], strides = [1, 1]} : vector<2x96xf32> to vector<2x32xf32>
    %389 = vector.extract_strided_slice %371 {offsets = [0, 64], sizes = [2, 32], strides = [1, 1]} : vector<2x96xf32> to vector<2x32xf32>
    %390 = vector.broadcast %9 : vector<1x32xf32> to vector<2x32xf32>
    %391 = arith.addf %389, %390 : vector<2x32xf32>
    %392 = arith.mulf %379, %391 : vector<2x32xf32>
    %393 = arith.addf %388, %392 : vector<2x32xf32>
    %394 = math.tanh %393 : vector<2x32xf32>
    %395 = arith.subf %309, %394 : vector<2x32xf32>
    %396 = arith.mulf %387, %395 : vector<2x32xf32>
    %397 = arith.addf %394, %396 : vector<2x32xf32>
    %cst_122 = arith.constant dense<0.000000e+00> : vector<2x96xf32>
    %398 = tpu.matmul %336, %8, %cst_122 {dimension_numbers = #tpu.dot_dimension_numbers<[1], [0], [0], [1], [0, 0, 1, 1], [], []>} : vector<2x32xf32>, vector<32x96xf32>, vector<2x96xf32> -> vector<2x96xf32>
    %399 = vector.extract_strided_slice %370 {offsets = [0, 0], sizes = [2, 32], strides = [1, 1]} : vector<2x96xf32> to vector<2x32xf32>
    %400 = vector.extract_strided_slice %398 {offsets = [0, 0], sizes = [2, 32], strides = [1, 1]} : vector<2x96xf32> to vector<2x32xf32>
    %401 = arith.addf %399, %400 : vector<2x32xf32>
    %402 = arith.negf %401 : vector<2x32xf32>
    %403 = math.exp %402 : vector<2x32xf32>
    %cst_123 = arith.constant 1.000000e+00 : f32
    %404 = vector.broadcast %cst_123 : f32 to vector<2x32xf32>
    %405 = arith.addf %404, %403 : vector<2x32xf32>
    %406 = arith.divf %404, %405 : vector<2x32xf32>
    %407 = vector.extract_strided_slice %370 {offsets = [0, 32], sizes = [2, 32], strides = [1, 1]} : vector<2x96xf32> to vector<2x32xf32>
    %408 = vector.extract_strided_slice %398 {offsets = [0, 32], sizes = [2, 32], strides = [1, 1]} : vector<2x96xf32> to vector<2x32xf32>
    %409 = arith.addf %407, %408 : vector<2x32xf32>
    %410 = arith.negf %409 : vector<2x32xf32>
    %411 = math.exp %410 : vector<2x32xf32>
    %cst_124 = arith.constant 1.000000e+00 : f32
    %412 = vector.broadcast %cst_124 : f32 to vector<2x32xf32>
    %413 = arith.addf %412, %411 : vector<2x32xf32>
    %414 = arith.divf %412, %413 : vector<2x32xf32>
    %415 = vector.extract_strided_slice %370 {offsets = [0, 64], sizes = [2, 32], strides = [1, 1]} : vector<2x96xf32> to vector<2x32xf32>
    %416 = vector.extract_strided_slice %398 {offsets = [0, 64], sizes = [2, 32], strides = [1, 1]} : vector<2x96xf32> to vector<2x32xf32>
    %417 = vector.broadcast %10 : vector<1x32xf32> to vector<2x32xf32>
    %418 = arith.addf %416, %417 : vector<2x32xf32>
    %419 = arith.mulf %406, %418 : vector<2x32xf32>
    %420 = arith.addf %415, %419 : vector<2x32xf32>
    %421 = math.tanh %420 : vector<2x32xf32>
    %422 = arith.subf %336, %421 : vector<2x32xf32>
    %423 = arith.mulf %414, %422 : vector<2x32xf32>
    %424 = arith.addf %421, %423 : vector<2x32xf32>
    %cst_125 = arith.constant dense<0.000000e+00> : vector<2xf32>
    %425 = vector.multi_reduction <add>, %397, %cst_125 [1] : vector<2x32xf32> to vector<2xf32>
    %426 = vector.shape_cast %425 : vector<2xf32> to vector<2x1xf32>
    %427 = arith.index_cast %c4_i32 : i32 to index
    %c0_126 = arith.constant 0 : index
    %c0_127 = arith.constant 0 : index
    %428 = vector.load %arg15[%427, %c0_126, %c0_127] : memref<8x2x1xf32, #tpu.memory_space<vmem>>, vector<1x2x1xf32>
    %429 = vector.shape_cast %428 : vector<1x2x1xf32> to vector<2x1xf32>
    %430 = vector.shape_cast %426 : vector<2x1xf32> to vector<1x2x1xf32>
    tpu.vector_store %arg15[%427, %c0_126, %c0_127], %430 {strides = array<i32>} : memref<8x2x1xf32, #tpu.memory_space<vmem>>, vector<1x2x1xf32>,
    %cst_128 = arith.constant dense<0xFF800000> : vector<2xf32>
    %431 = vector.multi_reduction <maximumf>, %397, %cst_128 [1] : vector<2x32xf32> to vector<2xf32>
    %432 = vector.shape_cast %431 : vector<2xf32> to vector<2x1xf32>
    %433 = arith.index_cast %c4_i32 : i32 to index
    %c0_129 = arith.constant 0 : index
    %c0_130 = arith.constant 0 : index
    %434 = vector.load %arg16[%433, %c0_129, %c0_130] : memref<8x2x1xf32, #tpu.memory_space<vmem>>, vector<1x2x1xf32>
    %435 = vector.shape_cast %434 : vector<1x2x1xf32> to vector<2x1xf32>
    %436 = vector.shape_cast %432 : vector<2x1xf32> to vector<1x2x1xf32>
    tpu.vector_store %arg16[%433, %c0_129, %c0_130], %436 {strides = array<i32>} : memref<8x2x1xf32, #tpu.memory_space<vmem>>, vector<1x2x1xf32>,
    %cst_131 = arith.constant dense<0.000000e+00> : vector<2xf32>
    %437 = vector.multi_reduction <add>, %424, %cst_131 [1] : vector<2x32xf32> to vector<2xf32>
    %438 = vector.shape_cast %437 : vector<2xf32> to vector<2x1xf32>
    %439 = arith.index_cast %364 : i32 to index
    %c0_132 = arith.constant 0 : index
    %c0_133 = arith.constant 0 : index
    %440 = vector.load %arg17[%439, %c0_132, %c0_133] : memref<8x2x1xf32, #tpu.memory_space<vmem>>, vector<1x2x1xf32>
    %441 = vector.shape_cast %440 : vector<1x2x1xf32> to vector<2x1xf32>
    %442 = vector.shape_cast %438 : vector<2x1xf32> to vector<1x2x1xf32>
    tpu.vector_store %arg17[%439, %c0_132, %c0_133], %442 {strides = array<i32>} : memref<8x2x1xf32, #tpu.memory_space<vmem>>, vector<1x2x1xf32>,
    %cst_134 = arith.constant dense<0xFF800000> : vector<2xf32>
    %443 = vector.multi_reduction <maximumf>, %424, %cst_134 [1] : vector<2x32xf32> to vector<2xf32>
    %444 = vector.shape_cast %443 : vector<2xf32> to vector<2x1xf32>
    %445 = arith.index_cast %364 : i32 to index
    %c0_135 = arith.constant 0 : index
    %c0_136 = arith.constant 0 : index
    %446 = vector.load %arg18[%445, %c0_135, %c0_136] : memref<8x2x1xf32, #tpu.memory_space<vmem>>, vector<1x2x1xf32>
    %447 = vector.shape_cast %446 : vector<1x2x1xf32> to vector<2x1xf32>
    %448 = vector.shape_cast %444 : vector<2x1xf32> to vector<1x2x1xf32>
    tpu.vector_store %arg18[%445, %c0_135, %c0_136], %448 {strides = array<i32>} : memref<8x2x1xf32, #tpu.memory_space<vmem>>, vector<1x2x1xf32>,
    %c0_i32_137 = arith.constant 0 : i32
    %449 = arith.cmpi eq, %c4_i32, %c0_i32_137 : i32
    %450 = arith.extui %449 : i1 to i32
    %c0_i32_138 = arith.constant 0 : i32
    %451 = arith.cmpi ne, %450, %c0_i32_138 : i32
    scf.if %451 {
      %c0_249 = arith.constant 0 : index
      %c0_250 = arith.constant 0 : index
      %748 = vector.load %arg19[%c0_249, %c0_250] : memref<2x32xf32, #tpu.memory_space<vmem>>, vector<2x32xf32>
      tpu.vector_store %arg19[%c0_249, %c0_250], %424 {strides = array<i32>} : memref<2x32xf32, #tpu.memory_space<vmem>>, vector<2x32xf32>,
    } else {
    }
    %c5_i32 = arith.constant 5 : i32
    %c7_i32_139 = arith.constant 7 : i32
    %452 = arith.subi %c7_i32_139, %c5_i32 : i32
    %c2_i32_140 = arith.constant 2 : i32
    %453 = arith.muli %c5_i32, %c2_i32_140 : i32
    %454 = arith.index_cast %453 : i32 to index
    %c0_141 = arith.constant 0 : index
    %455 = vector.load %arg14[%454, %c0_141] : memref<16x192xf32, #tpu.memory_space<vmem>>, vector<2x96xf32>
    %c2_i32_142 = arith.constant 2 : i32
    %456 = arith.muli %452, %c2_i32_142 : i32
    %457 = arith.index_cast %456 : i32 to index
    %c96_143 = arith.constant 96 : index
    %458 = vector.load %arg14[%457, %c96_143] : memref<16x192xf32, #tpu.memory_space<vmem>>, vector<2x96xf32>
    %cst_144 = arith.constant dense<0.000000e+00> : vector<2x96xf32>
    %459 = tpu.matmul %397, %7, %cst_144 {dimension_numbers = #tpu.dot_dimension_numbers<[1], [0], [0], [1], [0, 0, 1, 1], [], []>} : vector<2x32xf32>, vector<32x96xf32>, vector<2x96xf32> -> vector<2x96xf32>
    %460 = vector.extract_strided_slice %455 {offsets = [0, 0], sizes = [2, 32], strides = [1, 1]} : vector<2x96xf32> to vector<2x32xf32>
    %461 = vector.extract_strided_slice %459 {offsets = [0, 0], sizes = [2, 32], strides = [1, 1]} : vector<2x96xf32> to vector<2x32xf32>
    %462 = arith.addf %460, %461 : vector<2x32xf32>
    %463 = arith.negf %462 : vector<2x32xf32>
    %464 = math.exp %463 : vector<2x32xf32>
    %cst_145 = arith.constant 1.000000e+00 : f32
    %465 = vector.broadcast %cst_145 : f32 to vector<2x32xf32>
    %466 = arith.addf %465, %464 : vector<2x32xf32>
    %467 = arith.divf %465, %466 : vector<2x32xf32>
    %468 = vector.extract_strided_slice %455 {offsets = [0, 32], sizes = [2, 32], strides = [1, 1]} : vector<2x96xf32> to vector<2x32xf32>
    %469 = vector.extract_strided_slice %459 {offsets = [0, 32], sizes = [2, 32], strides = [1, 1]} : vector<2x96xf32> to vector<2x32xf32>
    %470 = arith.addf %468, %469 : vector<2x32xf32>
    %471 = arith.negf %470 : vector<2x32xf32>
    %472 = math.exp %471 : vector<2x32xf32>
    %cst_146 = arith.constant 1.000000e+00 : f32
    %473 = vector.broadcast %cst_146 : f32 to vector<2x32xf32>
    %474 = arith.addf %473, %472 : vector<2x32xf32>
    %475 = arith.divf %473, %474 : vector<2x32xf32>
    %476 = vector.extract_strided_slice %455 {offsets = [0, 64], sizes = [2, 32], strides = [1, 1]} : vector<2x96xf32> to vector<2x32xf32>
    %477 = vector.extract_strided_slice %459 {offsets = [0, 64], sizes = [2, 32], strides = [1, 1]} : vector<2x96xf32> to vector<2x32xf32>
    %478 = vector.broadcast %9 : vector<1x32xf32> to vector<2x32xf32>
    %479 = arith.addf %477, %478 : vector<2x32xf32>
    %480 = arith.mulf %467, %479 : vector<2x32xf32>
    %481 = arith.addf %476, %480 : vector<2x32xf32>
    %482 = math.tanh %481 : vector<2x32xf32>
    %483 = arith.subf %397, %482 : vector<2x32xf32>
    %484 = arith.mulf %475, %483 : vector<2x32xf32>
    %485 = arith.addf %482, %484 : vector<2x32xf32>
    %cst_147 = arith.constant dense<0.000000e+00> : vector<2x96xf32>
    %486 = tpu.matmul %424, %8, %cst_147 {dimension_numbers = #tpu.dot_dimension_numbers<[1], [0], [0], [1], [0, 0, 1, 1], [], []>} : vector<2x32xf32>, vector<32x96xf32>, vector<2x96xf32> -> vector<2x96xf32>
    %487 = vector.extract_strided_slice %458 {offsets = [0, 0], sizes = [2, 32], strides = [1, 1]} : vector<2x96xf32> to vector<2x32xf32>
    %488 = vector.extract_strided_slice %486 {offsets = [0, 0], sizes = [2, 32], strides = [1, 1]} : vector<2x96xf32> to vector<2x32xf32>
    %489 = arith.addf %487, %488 : vector<2x32xf32>
    %490 = arith.negf %489 : vector<2x32xf32>
    %491 = math.exp %490 : vector<2x32xf32>
    %cst_148 = arith.constant 1.000000e+00 : f32
    %492 = vector.broadcast %cst_148 : f32 to vector<2x32xf32>
    %493 = arith.addf %492, %491 : vector<2x32xf32>
    %494 = arith.divf %492, %493 : vector<2x32xf32>
    %495 = vector.extract_strided_slice %458 {offsets = [0, 32], sizes = [2, 32], strides = [1, 1]} : vector<2x96xf32> to vector<2x32xf32>
    %496 = vector.extract_strided_slice %486 {offsets = [0, 32], sizes = [2, 32], strides = [1, 1]} : vector<2x96xf32> to vector<2x32xf32>
    %497 = arith.addf %495, %496 : vector<2x32xf32>
    %498 = arith.negf %497 : vector<2x32xf32>
    %499 = math.exp %498 : vector<2x32xf32>
    %cst_149 = arith.constant 1.000000e+00 : f32
    %500 = vector.broadcast %cst_149 : f32 to vector<2x32xf32>
    %501 = arith.addf %500, %499 : vector<2x32xf32>
    %502 = arith.divf %500, %501 : vector<2x32xf32>
    %503 = vector.extract_strided_slice %458 {offsets = [0, 64], sizes = [2, 32], strides = [1, 1]} : vector<2x96xf32> to vector<2x32xf32>
    %504 = vector.extract_strided_slice %486 {offsets = [0, 64], sizes = [2, 32], strides = [1, 1]} : vector<2x96xf32> to vector<2x32xf32>
    %505 = vector.broadcast %10 : vector<1x32xf32> to vector<2x32xf32>
    %506 = arith.addf %504, %505 : vector<2x32xf32>
    %507 = arith.mulf %494, %506 : vector<2x32xf32>
    %508 = arith.addf %503, %507 : vector<2x32xf32>
    %509 = math.tanh %508 : vector<2x32xf32>
    %510 = arith.subf %424, %509 : vector<2x32xf32>
    %511 = arith.mulf %502, %510 : vector<2x32xf32>
    %512 = arith.addf %509, %511 : vector<2x32xf32>
    %cst_150 = arith.constant dense<0.000000e+00> : vector<2xf32>
    %513 = vector.multi_reduction <add>, %485, %cst_150 [1] : vector<2x32xf32> to vector<2xf32>
    %514 = vector.shape_cast %513 : vector<2xf32> to vector<2x1xf32>
    %515 = arith.index_cast %c5_i32 : i32 to index
    %c0_151 = arith.constant 0 : index
    %c0_152 = arith.constant 0 : index
    %516 = vector.load %arg15[%515, %c0_151, %c0_152] : memref<8x2x1xf32, #tpu.memory_space<vmem>>, vector<1x2x1xf32>
    %517 = vector.shape_cast %516 : vector<1x2x1xf32> to vector<2x1xf32>
    %518 = vector.shape_cast %514 : vector<2x1xf32> to vector<1x2x1xf32>
    tpu.vector_store %arg15[%515, %c0_151, %c0_152], %518 {strides = array<i32>} : memref<8x2x1xf32, #tpu.memory_space<vmem>>, vector<1x2x1xf32>,
    %cst_153 = arith.constant dense<0xFF800000> : vector<2xf32>
    %519 = vector.multi_reduction <maximumf>, %485, %cst_153 [1] : vector<2x32xf32> to vector<2xf32>
    %520 = vector.shape_cast %519 : vector<2xf32> to vector<2x1xf32>
    %521 = arith.index_cast %c5_i32 : i32 to index
    %c0_154 = arith.constant 0 : index
    %c0_155 = arith.constant 0 : index
    %522 = vector.load %arg16[%521, %c0_154, %c0_155] : memref<8x2x1xf32, #tpu.memory_space<vmem>>, vector<1x2x1xf32>
    %523 = vector.shape_cast %522 : vector<1x2x1xf32> to vector<2x1xf32>
    %524 = vector.shape_cast %520 : vector<2x1xf32> to vector<1x2x1xf32>
    tpu.vector_store %arg16[%521, %c0_154, %c0_155], %524 {strides = array<i32>} : memref<8x2x1xf32, #tpu.memory_space<vmem>>, vector<1x2x1xf32>,
    %cst_156 = arith.constant dense<0.000000e+00> : vector<2xf32>
    %525 = vector.multi_reduction <add>, %512, %cst_156 [1] : vector<2x32xf32> to vector<2xf32>
    %526 = vector.shape_cast %525 : vector<2xf32> to vector<2x1xf32>
    %527 = arith.index_cast %452 : i32 to index
    %c0_157 = arith.constant 0 : index
    %c0_158 = arith.constant 0 : index
    %528 = vector.load %arg17[%527, %c0_157, %c0_158] : memref<8x2x1xf32, #tpu.memory_space<vmem>>, vector<1x2x1xf32>
    %529 = vector.shape_cast %528 : vector<1x2x1xf32> to vector<2x1xf32>
    %530 = vector.shape_cast %526 : vector<2x1xf32> to vector<1x2x1xf32>
    tpu.vector_store %arg17[%527, %c0_157, %c0_158], %530 {strides = array<i32>} : memref<8x2x1xf32, #tpu.memory_space<vmem>>, vector<1x2x1xf32>,
    %cst_159 = arith.constant dense<0xFF800000> : vector<2xf32>
    %531 = vector.multi_reduction <maximumf>, %512, %cst_159 [1] : vector<2x32xf32> to vector<2xf32>
    %532 = vector.shape_cast %531 : vector<2xf32> to vector<2x1xf32>
    %533 = arith.index_cast %452 : i32 to index
    %c0_160 = arith.constant 0 : index
    %c0_161 = arith.constant 0 : index
    %534 = vector.load %arg18[%533, %c0_160, %c0_161] : memref<8x2x1xf32, #tpu.memory_space<vmem>>, vector<1x2x1xf32>
    %535 = vector.shape_cast %534 : vector<1x2x1xf32> to vector<2x1xf32>
    %536 = vector.shape_cast %532 : vector<2x1xf32> to vector<1x2x1xf32>
    tpu.vector_store %arg18[%533, %c0_160, %c0_161], %536 {strides = array<i32>} : memref<8x2x1xf32, #tpu.memory_space<vmem>>, vector<1x2x1xf32>,
    %c0_i32_162 = arith.constant 0 : i32
    %537 = arith.cmpi eq, %c5_i32, %c0_i32_162 : i32
    %538 = arith.extui %537 : i1 to i32
    %c0_i32_163 = arith.constant 0 : i32
    %539 = arith.cmpi ne, %538, %c0_i32_163 : i32
    scf.if %539 {
      %c0_249 = arith.constant 0 : index
      %c0_250 = arith.constant 0 : index
      %748 = vector.load %arg19[%c0_249, %c0_250] : memref<2x32xf32, #tpu.memory_space<vmem>>, vector<2x32xf32>
      tpu.vector_store %arg19[%c0_249, %c0_250], %512 {strides = array<i32>} : memref<2x32xf32, #tpu.memory_space<vmem>>, vector<2x32xf32>,
    } else {
    }
    %c6_i32 = arith.constant 6 : i32
    %c7_i32_164 = arith.constant 7 : i32
    %540 = arith.subi %c7_i32_164, %c6_i32 : i32
    %c2_i32_165 = arith.constant 2 : i32
    %541 = arith.muli %c6_i32, %c2_i32_165 : i32
    %542 = arith.index_cast %541 : i32 to index
    %c0_166 = arith.constant 0 : index
    %543 = vector.load %arg14[%542, %c0_166] : memref<16x192xf32, #tpu.memory_space<vmem>>, vector<2x96xf32>
    %c2_i32_167 = arith.constant 2 : i32
    %544 = arith.muli %540, %c2_i32_167 : i32
    %545 = arith.index_cast %544 : i32 to index
    %c96_168 = arith.constant 96 : index
    %546 = vector.load %arg14[%545, %c96_168] : memref<16x192xf32, #tpu.memory_space<vmem>>, vector<2x96xf32>
    %cst_169 = arith.constant dense<0.000000e+00> : vector<2x96xf32>
    %547 = tpu.matmul %485, %7, %cst_169 {dimension_numbers = #tpu.dot_dimension_numbers<[1], [0], [0], [1], [0, 0, 1, 1], [], []>} : vector<2x32xf32>, vector<32x96xf32>, vector<2x96xf32> -> vector<2x96xf32>
    %548 = vector.extract_strided_slice %543 {offsets = [0, 0], sizes = [2, 32], strides = [1, 1]} : vector<2x96xf32> to vector<2x32xf32>
    %549 = vector.extract_strided_slice %547 {offsets = [0, 0], sizes = [2, 32], strides = [1, 1]} : vector<2x96xf32> to vector<2x32xf32>
    %550 = arith.addf %548, %549 : vector<2x32xf32>
    %551 = arith.negf %550 : vector<2x32xf32>
    %552 = math.exp %551 : vector<2x32xf32>
    %cst_170 = arith.constant 1.000000e+00 : f32
    %553 = vector.broadcast %cst_170 : f32 to vector<2x32xf32>
    %554 = arith.addf %553, %552 : vector<2x32xf32>
    %555 = arith.divf %553, %554 : vector<2x32xf32>
    %556 = vector.extract_strided_slice %543 {offsets = [0, 32], sizes = [2, 32], strides = [1, 1]} : vector<2x96xf32> to vector<2x32xf32>
    %557 = vector.extract_strided_slice %547 {offsets = [0, 32], sizes = [2, 32], strides = [1, 1]} : vector<2x96xf32> to vector<2x32xf32>
    %558 = arith.addf %556, %557 : vector<2x32xf32>
    %559 = arith.negf %558 : vector<2x32xf32>
    %560 = math.exp %559 : vector<2x32xf32>
    %cst_171 = arith.constant 1.000000e+00 : f32
    %561 = vector.broadcast %cst_171 : f32 to vector<2x32xf32>
    %562 = arith.addf %561, %560 : vector<2x32xf32>
    %563 = arith.divf %561, %562 : vector<2x32xf32>
    %564 = vector.extract_strided_slice %543 {offsets = [0, 64], sizes = [2, 32], strides = [1, 1]} : vector<2x96xf32> to vector<2x32xf32>
    %565 = vector.extract_strided_slice %547 {offsets = [0, 64], sizes = [2, 32], strides = [1, 1]} : vector<2x96xf32> to vector<2x32xf32>
    %566 = vector.broadcast %9 : vector<1x32xf32> to vector<2x32xf32>
    %567 = arith.addf %565, %566 : vector<2x32xf32>
    %568 = arith.mulf %555, %567 : vector<2x32xf32>
    %569 = arith.addf %564, %568 : vector<2x32xf32>
    %570 = math.tanh %569 : vector<2x32xf32>
    %571 = arith.subf %485, %570 : vector<2x32xf32>
    %572 = arith.mulf %563, %571 : vector<2x32xf32>
    %573 = arith.addf %570, %572 : vector<2x32xf32>
    %cst_172 = arith.constant dense<0.000000e+00> : vector<2x96xf32>
    %574 = tpu.matmul %512, %8, %cst_172 {dimension_numbers = #tpu.dot_dimension_numbers<[1], [0], [0], [1], [0, 0, 1, 1], [], []>} : vector<2x32xf32>, vector<32x96xf32>, vector<2x96xf32> -> vector<2x96xf32>
    %575 = vector.extract_strided_slice %546 {offsets = [0, 0], sizes = [2, 32], strides = [1, 1]} : vector<2x96xf32> to vector<2x32xf32>
    %576 = vector.extract_strided_slice %574 {offsets = [0, 0], sizes = [2, 32], strides = [1, 1]} : vector<2x96xf32> to vector<2x32xf32>
    %577 = arith.addf %575, %576 : vector<2x32xf32>
    %578 = arith.negf %577 : vector<2x32xf32>
    %579 = math.exp %578 : vector<2x32xf32>
    %cst_173 = arith.constant 1.000000e+00 : f32
    %580 = vector.broadcast %cst_173 : f32 to vector<2x32xf32>
    %581 = arith.addf %580, %579 : vector<2x32xf32>
    %582 = arith.divf %580, %581 : vector<2x32xf32>
    %583 = vector.extract_strided_slice %546 {offsets = [0, 32], sizes = [2, 32], strides = [1, 1]} : vector<2x96xf32> to vector<2x32xf32>
    %584 = vector.extract_strided_slice %574 {offsets = [0, 32], sizes = [2, 32], strides = [1, 1]} : vector<2x96xf32> to vector<2x32xf32>
    %585 = arith.addf %583, %584 : vector<2x32xf32>
    %586 = arith.negf %585 : vector<2x32xf32>
    %587 = math.exp %586 : vector<2x32xf32>
    %cst_174 = arith.constant 1.000000e+00 : f32
    %588 = vector.broadcast %cst_174 : f32 to vector<2x32xf32>
    %589 = arith.addf %588, %587 : vector<2x32xf32>
    %590 = arith.divf %588, %589 : vector<2x32xf32>
    %591 = vector.extract_strided_slice %546 {offsets = [0, 64], sizes = [2, 32], strides = [1, 1]} : vector<2x96xf32> to vector<2x32xf32>
    %592 = vector.extract_strided_slice %574 {offsets = [0, 64], sizes = [2, 32], strides = [1, 1]} : vector<2x96xf32> to vector<2x32xf32>
    %593 = vector.broadcast %10 : vector<1x32xf32> to vector<2x32xf32>
    %594 = arith.addf %592, %593 : vector<2x32xf32>
    %595 = arith.mulf %582, %594 : vector<2x32xf32>
    %596 = arith.addf %591, %595 : vector<2x32xf32>
    %597 = math.tanh %596 : vector<2x32xf32>
    %598 = arith.subf %512, %597 : vector<2x32xf32>
    %599 = arith.mulf %590, %598 : vector<2x32xf32>
    %600 = arith.addf %597, %599 : vector<2x32xf32>
    %cst_175 = arith.constant dense<0.000000e+00> : vector<2xf32>
    %601 = vector.multi_reduction <add>, %573, %cst_175 [1] : vector<2x32xf32> to vector<2xf32>
    %602 = vector.shape_cast %601 : vector<2xf32> to vector<2x1xf32>
    %603 = arith.index_cast %c6_i32 : i32 to index
    %c0_176 = arith.constant 0 : index
    %c0_177 = arith.constant 0 : index
    %604 = vector.load %arg15[%603, %c0_176, %c0_177] : memref<8x2x1xf32, #tpu.memory_space<vmem>>, vector<1x2x1xf32>
    %605 = vector.shape_cast %604 : vector<1x2x1xf32> to vector<2x1xf32>
    %606 = vector.shape_cast %602 : vector<2x1xf32> to vector<1x2x1xf32>
    tpu.vector_store %arg15[%603, %c0_176, %c0_177], %606 {strides = array<i32>} : memref<8x2x1xf32, #tpu.memory_space<vmem>>, vector<1x2x1xf32>,
    %cst_178 = arith.constant dense<0xFF800000> : vector<2xf32>
    %607 = vector.multi_reduction <maximumf>, %573, %cst_178 [1] : vector<2x32xf32> to vector<2xf32>
    %608 = vector.shape_cast %607 : vector<2xf32> to vector<2x1xf32>
    %609 = arith.index_cast %c6_i32 : i32 to index
    %c0_179 = arith.constant 0 : index
    %c0_180 = arith.constant 0 : index
    %610 = vector.load %arg16[%609, %c0_179, %c0_180] : memref<8x2x1xf32, #tpu.memory_space<vmem>>, vector<1x2x1xf32>
    %611 = vector.shape_cast %610 : vector<1x2x1xf32> to vector<2x1xf32>
    %612 = vector.shape_cast %608 : vector<2x1xf32> to vector<1x2x1xf32>
    tpu.vector_store %arg16[%609, %c0_179, %c0_180], %612 {strides = array<i32>} : memref<8x2x1xf32, #tpu.memory_space<vmem>>, vector<1x2x1xf32>,
    %cst_181 = arith.constant dense<0.000000e+00> : vector<2xf32>
    %613 = vector.multi_reduction <add>, %600, %cst_181 [1] : vector<2x32xf32> to vector<2xf32>
    %614 = vector.shape_cast %613 : vector<2xf32> to vector<2x1xf32>
    %615 = arith.index_cast %540 : i32 to index
    %c0_182 = arith.constant 0 : index
    %c0_183 = arith.constant 0 : index
    %616 = vector.load %arg17[%615, %c0_182, %c0_183] : memref<8x2x1xf32, #tpu.memory_space<vmem>>, vector<1x2x1xf32>
    %617 = vector.shape_cast %616 : vector<1x2x1xf32> to vector<2x1xf32>
    %618 = vector.shape_cast %614 : vector<2x1xf32> to vector<1x2x1xf32>
    tpu.vector_store %arg17[%615, %c0_182, %c0_183], %618 {strides = array<i32>} : memref<8x2x1xf32, #tpu.memory_space<vmem>>, vector<1x2x1xf32>,
    %cst_184 = arith.constant dense<0xFF800000> : vector<2xf32>
    %619 = vector.multi_reduction <maximumf>, %600, %cst_184 [1] : vector<2x32xf32> to vector<2xf32>
    %620 = vector.shape_cast %619 : vector<2xf32> to vector<2x1xf32>
    %621 = arith.index_cast %540 : i32 to index
    %c0_185 = arith.constant 0 : index
    %c0_186 = arith.constant 0 : index
    %622 = vector.load %arg18[%621, %c0_185, %c0_186] : memref<8x2x1xf32, #tpu.memory_space<vmem>>, vector<1x2x1xf32>
    %623 = vector.shape_cast %622 : vector<1x2x1xf32> to vector<2x1xf32>
    %624 = vector.shape_cast %620 : vector<2x1xf32> to vector<1x2x1xf32>
    tpu.vector_store %arg18[%621, %c0_185, %c0_186], %624 {strides = array<i32>} : memref<8x2x1xf32, #tpu.memory_space<vmem>>, vector<1x2x1xf32>,
    %c0_i32_187 = arith.constant 0 : i32
    %625 = arith.cmpi eq, %c6_i32, %c0_i32_187 : i32
    %626 = arith.extui %625 : i1 to i32
    %c0_i32_188 = arith.constant 0 : i32
    %627 = arith.cmpi ne, %626, %c0_i32_188 : i32
    scf.if %627 {
      %c0_249 = arith.constant 0 : index
      %c0_250 = arith.constant 0 : index
      %748 = vector.load %arg19[%c0_249, %c0_250] : memref<2x32xf32, #tpu.memory_space<vmem>>, vector<2x32xf32>
      tpu.vector_store %arg19[%c0_249, %c0_250], %600 {strides = array<i32>} : memref<2x32xf32, #tpu.memory_space<vmem>>, vector<2x32xf32>,
    } else {
    }
    %c7_i32_189 = arith.constant 7 : i32
    %c7_i32_190 = arith.constant 7 : i32
    %628 = arith.subi %c7_i32_190, %c7_i32_189 : i32
    %c2_i32_191 = arith.constant 2 : i32
    %629 = arith.muli %c7_i32_189, %c2_i32_191 : i32
    %630 = arith.index_cast %629 : i32 to index
    %c0_192 = arith.constant 0 : index
    %631 = vector.load %arg14[%630, %c0_192] : memref<16x192xf32, #tpu.memory_space<vmem>>, vector<2x96xf32>
    %c2_i32_193 = arith.constant 2 : i32
    %632 = arith.muli %628, %c2_i32_193 : i32
    %633 = arith.index_cast %632 : i32 to index
    %c96_194 = arith.constant 96 : index
    %634 = vector.load %arg14[%633, %c96_194] : memref<16x192xf32, #tpu.memory_space<vmem>>, vector<2x96xf32>
    %cst_195 = arith.constant dense<0.000000e+00> : vector<2x96xf32>
    %635 = tpu.matmul %573, %7, %cst_195 {dimension_numbers = #tpu.dot_dimension_numbers<[1], [0], [0], [1], [0, 0, 1, 1], [], []>} : vector<2x32xf32>, vector<32x96xf32>, vector<2x96xf32> -> vector<2x96xf32>
    %636 = vector.extract_strided_slice %631 {offsets = [0, 0], sizes = [2, 32], strides = [1, 1]} : vector<2x96xf32> to vector<2x32xf32>
    %637 = vector.extract_strided_slice %635 {offsets = [0, 0], sizes = [2, 32], strides = [1, 1]} : vector<2x96xf32> to vector<2x32xf32>
    %638 = arith.addf %636, %637 : vector<2x32xf32>
    %639 = arith.negf %638 : vector<2x32xf32>
    %640 = math.exp %639 : vector<2x32xf32>
    %cst_196 = arith.constant 1.000000e+00 : f32
    %641 = vector.broadcast %cst_196 : f32 to vector<2x32xf32>
    %642 = arith.addf %641, %640 : vector<2x32xf32>
    %643 = arith.divf %641, %642 : vector<2x32xf32>
    %644 = vector.extract_strided_slice %631 {offsets = [0, 32], sizes = [2, 32], strides = [1, 1]} : vector<2x96xf32> to vector<2x32xf32>
    %645 = vector.extract_strided_slice %635 {offsets = [0, 32], sizes = [2, 32], strides = [1, 1]} : vector<2x96xf32> to vector<2x32xf32>
    %646 = arith.addf %644, %645 : vector<2x32xf32>
    %647 = arith.negf %646 : vector<2x32xf32>
    %648 = math.exp %647 : vector<2x32xf32>
    %cst_197 = arith.constant 1.000000e+00 : f32
    %649 = vector.broadcast %cst_197 : f32 to vector<2x32xf32>
    %650 = arith.addf %649, %648 : vector<2x32xf32>
    %651 = arith.divf %649, %650 : vector<2x32xf32>
    %652 = vector.extract_strided_slice %631 {offsets = [0, 64], sizes = [2, 32], strides = [1, 1]} : vector<2x96xf32> to vector<2x32xf32>
    %653 = vector.extract_strided_slice %635 {offsets = [0, 64], sizes = [2, 32], strides = [1, 1]} : vector<2x96xf32> to vector<2x32xf32>
    %654 = vector.broadcast %9 : vector<1x32xf32> to vector<2x32xf32>
    %655 = arith.addf %653, %654 : vector<2x32xf32>
    %656 = arith.mulf %643, %655 : vector<2x32xf32>
    %657 = arith.addf %652, %656 : vector<2x32xf32>
    %658 = math.tanh %657 : vector<2x32xf32>
    %659 = arith.subf %573, %658 : vector<2x32xf32>
    %660 = arith.mulf %651, %659 : vector<2x32xf32>
    %661 = arith.addf %658, %660 : vector<2x32xf32>
    %cst_198 = arith.constant dense<0.000000e+00> : vector<2x96xf32>
    %662 = tpu.matmul %600, %8, %cst_198 {dimension_numbers = #tpu.dot_dimension_numbers<[1], [0], [0], [1], [0, 0, 1, 1], [], []>} : vector<2x32xf32>, vector<32x96xf32>, vector<2x96xf32> -> vector<2x96xf32>
    %663 = vector.extract_strided_slice %634 {offsets = [0, 0], sizes = [2, 32], strides = [1, 1]} : vector<2x96xf32> to vector<2x32xf32>
    %664 = vector.extract_strided_slice %662 {offsets = [0, 0], sizes = [2, 32], strides = [1, 1]} : vector<2x96xf32> to vector<2x32xf32>
    %665 = arith.addf %663, %664 : vector<2x32xf32>
    %666 = arith.negf %665 : vector<2x32xf32>
    %667 = math.exp %666 : vector<2x32xf32>
    %cst_199 = arith.constant 1.000000e+00 : f32
    %668 = vector.broadcast %cst_199 : f32 to vector<2x32xf32>
    %669 = arith.addf %668, %667 : vector<2x32xf32>
    %670 = arith.divf %668, %669 : vector<2x32xf32>
    %671 = vector.extract_strided_slice %634 {offsets = [0, 32], sizes = [2, 32], strides = [1, 1]} : vector<2x96xf32> to vector<2x32xf32>
    %672 = vector.extract_strided_slice %662 {offsets = [0, 32], sizes = [2, 32], strides = [1, 1]} : vector<2x96xf32> to vector<2x32xf32>
    %673 = arith.addf %671, %672 : vector<2x32xf32>
    %674 = arith.negf %673 : vector<2x32xf32>
    %675 = math.exp %674 : vector<2x32xf32>
    %cst_200 = arith.constant 1.000000e+00 : f32
    %676 = vector.broadcast %cst_200 : f32 to vector<2x32xf32>
    %677 = arith.addf %676, %675 : vector<2x32xf32>
    %678 = arith.divf %676, %677 : vector<2x32xf32>
    %679 = vector.extract_strided_slice %634 {offsets = [0, 64], sizes = [2, 32], strides = [1, 1]} : vector<2x96xf32> to vector<2x32xf32>
    %680 = vector.extract_strided_slice %662 {offsets = [0, 64], sizes = [2, 32], strides = [1, 1]} : vector<2x96xf32> to vector<2x32xf32>
    %681 = vector.broadcast %10 : vector<1x32xf32> to vector<2x32xf32>
    %682 = arith.addf %680, %681 : vector<2x32xf32>
    %683 = arith.mulf %670, %682 : vector<2x32xf32>
    %684 = arith.addf %679, %683 : vector<2x32xf32>
    %685 = math.tanh %684 : vector<2x32xf32>
    %686 = arith.subf %600, %685 : vector<2x32xf32>
    %687 = arith.mulf %678, %686 : vector<2x32xf32>
    %688 = arith.addf %685, %687 : vector<2x32xf32>
    %cst_201 = arith.constant dense<0.000000e+00> : vector<2xf32>
    %689 = vector.multi_reduction <add>, %661, %cst_201 [1] : vector<2x32xf32> to vector<2xf32>
    %690 = vector.shape_cast %689 : vector<2xf32> to vector<2x1xf32>
    %691 = arith.index_cast %c7_i32_189 : i32 to index
    %c0_202 = arith.constant 0 : index
    %c0_203 = arith.constant 0 : index
    %692 = vector.load %arg15[%691, %c0_202, %c0_203] : memref<8x2x1xf32, #tpu.memory_space<vmem>>, vector<1x2x1xf32>
    %693 = vector.shape_cast %692 : vector<1x2x1xf32> to vector<2x1xf32>
    %694 = vector.shape_cast %690 : vector<2x1xf32> to vector<1x2x1xf32>
    tpu.vector_store %arg15[%691, %c0_202, %c0_203], %694 {strides = array<i32>} : memref<8x2x1xf32, #tpu.memory_space<vmem>>, vector<1x2x1xf32>,
    %cst_204 = arith.constant dense<0xFF800000> : vector<2xf32>
    %695 = vector.multi_reduction <maximumf>, %661, %cst_204 [1] : vector<2x32xf32> to vector<2xf32>
    %696 = vector.shape_cast %695 : vector<2xf32> to vector<2x1xf32>
    %697 = arith.index_cast %c7_i32_189 : i32 to index
    %c0_205 = arith.constant 0 : index
    %c0_206 = arith.constant 0 : index
    %698 = vector.load %arg16[%697, %c0_205, %c0_206] : memref<8x2x1xf32, #tpu.memory_space<vmem>>, vector<1x2x1xf32>
    %699 = vector.shape_cast %698 : vector<1x2x1xf32> to vector<2x1xf32>
    %700 = vector.shape_cast %696 : vector<2x1xf32> to vector<1x2x1xf32>
    tpu.vector_store %arg16[%697, %c0_205, %c0_206], %700 {strides = array<i32>} : memref<8x2x1xf32, #tpu.memory_space<vmem>>, vector<1x2x1xf32>,
    %cst_207 = arith.constant dense<0.000000e+00> : vector<2xf32>
    %701 = vector.multi_reduction <add>, %688, %cst_207 [1] : vector<2x32xf32> to vector<2xf32>
    %702 = vector.shape_cast %701 : vector<2xf32> to vector<2x1xf32>
    %703 = arith.index_cast %628 : i32 to index
    %c0_208 = arith.constant 0 : index
    %c0_209 = arith.constant 0 : index
    %704 = vector.load %arg17[%703, %c0_208, %c0_209] : memref<8x2x1xf32, #tpu.memory_space<vmem>>, vector<1x2x1xf32>
    %705 = vector.shape_cast %704 : vector<1x2x1xf32> to vector<2x1xf32>
    %706 = vector.shape_cast %702 : vector<2x1xf32> to vector<1x2x1xf32>
    tpu.vector_store %arg17[%703, %c0_208, %c0_209], %706 {strides = array<i32>} : memref<8x2x1xf32, #tpu.memory_space<vmem>>, vector<1x2x1xf32>,
    %cst_210 = arith.constant dense<0xFF800000> : vector<2xf32>
    %707 = vector.multi_reduction <maximumf>, %688, %cst_210 [1] : vector<2x32xf32> to vector<2xf32>
    %708 = vector.shape_cast %707 : vector<2xf32> to vector<2x1xf32>
    %709 = arith.index_cast %628 : i32 to index
    %c0_211 = arith.constant 0 : index
    %c0_212 = arith.constant 0 : index
    %710 = vector.load %arg18[%709, %c0_211, %c0_212] : memref<8x2x1xf32, #tpu.memory_space<vmem>>, vector<1x2x1xf32>
    %711 = vector.shape_cast %710 : vector<1x2x1xf32> to vector<2x1xf32>
    %712 = vector.shape_cast %708 : vector<2x1xf32> to vector<1x2x1xf32>
    tpu.vector_store %arg18[%709, %c0_211, %c0_212], %712 {strides = array<i32>} : memref<8x2x1xf32, #tpu.memory_space<vmem>>, vector<1x2x1xf32>,
    %c0_i32_213 = arith.constant 0 : i32
    %713 = arith.cmpi eq, %c7_i32_189, %c0_i32_213 : i32
    %714 = arith.extui %713 : i1 to i32
    %c0_i32_214 = arith.constant 0 : i32
    %715 = arith.cmpi ne, %714, %c0_i32_214 : i32
    scf.if %715 {
      %c0_249 = arith.constant 0 : index
      %c0_250 = arith.constant 0 : index
      %748 = vector.load %arg19[%c0_249, %c0_250] : memref<2x32xf32, #tpu.memory_space<vmem>>, vector<2x32xf32>
      tpu.vector_store %arg19[%c0_249, %c0_250], %688 {strides = array<i32>} : memref<2x32xf32, #tpu.memory_space<vmem>>, vector<2x32xf32>,
    } else {
    }
    %c8_i32 = arith.constant 8 : i32
    %c0_215 = arith.constant 0 : index
    %c0_216 = arith.constant 0 : index
    %c0_217 = arith.constant 0 : index
    %716 = vector.load %arg15[%c0_215, %c0_216, %c0_217] : memref<8x2x1xf32, #tpu.memory_space<vmem>>, vector<8x2x1xf32>
    %c0_218 = arith.constant 0 : index
    %c0_219 = arith.constant 0 : index
    %c0_220 = arith.constant 0 : index
    %717 = vector.load %arg17[%c0_218, %c0_219, %c0_220] : memref<8x2x1xf32, #tpu.memory_space<vmem>>, vector<8x2x1xf32>
    %718 = arith.addf %716, %717 : vector<8x2x1xf32>
    %cst_221 = arith.constant dense<0.000000e+00> : vector<8x2xf32>
    %719 = vector.multi_reduction <add>, %718, %cst_221 [2] : vector<8x2x1xf32> to vector<8x2xf32>
    %cst_222 = arith.constant 1.562500e-02 : f32
    %720 = vector.broadcast %cst_222 : f32 to vector<8x2xf32>
    %721 = arith.mulf %719, %720 : vector<8x2xf32>
    %c0_223 = arith.constant 0 : index
    %c0_224 = arith.constant 0 : index
    %c0_225 = arith.constant 0 : index
    %722 = vector.load %arg16[%c0_223, %c0_224, %c0_225] : memref<8x2x1xf32, #tpu.memory_space<vmem>>, vector<8x2x1xf32>
    %c0_226 = arith.constant 0 : index
    %c0_227 = arith.constant 0 : index
    %c0_228 = arith.constant 0 : index
    %723 = vector.load %arg18[%c0_226, %c0_227, %c0_228] : memref<8x2x1xf32, #tpu.memory_space<vmem>>, vector<8x2x1xf32>
    %724 = arith.maximumf %722, %723 : vector<8x2x1xf32>
    %cst_229 = arith.constant dense<0xFF800000> : vector<8x2xf32>
    %725 = vector.multi_reduction <maximumf>, %724, %cst_229 [2] : vector<8x2x1xf32> to vector<8x2xf32>
    %726 = tpu.transpose %721, [1, 0] : vector<8x2xf32> -> vector<2x8xf32>
    %727 = tpu.transpose %725, [1, 0] : vector<8x2xf32> -> vector<2x8xf32>
    %c0_230 = arith.constant 0 : index
    %c0_231 = arith.constant 0 : index
    %728 = vector.load %arg19[%c0_230, %c0_231] : memref<2x32xf32, #tpu.memory_space<vmem>>, vector<2x32xf32>
    %729 = tpu.concatenate %726, %727, %661, %728 in 1 : vector<2x8xf32>, vector<2x8xf32>, vector<2x32xf32>, vector<2x32xf32> -> vector<2x80xf32>
    %c0_232 = arith.constant 0 : index
    %c0_233 = arith.constant 0 : index
    %730 = vector.load %arg7[%c0_232, %c0_233] : memref<80x16xf32, #tpu.memory_space<vmem>>, vector<80x16xf32>
    %cst_234 = arith.constant dense<0.000000e+00> : vector<2x16xf32>
    %731 = tpu.matmul %729, %730, %cst_234 {dimension_numbers = #tpu.dot_dimension_numbers<[1], [0], [0], [1], [0, 0, 1, 1], [], []>} : vector<2x80xf32>, vector<80x16xf32>, vector<2x16xf32> -> vector<2x16xf32>
    %c0_235 = arith.constant 0 : index
    %c0_236 = arith.constant 0 : index
    %732 = vector.load %arg8[%c0_235, %c0_236] : memref<1x16xf32, #tpu.memory_space<vmem>>, vector<1x16xf32>
    %733 = vector.broadcast %732 : vector<1x16xf32> to vector<2x16xf32>
    %734 = arith.addf %731, %733 : vector<2x16xf32>
    %735 = math.tanh %734 : vector<2x16xf32>
    %c0_237 = arith.constant 0 : index
    %c0_238 = arith.constant 0 : index
    %736 = vector.load %arg9[%c0_237, %c0_238] : memref<16x16xf32, #tpu.memory_space<vmem>>, vector<16x16xf32>
    %cst_239 = arith.constant dense<0.000000e+00> : vector<2x16xf32>
    %737 = tpu.matmul %735, %736, %cst_239 {dimension_numbers = #tpu.dot_dimension_numbers<[1], [0], [0], [1], [0, 0, 1, 1], [], []>} : vector<2x16xf32>, vector<16x16xf32>, vector<2x16xf32> -> vector<2x16xf32>
    %c0_240 = arith.constant 0 : index
    %c0_241 = arith.constant 0 : index
    %738 = vector.load %arg10[%c0_240, %c0_241] : memref<1x16xf32, #tpu.memory_space<vmem>>, vector<1x16xf32>
    %739 = vector.broadcast %738 : vector<1x16xf32> to vector<2x16xf32>
    %740 = arith.addf %737, %739 : vector<2x16xf32>
    %741 = math.tanh %740 : vector<2x16xf32>
    %c0_242 = arith.constant 0 : index
    %c0_243 = arith.constant 0 : index
    %742 = vector.load %arg11[%c0_242, %c0_243] : memref<16x5xf32, #tpu.memory_space<vmem>>, vector<16x5xf32>
    %cst_244 = arith.constant dense<0.000000e+00> : vector<2x5xf32>
    %743 = tpu.matmul %741, %742, %cst_244 {dimension_numbers = #tpu.dot_dimension_numbers<[1], [0], [0], [1], [0, 0, 1, 1], [], []>} : vector<2x16xf32>, vector<16x5xf32>, vector<2x5xf32> -> vector<2x5xf32>
    %c0_245 = arith.constant 0 : index
    %c0_246 = arith.constant 0 : index
    %744 = vector.load %arg12[%c0_245, %c0_246] : memref<1x5xf32, #tpu.memory_space<vmem>>, vector<1x5xf32>
    %745 = vector.broadcast %744 : vector<1x5xf32> to vector<2x5xf32>
    %746 = arith.addf %743, %745 : vector<2x5xf32>
    %c0_247 = arith.constant 0 : index
    %c0_248 = arith.constant 0 : index
    %747 = vector.load %arg13[%c0_247, %c0_248] : memref<2x5xf32, #tpu.memory_space<vmem>>, vector<2x5xf32>
    tpu.vector_store %arg13[%c0_247, %c0_248], %746 {strides = array<i32>} : memref<2x5xf32, #tpu.memory_space<vmem>>, vector<2x5xf32>,
    return
  }
}

</mosaic_0001>

<bundles_post_ra>
// kernel: tpu_custom_call.1
= control target key start
LH: loop header
LB: loop body
LE: loop exit
PB: predicated region body
PF: predicated region fallthrough
CT: control target
= control target key end

     0   :  { %18 = vsyncpa [#allocation9], 0  ;;  %s3069_s0 = inlined_call_operand.hbm [shape: f32[16,16], index: 0, kind: input, shape index: {}]   ;;  %s3070_s1 = inlined_call_operand.vmem [shape: f32[16,192], index: 1, kind: input, shape index: {}]   ;;  %s3071_s2 = inlined_call_operand.vmem [shape: f32[1,192], index: 2, kind: input, shape index: {}]   ;;  %s3072_s3 = inlined_call_operand.vmem [shape: f32[32,96], index: 3, kind: input, shape index: {}]   ;;  %s3073_s4 = inlined_call_operand.vmem [shape: f32[32,96], index: 4, kind: input, shape index: {}]   ;;  %s3074_s5 = inlined_call_operand.vmem [shape: f32[1,32], index: 5, kind: input, shape index: {}]   ;;  %s3075_s6 = inlined_call_operand.vmem [shape: f32[1,32], index: 6, kind: input, shape index: {}]   ;;  %s3076_s7 = inlined_call_operand.vmem [shape: f32[80,16], index: 7, kind: input, shape index: {}]   ;;  %s3077_s8 = inlined_call_operand.vmem [shape: f32[1,16], index: 8, kind: input, shape index: {}]   ;;  %s3078_s9 = inlined_call_operand.hbm [shape: f32[16,16], index: 9, kind: input, shape index: {}]   ;;  %s3079_s10 = inlined_call_operand.vmem [shape: f32[1,16], index: 10, kind: input, shape index: {}]   ;;  %s3080_s11 = inlined_call_operand.vmem [shape: f32[16,5], index: 11, kind: input, shape index: {}]   ;;  %s3081_s12 = inlined_call_operand.vmem [shape: f32[1,5], index: 12, kind: input, shape index: {}]   ;;  %s3082_s13 = inlined_call_operand.hbm [shape: f32[2,5], index: 13, kind: output, shape index: {}]  }
   0x1   :  { %19 = vsyncpa [#allocation12], 0 }
   0x2   :  { %20 = vsyncpa [#allocation10], 0  ;;  %s25_s27 = sshll.u32 %s3069_s0, 4  ;;  %s2431_s28 = smov [#allocation8]   ;;  %s26_s27 = int_to_ptr.hbm [resolvable:$true] %s25_s27 }
   0x3   :  { %s27_s29 = sshll.u32 %s2431_s28, 4  ;;  %s54_s15 = sshll.u32 %s3078_s9, 4  ;;  %s28_s29 = int_to_ptr.vmem [resolvable:$true] %s27_s29  ;;  %s55_s15 = int_to_ptr.hbm [resolvable:$true] %s54_s15 }
   0x4   :  { %s2432_s16 = smov 128   ;;  %s2433_s17 = smov 8  }
   0x5   :  { %33 = dma.hbm_to_vmem [thread:$0]  %s26_s27, 256, %s28_s29, [#allocation9], %s2432_s16, %s2432_s16, %s2433_s17  }
   0x6   :  { %s2434_s18 = smov [#allocation11]  }
   0x7   :  { %s56_s19 = sshll.u32 %s2434_s18, 4  ;;  %s57_s19 = int_to_ptr.vmem [resolvable:$true] %s56_s19 }
   0x8   :  { %62 = dma.hbm_to_vmem [thread:$0]  %s55_s15, 256, %s57_s19, [#allocation12], %s2432_s16, %s2432_s16, %s2433_s17  }
   0x9   :  { %2425 = dma.done.wait [#allocation9], 256  }
   0xa   :  { %2426 = vsyncadd [#allocation9], 4294967040 }
   0xb   :  { %2427 = dma.done.wait [#allocation12], 256  }
   0xc   :  { %2428 = vsyncadd [#allocation12], 4294967040  ;;  %v81_v0 = vld [vmem:[%s3070_s1 + $0x10] sm:$0xff]  ;;  %v79_v1 = vld [vmem:[%s3070_s1] sm:$0xff]  ;;  %vm3083_vm0 = vcmask 130048   ;;  %s2435_s30 = smov 64  }
   0xd   :  { %2199 = vmatpush.msra.mxu3 %v81_v0  ;;  %v78_v2 = vld [vmem:[#allocation8 + $0x8] sm:$0xff]  ;;  %110 = vmatpush.msra.mxu0 %v81_v0  ;;  %v2530_v3 = vld [vmem:[%s3073_s4 + $0x18] sm:$0xff]  ;;  %v2216_v4 = vld [vmem:[%s3075_s6] ss:$0 sm:$0xff]  ;;  %v2436_v11 = vmov 0.0   ;;  %vm143_vm1 = vcmask 523264  }
   0xe   :  { %v2538_v5 = vld [vmem:[%s3073_s4 + $0x10] sm:$0xff]  ;;  %v82_v6 = vld [vmem:[%s3070_s1 + $0x18] sm:$0xff]  ;;  %299 = vrot.lane.b32.xlu0 %v2216_v4, %s2435_s30  ;;  %v80_v7 = vld [vmem:[%s3070_s1 + $0x8] sm:$0xff]  ;;  %s2438_s0 = smov 32   ;;  %vm160_vm14 = vcmask 261120   ;;  %s2442_s15 = smov [#allocation13]  }
   0xf   :  { %2200 = vmatpush.msra.mxu3 %v79_v1  ;;  %111 = vmatpush.msra.mxu0 %v79_v1  ;;  %v77_v8 = vld [vmem:[#allocation8] sm:$0xff]  ;;  %v2584_v12 = vld [vmem:[%s3071_s2] sm:$0x3]  ;;  %s2437_s2 = smov 96   ;;  %v2598_v29 = vld [vmem:[%s3072_s3 + $0x18] sm:$0xff]  ;;  %s2141_s6 = sshll.u32 %s2442_s15, 4  ;;  %s2142_s6 = int_to_ptr.vmem [resolvable:$true] %s2141_s6 }
  0x10   :  { %2155 = vmatmul.msk.f32.vlgmr.msra.gmra.mxu3 %vm3083_vm0, %v78_v2  ;;  %133 = vmatpush.msra.mxu1 %v82_v6  ;;  %v2552_v9 = vld [vmem:[%s3073_s4 + $0x8] sm:$0xff]  ;;  %v2559_v10 = vld [vmem:[%s3073_s4] sm:$0xff]  ;;  %v85_v13 = vperm.slane %v2584_v12, 0  ;;  %v86_v14 = vperm.slane %v2584_v12, 1  ;;  %v2603_v30 = vld [vmem:[%s3072_s3 + $0x10] sm:$0xff]  ;;  %s2143_s18 = sshll.u32 %s3082_s13, 4  ;;  %s2144_s18 = int_to_ptr.hbm [resolvable:$true] %s2143_s18 }
  0x11   :  { %244 = vmatpush.msrb.mxu3 %v2530_v3  ;;  %2154 = vmatmul.msk.f32.vlgmr.msra.gmra.mxu0 %vm3083_vm0, %v77_v8  ;;  %v2217_v31 = vld [vmem:[%s3074_s5] ss:$0 sm:$0xff]  ;;  %v2613_v33 = vld [vmem:[%s3072_s3 + $0x8] sm:$0xff]  ;;  %s2441_s5 = smov 48  }
  0x12   :  { %134 = vmatpush.msra.mxu1 %v80_v7  ;;  %176 = vmatpush.msra.mxu2 %v2598_v29  ;;  %v2620_v34 = vld [vmem:[%s3072_s3] sm:$0xff]  ;;  %s2440_s3 = smov 80  }
  0x13   :  { %245 = vmatpush.msrb.mxu3 %v2538_v5  ;;  %2156 = vmatmul.msk.f32.vlgmr.msra.gmra.mxu1 %vm3083_vm0, %v77_v8 }
  0x14   :  { %663 = vmatpush.msrb.mxu1 %v2530_v3  ;;  %587 = vmatpush.msrb.mxu0 %v2598_v29 }
  0x15   :  { %246 = vmatpush.msrb.mxu3 %v2552_v9  ;;  %177 = vmatpush.msra.mxu2 %v2603_v30 }
  0x16   :  { %664 = vmatpush.msrb.mxu1 %v2538_v5  ;;  %588 = vmatpush.msrb.mxu0 %v2603_v30 }
  0x17   :  { %247 = vmatpush.msrb.mxu3 %v2559_v10  ;;  %178 = vmatpush.msra.mxu2 %v2613_v33 }
  0x18   :  { %248 = vmatmul.f32.vlgmr.msrb.gmra.mxu3 %v2436_v11  ;;  %665 = vmatpush.msrb.mxu1 %v2552_v9 }
  0x19   :  { %452 = vmatpush.msra.mxu3 %v2530_v3  ;;  %589 = vmatpush.msrb.mxu0 %v2613_v33 }
  0x1a   :  { %666 = vmatpush.msrb.mxu1 %v2559_v10  ;;  %179 = vmatpush.msra.mxu2 %v2620_v34 }
  0x1b   :  { %453 = vmatpush.msra.mxu3 %v2538_v5  ;;  %2157 = vmatmul.msk.f32.gmra.mxu1 %vm3083_vm0, %v78_v2 }
  0x1c   :  { %1068 = vmatpush.msra.mxu1 %v2530_v3  ;;  %180 = vmatmul.f32.vlgmr.msra.gmra.mxu2 %v2436_v11 }
  0x1d   :  { %454 = vmatpush.msra.mxu3 %v2552_v9  ;;  %590 = vmatpush.msrb.mxu0 %v2620_v34 }
  0x1e   :  { %1069 = vmatpush.msra.mxu1 %v2538_v5  ;;  %376 = vmatpush.msrb.mxu2 %v2598_v29 }
  0x1f   :  { %455 = vmatpush.msra.mxu3 %v2559_v10  ;;  %999 = vmatpush.msra.mxu0 %v2598_v29 }
  0x20   :  { %1070 = vmatpush.msra.mxu1 %v2552_v9  ;;  %377 = vmatpush.msrb.mxu2 %v2603_v30 }
  0x21   :  { %870 = vmatpush.msrb.mxu3 %v2530_v3  ;;  %1000 = vmatpush.msra.mxu0 %v2603_v30 }
  0x22   :  { %1071 = vmatpush.msra.mxu1 %v2559_v10  ;;  %378 = vmatpush.msrb.mxu2 %v2613_v33 }
  0x23   :  { %871 = vmatpush.msrb.mxu3 %v2538_v5  ;;  %1001 = vmatpush.msra.mxu0 %v2613_v33 }
  0x24   :  { %379 = vmatpush.msrb.mxu2 %v2620_v34 }
  0x25   :  { %872 = vmatpush.msrb.mxu3 %v2552_v9  ;;  %1002 = vmatpush.msra.mxu0 %v2620_v34 }
  0x26   :  { %794 = vmatpush.msra.mxu2 %v2598_v29 }
  0x27   :  { %873 = vmatpush.msrb.mxu3 %v2559_v10 }
  0x28   :  { %795 = vmatpush.msra.mxu2 %v2603_v30 }
  0x2a   :  { %796 = vmatpush.msra.mxu2 %v2613_v33 }
  0x2c   :  { %797 = vmatpush.msra.mxu2 %v2620_v34 }
  0x80   :  { %v2590_v19 = vpop.permute.xlu0 %299 }
  0x8e   :  { %v113_v49 = vpop.f32.mrf.mxu0 }
  0x8f   :  { %v114_v50 = vadd.f32 %v113_v49, %v85_v13 }
  0x90   :  { %v136_v15 = vpop.f32.mrf.mxu1 }
  0x91   :  { %v137_v16 = vadd.f32 %v136_v15, %v86_v14  ;;  %142 = vst [vmem:[#allocation2] sm:$0xff] %v114_v50 }
  0x93   :  { %v116_v17 = vpop.f32.mrf.mxu3  ;;  %144 = vst.msk [vmem:[#allocation2 + $0x8] sm:$0xff] %vm143_vm1, %v137_v16 }
  0x94   :  { %v117_v18 = vadd.f32 %v116_v17, %v85_v13 }
  0x96   :  { %145 = vst [vmem:[#allocation2 + $0x10] sm:$0xff] %v117_v18 }
  0x98   :  { %v139_v20 = vpop.f32.mrf.mxu1  ;;  %v157_v15 = vld [vmem:[#allocation2] sm:$0x3] }
  0x99   :  { %v140_v21 = vadd.f32 %v139_v20, %v86_v14 }
  0x9b   :  { %v249_v22 = vpop.f32.mrf.mxu3  ;;  %146 = vst.msk [vmem:[#allocation2 + $0x18] sm:$0xff] %vm143_vm1, %v140_v21 }
  0x9c   :  { %v253_v23 = vrot.slane %v249_v22, 2  ;;  %v302_v24 = vadd.f32 %v2590_v19, %v249_v22 }
  0x9d   :  { %v158_v27 = vld [vmem:[#allocation2 + $0x10] sm:$0xc0] }
  0x9e   :  { %254 = vrot.lane.b32.xlu0 %v253_v23, %s2437_s2  ;;  %v304_v25 = vrot.slane %v302_v24, 2 }
  0x9f   :  { %v181_v13 = vpop.f32.mrf.mxu2 }
  0xa0   :  { %305 = vrot.lane.b32.xlu1 %v304_v25, %s2438_s0  ;;  %v184_v16 = vadd.f32 %v181_v13, %v157_v15 }
  0xa2   :  { %v159_v52 = vld [vmem:[#allocation2 + $0x18] sm:$0xc0]  ;;  %v2158_v17 = vmul.f32 -1.442695, %v184_v16 }
  0xa6   :  { %206 = vrot.lane.b32.xlu0 %v2217_v31, %s2435_s30 }
 0x110   :  { %v255_v26 = vpop.permute.xlu0 %254 }
 0x111   :  { %v257_v28 = vadd.f32 %v255_v26, %v158_v27  ;;  %v277_v56 = vadd.f32 %v255_v26, %v159_v52 }
 0x112   :  { %v306_v46 = vpop.permute.xlu1 %305 }
 0x113   :  { %v2159_v32 = vmul.f32 -1.442695, %v257_v28  ;;  %v2160_v57 = vmul.f32 -1.442695, %v277_v56 }
 0x115   :  { %2221 = vpow2.f32 %v2159_v32 }
 0x118   :  { %v2644_v12 = vpop.permute.xlu0 %206 }
 0x119   :  { %v209_v14 = vadd.f32 %v2644_v12, %v181_v13  ;;  %v361_v13 = vld [vmem:[#allocation2 + $0x18] sm:$0x30] }
 0x11b   :  { %v2222_v35 = vpop.eup %2221 }
 0x11c   :  { %v261_v36 = vadd.f32 1.0, %v2222_v35 }
 0x11e   :  { %2223 = vrcp.f32 %v261_v36  ;;  %v273_v40 = vand.u32 2147483648, %v261_v36  ;;  %v271_v42 = vand.u32 2147483647, %v261_v36  ;;  %vm267_vm3 = vweird.f32 %v261_v36 }
 0x120   :  { %v274_v44 = vor.u32 1.1754944e-38, %v273_v40  ;;  %vm272_vm5 = vcmp.eq.f32.partialorder %v271_v42, 8.507059e+37 }
 0x124   :  { %v2224_v37 = vpop.eup %2223 }
 0x125   :  { %v263_v38 = vmul.f32 %v2224_v37, %v261_v36  ;;  %vm268_vm2 = vweird.f32 %v2224_v37 }
 0x126   :  { %vm269_vm4 = vmor %vm267_vm3, %vm268_vm2 }
 0x127   :  { %v264_v39 = vsub.f32 1.0, %v263_v38 }
 0x129   :  { %v265_v41 = vmul.f32 %v2224_v37, %v264_v39 }
 0x12b   :  { %v266_v43 = vadd.f32 %v2224_v37, %v265_v41 }
 0x12d   :  { %v270_v45 = vsel %vm269_vm4, %v2224_v37, %v266_v43 }
 0x12e   :  { %v275_v47 = vsel %vm272_vm5, %v274_v44, %v270_v45 }
 0x12f   :  { %v308_v48 = vmul.f32 %v306_v46, %v275_v47 }
 0x131   :  { %310 = vrot.lane.b32.xlu1 %v308_v48, %s2435_s30 }
 0x1a3   :  { %v311_v51 = vpop.permute.xlu1 %310 }
 0x1a4   :  { %v313_v53 = vadd.f32 %v311_v51, %v159_v52 }
 0x1a6   :  { %2225 = vtanh.f32 %v313_v53  ;;  %v360_v53 = vld [vmem:[#allocation2 + $0x10] sm:$0x30] }
 0x1a7   :  { %2227 = vpow2.f32 %v2160_v57 }
 0x1ac   :  { %v2226_v54 = vpop.eup %2225 }
 0x1ad   :  { %v315_v55 = vsub.f32 0.0, %v2226_v54  ;;  %v2228_v58 = vpop.eup %2227 }
 0x1ae   :  { %v281_v59 = vadd.f32 1.0, %v2228_v58 }
 0x1af   :  { %317 = vrot.lane.b32.xlu2 %v315_v55, %s2437_s2 }
 0x1b0   :  { %2229 = vrcp.f32 %v281_v59  ;;  %v293_v1 = vand.u32 2147483648, %v281_v59  ;;  %vm287_vm7 = vweird.f32 %v281_v59  ;;  %v291_v2 = vand.u32 2147483647, %v281_v59 }
 0x1b1   :  { %2231 = vpow2.f32 %v2158_v17 }
 0x1b2   :  { %v294_v6 = vor.u32 1.1754944e-38, %v293_v1  ;;  %vm292_vm9 = vcmp.eq.f32.partialorder %v291_v2, 8.507059e+37 }
 0x1b6   :  { %v2230_v60 = vpop.eup %2229 }
 0x1b7   :  { %v283_v61 = vmul.f32 %v2230_v60, %v281_v59  ;;  %vm288_vm6 = vweird.f32 %v2230_v60  ;;  %v2232_v18 = vpop.eup %2231 }
 0x1b8   :  { %vm289_vm8 = vmor %vm287_vm7, %vm288_vm6  ;;  %v188_v20 = vadd.f32 1.0, %v2232_v18 }
 0x1b9   :  { %v284_v62 = vsub.f32 1.0, %v283_v61 }
 0x1ba   :  { %2233 = vrcp.f32 %v188_v20  ;;  %vm194_vm10 = vweird.f32 %v188_v20  ;;  %v200_v26 = vand.u32 2147483648, %v188_v20  ;;  %v198_v31 = vand.u32 2147483647, %v188_v20 }
 0x1bb   :  { %v285_v63 = vmul.f32 %v2230_v60, %v284_v62 }
 0x1bc   :  { %v201_v35 = vor.u32 1.1754944e-38, %v200_v26  ;;  %vm199_vm13 = vcmp.eq.f32.partialorder %v198_v31, 8.507059e+37 }
 0x1bd   :  { %v286_v0 = vadd.f32 %v2230_v60, %v285_v63 }
 0x1bf   :  { %v290_v4 = vsel %vm289_vm8, %v2230_v60, %v286_v0 }
 0x1c0   :  { %v295_v8 = vsel %vm292_vm9, %v294_v6, %v290_v4  ;;  %v2234_v21 = vpop.eup %2233 }
 0x1c1   :  { %v190_v22 = vmul.f32 %v2234_v21, %v188_v20  ;;  %vm195_vm11 = vweird.f32 %v2234_v21 }
 0x1c2   :  { %vm196_vm12 = vmor %vm194_vm10, %vm195_vm11 }
 0x1c3   :  { %v191_v23 = vsub.f32 1.0, %v190_v22 }
 0x1c5   :  { %v192_v24 = vmul.f32 %v2234_v21, %v191_v23 }
 0x1c7   :  { %v193_v28 = vadd.f32 %v2234_v21, %v192_v24 }
 0x1c9   :  { %v197_v36 = vsel %vm196_vm12, %v2234_v21, %v193_v28 }
 0x1ca   :  { %v202_v38 = vsel %vm199_vm13, %v201_v35, %v197_v36 }
 0x209   :  { %v318_v7 = vpop.permute.xlu2 %317 }
 0x20a   :  { %v320_v11 = vmul.f32 %v318_v7, %v295_v8 }
 0x20c   :  { %322 = vrot.lane.b32.xlu2 %v320_v11, %s2438_s0 }
 0x214   :  { %211 = vrot.lane.b32.xlu2 %v209_v14, %s2435_s30 }
 0x266   :  { %v323_v25 = vpop.permute.xlu2 %322 }
 0x267   :  { %v2648_v27 = vadd.f32 %v2226_v54, %v323_v25 }
 0x269   :  { %v435_v32 = vrot.slane %v2648_v27, 6 }
 0x26b   :  { %436 = vrot.lane.b32.xlu1 %v435_v32, %s2437_s2 }
 0x26e   :  { %v212_v37 = vpop.permute.xlu2 %211 }
 0x26f   :  { %v214_v39 = vmul.f32 %v212_v37, %v202_v38 }
 0x271   :  { %216 = vrot.lane.b32.xlu0 %v214_v39, %s2435_s30 }
 0x2dd   :  { %v437_v40 = vpop.permute.xlu1 %436 }
 0x2de   :  { %2163 = vmatmul.msk.f32.vlgmr.msra.gmra.mxu3 %vm160_vm14, %v437_v40 }
 0x2df   :  { %1270 = vmatpush.msra.mxu3 %v2530_v3 }
 0x2e1   :  { %1271 = vmatpush.msra.mxu3 %v2538_v5 }
 0x2e3   :  { %v217_v41 = vpop.permute.xlu0 %216  ;;  %1272 = vmatpush.msra.mxu3 %v2552_v9 }
 0x2e4   :  { %v219_v42 = vadd.f32 %v217_v41, %v157_v15 }
 0x2e5   :  { %1273 = vmatpush.msra.mxu3 %v2559_v10 }
 0x2e6   :  { %2235 = vtanh.f32 %v219_v42 }
 0x2ec   :  { %v2236_v43 = vpop.eup %2235 }
 0x2ed   :  { %v221_v44 = vsub.f32 0.0, %v2236_v43 }
 0x2ef   :  { %223 = vrot.lane.b32.xlu1 %v221_v44, %s2437_s2 }
 0x361   :  { %v457_v45 = vpop.f32.mrf.mxu3  ;;  %v224_v46 = vpop.permute.xlu1 %223 }
 0x362   :  { %v461_v47 = vrot.slane %v457_v45, 4  ;;  %v226_v48 = vmul.f32 %v224_v46, %v202_v38  ;;  %v505_v49 = vadd.f32 %v457_v45, %v2590_v19  ;;  %v359_v46 = vld [vmem:[#allocation2] sm:$0xc] }
 0x364   :  { %462 = vrot.lane.b32.xlu0 %v461_v47, %s2437_s2  ;;  %228 = vrot.lane.b32.xlu2 %v226_v48, %s2438_s0  ;;  %v507_v50 = vrot.slane %v505_v49, 4 }
 0x36c   :  { %508 = vrot.lane.b32.xlu2 %v507_v50, %s2438_s0 }
 0x3be   :  { %v229_v51 = vpop.permute.xlu2 %228 }
 0x3bf   :  { %v2663_v52 = vadd.f32 %v2236_v43, %v229_v51 }
 0x3c1   :  { %327 = vrot.lane.b32.xlu1 %v2663_v52, %s2435_s30 }
 0x3c6   :  { %v509_v6 = vpop.permute.xlu2 %508 }
 0x3d6   :  { %v463_v54 = vpop.permute.xlu0 %462 }
 0x3d7   :  { %v465_v55 = vadd.f32 %v463_v54, %v360_v53  ;;  %v485_v23 = vadd.f32 %v463_v54, %v361_v13 }
 0x3d9   :  { %v2164_v56 = vmul.f32 -1.442695, %v465_v55  ;;  %v2165_v25 = vmul.f32 -1.442695, %v485_v23 }
 0x3db   :  { %2237 = vpow2.f32 %v2164_v56 }
 0x3e1   :  { %v2238_v57 = vpop.eup %2237 }
 0x3e2   :  { %v469_v58 = vadd.f32 1.0, %v2238_v57 }
 0x3e4   :  { %2239 = vrcp.f32 %v469_v58  ;;  %v481_v62 = vand.u32 2147483648, %v469_v58  ;;  %v479_v0 = vand.u32 2147483647, %v469_v58  ;;  %vm475_vm1 = vweird.f32 %v469_v58 }
 0x3e6   :  { %v482_v2 = vor.u32 1.1754944e-38, %v481_v62  ;;  %vm480_vm3 = vcmp.eq.f32.partialorder %v479_v0, 8.507059e+37 }
 0x3ea   :  { %v2240_v59 = vpop.eup %2239 }
 0x3eb   :  { %v471_v60 = vmul.f32 %v2240_v59, %v469_v58  ;;  %vm476_vm15 = vweird.f32 %v2240_v59 }
 0x3ec   :  { %vm477_vm2 = vmor %vm475_vm1, %vm476_vm15 }
 0x3ed   :  { %v472_v61 = vsub.f32 1.0, %v471_v60 }
 0x3ef   :  { %v473_v63 = vmul.f32 %v2240_v59, %v472_v61 }
 0x3f1   :  { %v474_v1 = vadd.f32 %v2240_v59, %v473_v63 }
 0x3f3   :  { %v478_v4 = vsel %vm477_vm2, %v2240_v59, %v474_v1 }
 0x3f4   :  { %v483_v7 = vsel %vm480_vm3, %v482_v2, %v478_v4 }
 0x3f5   :  { %v511_v8 = vmul.f32 %v509_v6, %v483_v7 }
 0x3f7   :  { %513 = vrot.lane.b32.xlu0 %v511_v8, %s2435_s30 }
 0x433   :  { %v2668_v11 = vpop.permute.xlu1 %327 }
 0x434   :  { %2161 = vmatmul.msk.f32.vlgmr.msrb.gmra.mxu2 %vm160_vm14, %v2668_v11 }
 0x435   :  { %1194 = vmatpush.msrb.mxu2 %v2598_v29 }
 0x437   :  { %1195 = vmatpush.msrb.mxu2 %v2603_v30 }
 0x439   :  { %1196 = vmatpush.msrb.mxu2 %v2613_v33 }
 0x43b   :  { %1197 = vmatpush.msrb.mxu2 %v2620_v34 }
 0x469   :  { %v514_v14 = vpop.permute.xlu0 %513 }
 0x46a   :  { %v516_v15 = vadd.f32 %v514_v14, %v361_v13 }
 0x46c   :  { %2241 = vtanh.f32 %v516_v15 }
 0x46d   :  { %2243 = vpow2.f32 %v2165_v25 }
 0x472   :  { %v2242_v16 = vpop.eup %2241 }
 0x473   :  { %v519_v17 = vrot.slane %v2242_v16, 6  ;;  %v2244_v26 = vpop.eup %2243 }
 0x474   :  { %v489_v28 = vadd.f32 1.0, %v2244_v26  ;;  %v568_v26 = vld [vmem:[#allocation2 + $0x10] sm:$0xc] }
 0x475   :  { %v521_v18 = vsub.f32 %v2648_v27, %v519_v17 }
 0x476   :  { %2245 = vrcp.f32 %v489_v28  ;;  %v501_v38 = vand.u32 2147483648, %v489_v28  ;;  %vm495_vm5 = vweird.f32 %v489_v28  ;;  %v499_v39 = vand.u32 2147483647, %v489_v28 }
 0x477   :  { %v523_v20 = vrot.slane %v521_v18, 2 }
 0x478   :  { %v502_v41 = vor.u32 1.1754944e-38, %v501_v38  ;;  %vm500_vm7 = vcmp.eq.f32.partialorder %v499_v39, 8.507059e+37 }
 0x479   :  { %524 = vrot.lane.b32.xlu1 %v523_v20, %s2437_s2 }
 0x47c   :  { %v2246_v31 = vpop.eup %2245 }
 0x47d   :  { %v491_v32 = vmul.f32 %v2246_v31, %v489_v28  ;;  %vm496_vm4 = vweird.f32 %v2246_v31 }
 0x47e   :  { %vm497_vm6 = vmor %vm495_vm5, %vm496_vm4 }
 0x47f   :  { %v492_v35 = vsub.f32 1.0, %v491_v32 }
 0x481   :  { %v493_v36 = vmul.f32 %v2246_v31, %v492_v35 }
 0x483   :  { %v494_v37 = vadd.f32 %v2246_v31, %v493_v36 }
 0x485   :  { %v498_v40 = vsel %vm497_vm6, %v2246_v31, %v494_v37 }
 0x486   :  { %v503_v42 = vsel %vm500_vm7, %v502_v41, %v498_v40 }
 0x4b7   :  { %v381_v21 = vpop.f32.mrf.mxu2 }
 0x4b8   :  { %v407_v22 = vadd.f32 %v381_v21, %v2644_v12  ;;  %v385_v45 = vrot.slane %v381_v21, 6 }
 0x4ba   :  { %v409_v24 = vrot.slane %v407_v22, 6  ;;  %v387_v47 = vadd.f32 %v385_v45, %v359_v46 }
 0x4bc   :  { %410 = vrot.lane.b32.xlu0 %v409_v24, %s2435_s30  ;;  %v2162_v48 = vmul.f32 -1.442695, %v387_v47 }
 0x4be   :  { %2247 = vpow2.f32 %v2162_v48 }
 0x4c4   :  { %v2248_v49 = vpop.eup %2247 }
 0x4c5   :  { %v391_v50 = vadd.f32 1.0, %v2248_v49 }
 0x4c7   :  { %2249 = vrcp.f32 %v391_v50  ;;  %v403_v57 = vand.u32 2147483648, %v391_v50  ;;  %vm397_vm9 = vweird.f32 %v391_v50  ;;  %v401_v58 = vand.u32 2147483647, %v391_v50 }
 0x4c9   :  { %v404_v60 = vor.u32 1.1754944e-38, %v403_v57  ;;  %vm402_vm11 = vcmp.eq.f32.partialorder %v401_v58, 8.507059e+37 }
 0x4cd   :  { %v2250_v51 = vpop.eup %2249 }
 0x4ce   :  { %v393_v53 = vmul.f32 %v2250_v51, %v391_v50  ;;  %vm398_vm8 = vweird.f32 %v2250_v51  ;;  %v569_v50 = vld [vmem:[#allocation2 + $0x18] sm:$0xc] }
 0x4cf   :  { %vm399_vm10 = vmor %vm397_vm9, %vm398_vm8 }
 0x4d0   :  { %v394_v54 = vsub.f32 1.0, %v393_v53 }
 0x4d2   :  { %v395_v55 = vmul.f32 %v2250_v51, %v394_v54 }
 0x4d4   :  { %v396_v56 = vadd.f32 %v2250_v51, %v395_v55 }
 0x4d6   :  { %v400_v59 = vsel %vm399_vm10, %v2250_v51, %v396_v56 }
 0x4d7   :  { %v405_v61 = vsel %vm402_vm11, %v404_v60, %v400_v59 }
 0x4eb   :  { %v525_v43 = vpop.permute.xlu1 %524 }
 0x4ec   :  { %v527_v44 = vmul.f32 %v525_v43, %v503_v42 }
 0x4ee   :  { %529 = vrot.lane.b32.xlu2 %v527_v44, %s2438_s0 }
 0x52e   :  { %v411_v62 = vpop.permute.xlu0 %410 }
 0x52f   :  { %v413_v63 = vmul.f32 %v411_v62, %v405_v61 }
 0x531   :  { %415 = vrot.lane.b32.xlu2 %v413_v63, %s2435_s30 }
 0x548   :  { %v530_v0 = vpop.permute.xlu2 %529 }
 0x549   :  { %v2682_v1 = vadd.f32 %v2242_v16, %v530_v0 }
 0x54b   :  { %v646_v2 = vrot.slane %v2682_v1, 4 }
 0x54d   :  { %647 = vrot.lane.b32.xlu1 %v646_v2, %s2437_s2 }
 0x58b   :  { %v416_v4 = vpop.permute.xlu2 %415 }
 0x58c   :  { %v418_v6 = vadd.f32 %v416_v4, %v359_v46 }
 0x58e   :  { %2251 = vtanh.f32 %v418_v6 }
 0x594   :  { %v2252_v7 = vpop.eup %2251 }
 0x595   :  { %v421_v8 = vrot.slane %v2252_v7, 2 }
 0x597   :  { %v423_v13 = vsub.f32 %v2663_v52, %v421_v8 }
 0x599   :  { %v425_v14 = vrot.slane %v423_v13, 6 }
 0x59b   :  { %426 = vrot.lane.b32.xlu0 %v425_v14, %s2437_s2 }
 0x5bf   :  { %v648_v15 = vpop.permute.xlu1 %647 }
 0x5c0   :  { %2168 = vmatmul.msk.f32.vlgmr.msrb.gmra.mxu1 %vm160_vm14, %v648_v15 }
 0x5c1   :  { %1475 = vmatpush.msrb.mxu1 %v2530_v3 }
 0x5c3   :  { %1476 = vmatpush.msrb.mxu1 %v2538_v5 }
 0x5c5   :  { %1477 = vmatpush.msrb.mxu1 %v2552_v9 }
 0x5c7   :  { %1478 = vmatpush.msrb.mxu1 %v2559_v10 }
 0x60d   :  { %v427_v16 = vpop.permute.xlu0 %426 }
 0x60e   :  { %v429_v17 = vmul.f32 %v427_v16, %v405_v61 }
 0x610   :  { %431 = vrot.lane.b32.xlu1 %v429_v17, %s2438_s0 }
 0x63d   :  { %v668_v18 = vpop.f32.mrf.mxu1 }
 0x63e   :  { %v672_v20 = vrot.slane %v668_v18, 6  ;;  %v716_v21 = vadd.f32 %v668_v18, %v2590_v19 }
 0x640   :  { %v718_v22 = vrot.slane %v716_v21, 6  ;;  %673 = vrot.lane.b32.xlu2 %v672_v20, %s2437_s2 }
 0x642   :  { %719 = vrot.lane.b32.xlu1 %v718_v22, %s2438_s0  ;;  %v567_v22 = vld [vmem:[#allocation2] sm:$0x30] }
 0x682   :  { %v432_v23 = vpop.permute.xlu1 %431 }
 0x683   :  { %v2697_v24 = vadd.f32 %v2252_v7, %v432_v23 }
 0x685   :  { %v570_v25 = vrot.slane %v2697_v24, 2 }
 0x687   :  { %571 = vrot.lane.b32.xlu0 %v570_v25, %s2435_s30 }
 0x69a   :  { %v674_v28 = vpop.permute.xlu2 %673 }
 0x69b   :  { %v676_v31 = vadd.f32 %v674_v28, %v568_v26  ;;  %v696_v58 = vadd.f32 %v674_v28, %v569_v50 }
 0x69d   :  { %v2169_v32 = vmul.f32 -1.442695, %v676_v31  ;;  %v2170_v59 = vmul.f32 -1.442695, %v696_v58 }
 0x69f   :  { %2253 = vpow2.f32 %v2169_v32 }
 0x6a5   :  { %v2254_v35 = vpop.eup %2253 }
 0x6a6   :  { %v680_v36 = vadd.f32 1.0, %v2254_v35 }
 0x6a8   :  { %2255 = vrcp.f32 %v680_v36  ;;  %v692_v40 = vand.u32 2147483648, %v680_v36  ;;  %v690_v42 = vand.u32 2147483647, %v680_v36  ;;  %vm686_vm13 = vweird.f32 %v680_v36 }
 0x6aa   :  { %v693_v44 = vor.u32 1.1754944e-38, %v692_v40  ;;  %vm691_vm1 = vcmp.eq.f32.partialorder %v690_v42, 8.507059e+37 }
 0x6ae   :  { %v2256_v37 = vpop.eup %2255 }
 0x6af   :  { %v682_v38 = vmul.f32 %v2256_v37, %v680_v36  ;;  %vm687_vm12 = vweird.f32 %v2256_v37 }
 0x6b0   :  { %vm688_vm15 = vmor %vm686_vm13, %vm687_vm12 }
 0x6b1   :  { %v683_v39 = vsub.f32 1.0, %v682_v38 }
 0x6b3   :  { %v684_v41 = vmul.f32 %v2256_v37, %v683_v39 }
 0x6b4   :  { %v720_v46 = vpop.permute.xlu1 %719 }
 0x6b5   :  { %v685_v43 = vadd.f32 %v2256_v37, %v684_v41 }
 0x6b7   :  { %v689_v45 = vsel %vm688_vm15, %v2256_v37, %v685_v43 }
 0x6b8   :  { %v694_v47 = vsel %vm691_vm1, %v693_v44, %v689_v45 }
 0x6b9   :  { %v722_v48 = vmul.f32 %v720_v46, %v694_v47 }
 0x6bb   :  { %724 = vrot.lane.b32.xlu2 %v722_v48, %s2435_s30 }
 0x6f9   :  { %v572_v49 = vpop.permute.xlu0 %571 }
 0x6fa   :  { %2166 = vmatmul.msk.f32.vlgmr.msrb.gmra.mxu0 %vm160_vm14, %v572_v49 }
 0x6fb   :  { %1399 = vmatpush.msrb.mxu0 %v2598_v29 }
 0x6fd   :  { %1400 = vmatpush.msrb.mxu0 %v2603_v30 }
 0x6ff   :  { %1401 = vmatpush.msrb.mxu0 %v2613_v33 }
 0x701   :  { %1402 = vmatpush.msrb.mxu0 %v2620_v34 }
 0x715   :  { %v725_v51 = vpop.permute.xlu2 %724 }
 0x716   :  { %v727_v53 = vadd.f32 %v725_v51, %v569_v50 }
 0x718   :  { %2257 = vtanh.f32 %v727_v53 }
 0x719   :  { %2259 = vpow2.f32 %v2170_v59 }
 0x71e   :  { %v2258_v54 = vpop.eup %2257 }
 0x71f   :  { %v730_v55 = vrot.slane %v2258_v54, 6  ;;  %v2260_v60 = vpop.eup %2259 }
 0x720   :  { %v700_v61 = vadd.f32 1.0, %v2260_v60 }
 0x721   :  { %v732_v56 = vsub.f32 %v2682_v1, %v730_v55 }
 0x722   :  { %2261 = vrcp.f32 %v700_v61  ;;  %v712_v13 = vand.u32 2147483648, %v700_v61  ;;  %vm706_vm3 = vweird.f32 %v700_v61  ;;  %v710_v14 = vand.u32 2147483647, %v700_v61 }
 0x723   :  { %v734_v57 = vrot.slane %v732_v56, 2 }
 0x724   :  { %v713_v16 = vor.u32 1.1754944e-38, %v712_v13  ;;  %vm711_vm5 = vcmp.eq.f32.partialorder %v710_v14, 8.507059e+37 }
 0x725   :  { %735 = vrot.lane.b32.xlu0 %v734_v57, %s2437_s2 }
 0x728   :  { %v2262_v2 = vpop.eup %2261 }
 0x729   :  { %v702_v4 = vmul.f32 %v2262_v2, %v700_v61  ;;  %vm707_vm2 = vweird.f32 %v2262_v2 }
 0x72a   :  { %vm708_vm4 = vmor %vm706_vm3, %vm707_vm2 }
 0x72b   :  { %v703_v6 = vsub.f32 1.0, %v702_v4 }
 0x72d   :  { %v704_v7 = vmul.f32 %v2262_v2, %v703_v6 }
 0x72f   :  { %v705_v8 = vadd.f32 %v2262_v2, %v704_v7 }
 0x731   :  { %v709_v15 = vsel %vm708_vm4, %v2262_v2, %v705_v8 }
 0x732   :  { %v714_v17 = vsel %vm711_vm5, %v713_v16, %v709_v15 }
 0x777   :  { %v592_v62 = vpop.f32.mrf.mxu0 }
 0x778   :  { %v618_v63 = vadd.f32 %v592_v62, %v2644_v12  ;;  %v596_v21 = vrot.slane %v592_v62, 4 }
 0x77a   :  { %v620_v0 = vrot.slane %v618_v63, 4  ;;  %v598_v23 = vadd.f32 %v596_v21, %v567_v22 }
 0x77c   :  { %621 = vrot.lane.b32.xlu2 %v620_v0, %s2435_s30  ;;  %v2167_v25 = vmul.f32 -1.442695, %v598_v23 }
 0x77e   :  { %2263 = vpow2.f32 %v2167_v25 }
 0x784   :  { %v2264_v26 = vpop.eup %2263 }
 0x785   :  { %v602_v28 = vadd.f32 1.0, %v2264_v26 }
 0x787   :  { %2265 = vrcp.f32 %v602_v28  ;;  %v614_v38 = vand.u32 2147483648, %v602_v28  ;;  %vm608_vm7 = vweird.f32 %v602_v28  ;;  %v612_v39 = vand.u32 2147483647, %v602_v28 }
 0x789   :  { %v615_v41 = vor.u32 1.1754944e-38, %v614_v38  ;;  %vm613_vm9 = vcmp.eq.f32.partialorder %v612_v39, 8.507059e+37 }
 0x78d   :  { %v2266_v31 = vpop.eup %2265 }
 0x78e   :  { %v604_v32 = vmul.f32 %v2266_v31, %v602_v28  ;;  %vm609_vm6 = vweird.f32 %v2266_v31 }
 0x78f   :  { %vm610_vm8 = vmor %vm608_vm7, %vm609_vm6 }
 0x790   :  { %v605_v35 = vsub.f32 1.0, %v604_v32 }
 0x792   :  { %v606_v36 = vmul.f32 %v2266_v31, %v605_v35 }
 0x794   :  { %v607_v37 = vadd.f32 %v2266_v31, %v606_v36 }
 0x796   :  { %v611_v40 = vsel %vm610_vm8, %v2266_v31, %v607_v37 }
 0x797   :  { %v736_v18 = vpop.permute.xlu0 %735  ;;  %v616_v42 = vsel %vm613_vm9, %v615_v41, %v611_v40 }
 0x798   :  { %v738_v20 = vmul.f32 %v736_v18, %v714_v17 }
 0x79a   :  { %740 = vrot.lane.b32.xlu1 %v738_v20, %s2438_s0 }
 0x7d6   :  { %v622_v43 = vpop.permute.xlu2 %621 }
 0x7d7   :  { %v624_v44 = vmul.f32 %v622_v43, %v616_v42 }
 0x7d9   :  { %626 = vrot.lane.b32.xlu1 %v624_v44, %s2435_s30 }
 0x80c   :  { %v741_v45 = vpop.permute.xlu1 %740 }
 0x80d   :  { %v2713_v46 = vadd.f32 %v2258_v54, %v741_v45 }
 0x80f   :  { %v853_v47 = vrot.slane %v2713_v46, 2 }
 0x811   :  { %854 = vrot.lane.b32.xlu0 %v853_v47, %s2437_s2 }
 0x84b   :  { %v627_v48 = vpop.permute.xlu1 %626 }
 0x84c   :  { %v629_v49 = vadd.f32 %v627_v48, %v567_v22  ;;  %v776_v22 = vld [vmem:[#allocation2 + $0x18] sm:$0x3] }
 0x84e   :  { %2267 = vtanh.f32 %v629_v49 }
 0x854   :  { %v2268_v50 = vpop.eup %2267 }
 0x855   :  { %v632_v51 = vrot.slane %v2268_v50, 2 }
 0x857   :  { %v634_v53 = vsub.f32 %v2697_v24, %v632_v51 }
 0x859   :  { %v636_v55 = vrot.slane %v634_v53, 6  ;;  %v774_v53 = vld [vmem:[#allocation2] sm:$0xc0] }
 0x85b   :  { %637 = vrot.lane.b32.xlu2 %v636_v55, %s2437_s2 }
 0x883   :  { %v855_v56 = vpop.permute.xlu0 %854 }
 0x884   :  { %2173 = vmatmul.msk.f32.vlgmr.msrb.gmra.mxu3 %vm160_vm14, %v855_v56 }
 0x885   :  { %1680 = vmatpush.msrb.mxu3 %v2530_v3 }
 0x887   :  { %1681 = vmatpush.msrb.mxu3 %v2538_v5  ;;  %v775_v5 = vld [vmem:[#allocation2 + $0x10] sm:$0x3] }
 0x889   :  { %1682 = vmatpush.msrb.mxu3 %v2552_v9 }
 0x88b   :  { %1683 = vmatpush.msrb.mxu3 %v2559_v10 }
 0x8b5   :  { %v638_v54 = vpop.permute.xlu2 %637 }
 0x8b6   :  { %v640_v57 = vmul.f32 %v638_v54, %v616_v42 }
 0x8b8   :  { %642 = vrot.lane.b32.xlu0 %v640_v57, %s2438_s0 }
 0x907   :  { %v875_v58 = vpop.f32.mrf.mxu3 }
 0x908   :  { %v922_v59 = vadd.f32 %v875_v58, %v2590_v19  ;;  %879 = vrot.lane.b32.xlu2 %v875_v58, %s2437_s2 }
 0x90a   :  { %924 = vrot.lane.b32.xlu0 %v922_v59, %s2438_s0 }
 0x92a   :  { %v643_v60 = vpop.permute.xlu0 %642 }
 0x92b   :  { %v2728_v61 = vadd.f32 %v2268_v50, %v643_v60 }
 0x92d   :  { %v777_v3 = vrot.slane %v2728_v61, 4 }
 0x92f   :  { %778 = vrot.lane.b32.xlu1 %v777_v3, %s2435_s30 }
 0x962   :  { %v880_v9 = vpop.permute.xlu2 %879 }
 0x963   :  { %v882_v10 = vadd.f32 %v880_v9, %v775_v5 }
 0x965   :  { %v2174_v62 = vmul.f32 -1.442695, %v882_v10 }
 0x967   :  { %2269 = vpow2.f32 %v2174_v62 }
 0x96d   :  { %v2270_v63 = vpop.eup %2269 }
 0x96e   :  { %v886_v0 = vadd.f32 1.0, %v2270_v63 }
 0x970   :  { %2271 = vrcp.f32 %v886_v0  ;;  %v898_v7 = vand.u32 2147483648, %v886_v0  ;;  %v896_v13 = vand.u32 2147483647, %v886_v0  ;;  %vm892_vm11 = vweird.f32 %v886_v0 }
 0x972   :  { %v899_v15 = vor.u32 1.1754944e-38, %v898_v7  ;;  %vm897_vm13 = vcmp.eq.f32.partialorder %v896_v13, 8.507059e+37 }
 0x976   :  { %v2272_v2 = vpop.eup %2271 }
 0x977   :  { %v888_v4 = vmul.f32 %v2272_v2, %v886_v0  ;;  %vm893_vm10 = vweird.f32 %v2272_v2 }
 0x978   :  { %vm894_vm12 = vmor %vm892_vm11, %vm893_vm10 }
 0x979   :  { %v889_v6 = vsub.f32 1.0, %v888_v4 }
 0x97b   :  { %v890_v8 = vmul.f32 %v2272_v2, %v889_v6 }
 0x97c   :  { %v925_v17 = vpop.permute.xlu0 %924 }
 0x97d   :  { %v891_v14 = vadd.f32 %v2272_v2, %v890_v8 }
 0x97f   :  { %v895_v16 = vsel %vm894_vm12, %v2272_v2, %v891_v14 }
 0x980   :  { %v900_v18 = vsel %vm897_vm13, %v899_v15, %v895_v16 }
 0x981   :  { %v927_v20 = vmul.f32 %v925_v17, %v900_v18 }
 0x983   :  { %929 = vrot.lane.b32.xlu1 %v927_v20, %s2435_s30 }
 0x9a1   :  { %v779_v21 = vpop.permute.xlu1 %778 }
 0x9a2   :  { %2171 = vmatmul.msk.f32.vlgmr.msra.gmra.mxu2 %vm160_vm14, %v779_v21 }
 0x9a3   :  { %1604 = vmatpush.msra.mxu2 %v2598_v29 }
 0x9a5   :  { %1605 = vmatpush.msra.mxu2 %v2603_v30  ;;  %v902_v30 = vadd.f32 %v880_v9, %v776_v22 }
 0x9a7   :  { %1606 = vmatpush.msra.mxu2 %v2613_v33  ;;  %v2175_v33 = vmul.f32 -1.442695, %v902_v30 }
 0x9a9   :  { %1607 = vmatpush.msra.mxu2 %v2620_v34 }
 0x9f5   :  { %v930_v23 = vpop.permute.xlu1 %929 }
 0x9f6   :  { %v932_v25 = vadd.f32 %v930_v23, %v776_v22 }
 0x9f8   :  { %2273 = vtanh.f32 %v932_v25 }
 0x9f9   :  { %2275 = vpow2.f32 %v2175_v33 }
 0x9fe   :  { %v2274_v26 = vpop.eup %2273 }
 0x9ff   :  { %v935_v28 = vrot.slane %v2274_v26, 6  ;;  %v2276_v34 = vpop.eup %2275 }
 0xa00   :  { %v906_v37 = vadd.f32 1.0, %v2276_v34 }
 0xa01   :  { %v937_v31 = vsub.f32 %v2713_v46, %v935_v28 }
 0xa02   :  { %2277 = vrcp.f32 %v906_v37  ;;  %v918_v43 = vand.u32 2147483648, %v906_v37  ;;  %vm912_vm1 = vweird.f32 %v906_v37  ;;  %v916_v44 = vand.u32 2147483647, %v906_v37 }
 0xa03   :  { %v939_v32 = vrot.slane %v937_v31, 2 }
 0xa04   :  { %v919_v47 = vor.u32 1.1754944e-38, %v918_v43  ;;  %vm917_vm3 = vcmp.eq.f32.partialorder %v916_v44, 8.507059e+37 }
 0xa05   :  { %940 = vrot.lane.b32.xlu2 %v939_v32, %s2437_s2 }
 0xa08   :  { %v2278_v38 = vpop.eup %2277 }
 0xa09   :  { %v908_v39 = vmul.f32 %v2278_v38, %v906_v37  ;;  %vm913_vm15 = vweird.f32 %v2278_v38 }
 0xa0a   :  { %vm914_vm2 = vmor %vm912_vm1, %vm913_vm15 }
 0xa0b   :  { %v909_v40 = vsub.f32 1.0, %v908_v39 }
 0xa0d   :  { %v910_v41 = vmul.f32 %v2278_v38, %v909_v40 }
 0xa0f   :  { %v911_v42 = vadd.f32 %v2278_v38, %v910_v41 }
 0xa11   :  { %v915_v45 = vsel %vm914_vm2, %v2278_v38, %v911_v42 }
 0xa12   :  { %v920_v48 = vsel %vm917_vm3, %v919_v47, %v915_v45 }
 0xa25   :  { %v799_v35 = vpop.f32.mrf.mxu2 }
 0xa26   :  { %v825_v29 = vadd.f32 %v799_v35, %v2644_v12  ;;  %v803_v51 = vrot.slane %v799_v35, 2  ;;  %v980_v35 = vld [vmem:[#allocation2] sm:$0xc0] }
 0xa28   :  { %v827_v36 = vrot.slane %v825_v29, 2  ;;  %v805_v55 = vadd.f32 %v803_v51, %v774_v53 }
 0xa2a   :  { %828 = vrot.lane.b32.xlu0 %v827_v36, %s2435_s30  ;;  %v2172_v56 = vmul.f32 -1.442695, %v805_v55  ;;  %v981_v55 = vld [vmem:[#allocation2 + $0x8] sm:$0xc0] }
 0xa2c   :  { %2279 = vpow2.f32 %v2172_v56 }
 0xa32   :  { %v2280_v54 = vpop.eup %2279 }
 0xa33   :  { %v809_v57 = vadd.f32 1.0, %v2280_v54 }
 0xa35   :  { %2281 = vrcp.f32 %v809_v57  ;;  %v821_v9 = vand.u32 2147483648, %v809_v57  ;;  %vm815_vm5 = vweird.f32 %v809_v57  ;;  %v819_v10 = vand.u32 2147483647, %v809_v57 }
 0xa37   :  { %v822_v63 = vor.u32 1.1754944e-38, %v821_v9  ;;  %vm820_vm7 = vcmp.eq.f32.partialorder %v819_v10, 8.507059e+37  ;;  %v979_v9 = vld [vmem:[#allocation2 + $0x10] sm:$0x3] }
 0xa3b   :  { %v2282_v58 = vpop.eup %2281 }
 0xa3c   :  { %v811_v59 = vmul.f32 %v2282_v58, %v809_v57  ;;  %vm816_vm4 = vweird.f32 %v2282_v58 }
 0xa3d   :  { %vm817_vm6 = vmor %vm815_vm5, %vm816_vm4 }
 0xa3e   :  { %v812_v60 = vsub.f32 1.0, %v811_v59 }
 0xa40   :  { %v813_v3 = vmul.f32 %v2282_v58, %v812_v60 }
 0xa42   :  { %v814_v5 = vadd.f32 %v2282_v58, %v813_v3 }
 0xa44   :  { %v818_v62 = vsel %vm817_vm6, %v2282_v58, %v814_v5 }
 0xa45   :  { %v823_v0 = vsel %vm820_vm7, %v822_v63, %v818_v62 }
 0xa5f   :  { %v941_v49 = vpop.permute.xlu2 %940 }
 0xa60   :  { %v943_v50 = vmul.f32 %v941_v49, %v920_v48 }
 0xa62   :  { %945 = vrot.lane.b32.xlu1 %v943_v50, %s2438_s0 }
 0xa9c   :  { %v829_v2 = vpop.permute.xlu0 %828 }
 0xa9d   :  { %v831_v4 = vmul.f32 %v829_v2, %v823_v0 }
 0xa9f   :  { %833 = vrot.lane.b32.xlu2 %v831_v4, %s2435_s30 }
 0xad4   :  { %v946_v6 = vpop.permute.xlu1 %945 }
 0xad5   :  { %v2744_v7 = vadd.f32 %v2274_v26, %v946_v6 }
 0xad7   :  { %965 = vrot.lane.b32.xlu0 %v2744_v7, %s2437_s2 }
 0xaf9   :  { %v834_v8 = vpop.permute.xlu2 %833 }
 0xafa   :  { %v836_v13 = vadd.f32 %v834_v8, %v774_v53 }
 0xafc   :  { %2283 = vtanh.f32 %v836_v13 }
 0xb02   :  { %v2284_v14 = vpop.eup %2283 }
 0xb03   :  { %v839_v15 = vrot.slane %v2284_v14, 2 }
 0xb05   :  { %v841_v16 = vsub.f32 %v2728_v61, %v839_v15 }
 0xb07   :  { %v843_v17 = vrot.slane %v841_v16, 6 }
 0xb09   :  { %844 = vrot.lane.b32.xlu1 %v843_v17, %s2437_s2 }
 0xb49   :  { %v2750_v18 = vpop.permute.xlu0 %965 }
 0xb4a   :  { %2178 = vmatmul.msk.f32.vlgmr.msra.gmra.mxu1 %vm160_vm14, %v2750_v18 }
 0xb7b   :  { %v845_v20 = vpop.permute.xlu1 %844 }
 0xb7c   :  { %v847_v21 = vmul.f32 %v845_v20, %v823_v0 }
 0xb7e   :  { %849 = vrot.lane.b32.xlu2 %v847_v21, %s2438_s0 }
 0xbc7   :  { %v1073_v22 = vpop.f32.mrf.mxu1 }
 0xbc8   :  { %v1077_v23 = vrot.slane %v1073_v22, 2  ;;  %v1121_v25 = vadd.f32 %v1073_v22, %v2590_v19 }
 0xbca   :  { %v1123_v26 = vrot.slane %v1121_v25, 2  ;;  %1078 = vrot.lane.b32.xlu1 %v1077_v23, %s2437_s2 }
 0xbcc   :  { %1124 = vrot.lane.b32.xlu2 %v1123_v26, %s2438_s0 }
 0xbd8   :  { %v850_v28 = vpop.permute.xlu2 %849 }
 0xbd9   :  { %v2758_v31 = vadd.f32 %v2284_v14, %v850_v28 }
 0xbdb   :  { %v982_v32 = vrot.slane %v2758_v31, 6 }
 0xbdd   :  { %983 = vrot.lane.b32.xlu0 %v982_v32, %s2435_s30 }
 0xc26   :  { %v1125_v48 = vpop.permute.xlu2 %1124 }
 0xc3c   :  { %v1079_v29 = vpop.permute.xlu1 %1078 }
 0xc3d   :  { %v1081_v36 = vadd.f32 %v1079_v29, %v980_v35  ;;  %v1101_v3 = vadd.f32 %v1079_v29, %v981_v55 }
 0xc3f   :  { %v2179_v30 = vmul.f32 -1.442695, %v1081_v36  ;;  %v2180_v5 = vmul.f32 -1.442695, %v1101_v3 }
 0xc41   :  { %2285 = vpow2.f32 %v2179_v30 }
 0xc47   :  { %v2286_v33 = vpop.eup %2285 }
 0xc48   :  { %v1085_v34 = vadd.f32 1.0, %v2286_v33 }
 0xc4a   :  { %2287 = vrcp.f32 %v1085_v34  ;;  %v1097_v41 = vand.u32 2147483648, %v1085_v34  ;;  %v1095_v43 = vand.u32 2147483647, %v1085_v34  ;;  %vm1091_vm9 = vweird.f32 %v1085_v34 }
 0xc4c   :  { %v1098_v45 = vor.u32 1.1754944e-38, %v1097_v41  ;;  %vm1096_vm11 = vcmp.eq.f32.partialorder %v1095_v43, 8.507059e+37 }
 0xc4f   :  { %v984_v37 = vpop.permute.xlu0 %983 }
 0xc50   :  { %v2288_v38 = vpop.eup %2287  ;;  %2176 = vmatmul.msk.f32.vlgmr.msra.gmra.mxu0 %vm160_vm14, %v984_v37 }
 0xc51   :  { %v1087_v39 = vmul.f32 %v2288_v38, %v1085_v34  ;;  %vm1092_vm8 = vweird.f32 %v2288_v38 }
 0xc52   :  { %vm1093_vm10 = vmor %vm1091_vm9, %vm1092_vm8 }
 0xc53   :  { %v1088_v40 = vsub.f32 1.0, %v1087_v39 }
 0xc55   :  { %v1089_v42 = vmul.f32 %v2288_v38, %v1088_v40 }
 0xc57   :  { %v1090_v44 = vadd.f32 %v2288_v38, %v1089_v42 }
 0xc59   :  { %v1094_v47 = vsel %vm1093_vm10, %v2288_v38, %v1090_v44 }
 0xc5a   :  { %v1099_v49 = vsel %vm1096_vm11, %v1098_v45, %v1094_v47 }
 0xc5b   :  { %v1127_v50 = vmul.f32 %v1125_v48, %v1099_v49 }
 0xc5d   :  { %1129 = vrot.lane.b32.xlu0 %v1127_v50, %s2435_s30 }
 0xccd   :  { %v1004_v51 = vpop.f32.mrf.mxu0 }
 0xcce   :  { %v1027_v53 = vadd.f32 %v1004_v51, %v2644_v12  ;;  %v1007_v10 = vadd.f32 %v1004_v51, %v979_v9 }
 0xccf   :  { %v1130_v56 = vpop.permute.xlu0 %1129 }
 0xcd0   :  { %v1132_v54 = vadd.f32 %v1130_v56, %v981_v55  ;;  %1029 = vrot.lane.b32.xlu1 %v1027_v53, %s2435_s30  ;;  %v2177_v62 = vmul.f32 -1.442695, %v1007_v10 }
 0xcd2   :  { %2289 = vtanh.f32 %v1132_v54 }
 0xcd3   :  { %2291 = vpow2.f32 %v2180_v5 }
 0xcd4   :  { %2293 = vpow2.f32 %v2177_v62 }
 0xcd8   :  { %v2290_v57 = vpop.eup %2289 }
 0xcd9   :  { %v1135_v58 = vrot.slane %v2290_v57, 6  ;;  %v2292_v63 = vpop.eup %2291 }
 0xcda   :  { %v1105_v0 = vadd.f32 1.0, %v2292_v63  ;;  %v2294_v2 = vpop.eup %2293 }
 0xcdb   :  { %v1137_v59 = vsub.f32 %v2744_v7, %v1135_v58  ;;  %v1011_v4 = vadd.f32 1.0, %v2294_v2 }
 0xcdc   :  { %2295 = vrcp.f32 %v1105_v0  ;;  %v1117_v21 = vand.u32 2147483648, %v1105_v0  ;;  %vm1111_vm13 = vweird.f32 %v1105_v0  ;;  %v1115_v22 = vand.u32 2147483647, %v1105_v0 }
 0xcdd   :  { %v1139_v60 = vrot.slane %v1137_v59, 2  ;;  %2297 = vrcp.f32 %v1011_v4  ;;  %v1023_v36 = vand.u32 2147483648, %v1011_v4  ;;  %vm1017_vm3 = vweird.f32 %v1011_v4 }
 0xcde   :  { %v1118_v26 = vor.u32 1.1754944e-38, %v1117_v21  ;;  %vm1116_vm1 = vcmp.eq.f32.partialorder %v1115_v22, 8.507059e+37  ;;  %v1021_v30 = vand.u32 2147483647, %v1011_v4  ;;  %v1179_v22 = vld [vmem:[#allocation2 + $0x8] sm:$0x30] }
 0xcdf   :  { %1140 = vrot.lane.b32.xlu2 %v1139_v60, %s2437_s2  ;;  %v1024_v34 = vor.u32 1.1754944e-38, %v1023_v36  ;;  %v1178_v60 = vld [vmem:[#allocation2] sm:$0x30] }
 0xce0   :  { %vm1022_vm5 = vcmp.eq.f32.partialorder %v1021_v30, 8.507059e+37 }
 0xce2   :  { %v2296_v6 = vpop.eup %2295 }
 0xce3   :  { %v1107_v8 = vmul.f32 %v2296_v6, %v1105_v0  ;;  %v2298_v14 = vpop.eup %2297  ;;  %vm1112_vm12 = vweird.f32 %v2296_v6 }
 0xce4   :  { %v1013_v16 = vmul.f32 %v2298_v14, %v1011_v4  ;;  %vm1113_vm15 = vmor %vm1111_vm13, %vm1112_vm12  ;;  %vm1018_vm2 = vweird.f32 %v2298_v14 }
 0xce5   :  { %v1108_v13 = vsub.f32 1.0, %v1107_v8  ;;  %vm1019_vm4 = vmor %vm1017_vm3, %vm1018_vm2 }
 0xce6   :  { %v1014_v20 = vsub.f32 1.0, %v1013_v16 }
 0xce7   :  { %v1109_v15 = vmul.f32 %v2296_v6, %v1108_v13 }
 0xce8   :  { %v1015_v25 = vmul.f32 %v2298_v14, %v1014_v20 }
 0xce9   :  { %v1110_v17 = vadd.f32 %v2296_v6, %v1109_v15 }
 0xcea   :  { %v1016_v29 = vadd.f32 %v2298_v14, %v1015_v25 }
 0xceb   :  { %v1114_v23 = vsel %vm1113_vm15, %v2296_v6, %v1110_v17 }
 0xcec   :  { %v1119_v28 = vsel %vm1116_vm1, %v1118_v26, %v1114_v23  ;;  %v1020_v33 = vsel %vm1019_vm4, %v2298_v14, %v1016_v29 }
 0xced   :  { %v1025_v37 = vsel %vm1022_vm5, %v1024_v34, %v1020_v33 }
 0xd39   :  { %v1141_v32 = vpop.permute.xlu2 %1140 }
 0xd3a   :  { %v1143_v35 = vmul.f32 %v1141_v32, %v1119_v28 }
 0xd3c   :  { %1145 = vrot.lane.b32.xlu1 %v1143_v35, %s2438_s0 }
 0xd42   :  { %v1030_v38 = vpop.permute.xlu1 %1029 }
 0xd43   :  { %v1032_v39 = vmul.f32 %v1030_v38, %v1025_v37 }
 0xd45   :  { %1034 = vrot.lane.b32.xlu0 %v1032_v39, %s2435_s30 }
 0xdae   :  { %v1146_v40 = vpop.permute.xlu1 %1145 }
 0xdaf   :  { %v2770_v41 = vadd.f32 %v2290_v57, %v1146_v40 }
 0xdb1   :  { %v1253_v42 = vrot.slane %v2770_v41, 6 }
 0xdb3   :  { %1254 = vrot.lane.b32.xlu2 %v1253_v42, %s2437_s2 }
 0xdb7   :  { %v1035_v43 = vpop.permute.xlu0 %1034 }
 0xdb8   :  { %v1037_v44 = vadd.f32 %v1035_v43, %v979_v9 }
 0xdba   :  { %2299 = vtanh.f32 %v1037_v44 }
 0xdc0   :  { %v2300_v45 = vpop.eup %2299 }
 0xdc1   :  { %v1040_v47 = vrot.slane %v2300_v45, 2 }
 0xdc3   :  { %v1042_v48 = vsub.f32 %v2758_v31, %v1040_v47 }
 0xdc5   :  { %v1044_v49 = vrot.slane %v1042_v48, 6 }
 0xdc7   :  { %1045 = vrot.lane.b32.xlu0 %v1044_v49, %s2437_s2 }
 0xe0d   :  { %v1255_v50 = vpop.permute.xlu2 %1254 }
 0xe0e   :  { %2183 = vmatmul.msk.f32.vlgmr.msra.gmra.mxu3 %vm160_vm14, %v1255_v50 }
 0xe39   :  { %v1046_v51 = vpop.permute.xlu0 %1045 }
 0xe3a   :  { %v1048_v53 = vmul.f32 %v1046_v51, %v1025_v37  ;;  %v1177_v37 = vld [vmem:[#allocation2 + $0x10] sm:$0xc] }
 0xe3c   :  { %1050 = vrot.lane.b32.xlu1 %v1048_v53, %s2438_s0 }
 0xe91   :  { %v1275_v55 = vpop.f32.mrf.mxu3 }
 0xe92   :  { %v1279_v56 = vrot.slane %v1275_v55, 4  ;;  %v1323_v54 = vadd.f32 %v1275_v55, %v2590_v19 }
 0xe94   :  { %v1325_v57 = vrot.slane %v1323_v54, 4  ;;  %1280 = vrot.lane.b32.xlu0 %v1279_v56, %s2437_s2 }
 0xe96   :  { %1326 = vrot.lane.b32.xlu1 %v1325_v57, %s2438_s0 }
 0xeae   :  { %v1051_v58 = vpop.permute.xlu1 %1050 }
 0xeaf   :  { %v2781_v59 = vadd.f32 %v2300_v45, %v1051_v58 }
 0xeb1   :  { %1150 = vrot.lane.b32.xlu2 %v2781_v59, %s2435_s30 }
 0xf06   :  { %v1281_v3 = vpop.permute.xlu0 %1280 }
 0xf07   :  { %v1283_v5 = vadd.f32 %v1281_v3, %v1178_v60  ;;  %v1303_v34 = vadd.f32 %v1281_v3, %v1179_v22 }
 0xf08   :  { %v1327_v20 = vpop.permute.xlu1 %1326 }
 0xf09   :  { %v2184_v9 = vmul.f32 -1.442695, %v1283_v5  ;;  %v2185_v39 = vmul.f32 -1.442695, %v1303_v34 }
 0xf0b   :  { %v2785_v10 = vpop.permute.xlu2 %1150  ;;  %2301 = vpow2.f32 %v2184_v9 }
 0xf0c   :  { %2181 = vmatmul.msk.f32.vlgmr.msrb.gmra.mxu2 %vm160_vm14, %v2785_v10 }
 0xf11   :  { %v2302_v62 = vpop.eup %2301 }
 0xf12   :  { %v1287_v63 = vadd.f32 1.0, %v2302_v62 }
 0xf14   :  { %2303 = vrcp.f32 %v1287_v63  ;;  %v1299_v6 = vand.u32 2147483648, %v1287_v63  ;;  %v1297_v13 = vand.u32 2147483647, %v1287_v63  ;;  %vm1293_vm7 = vweird.f32 %v1287_v63 }
 0xf16   :  { %v1300_v15 = vor.u32 1.1754944e-38, %v1299_v6  ;;  %vm1298_vm9 = vcmp.eq.f32.partialorder %v1297_v13, 8.507059e+37 }
 0xf1a   :  { %v2304_v0 = vpop.eup %2303 }
 0xf1b   :  { %v1289_v2 = vmul.f32 %v2304_v0, %v1287_v63  ;;  %vm1294_vm6 = vweird.f32 %v2304_v0 }
 0xf1c   :  { %vm1295_vm8 = vmor %vm1293_vm7, %vm1294_vm6 }
 0xf1d   :  { %v1290_v4 = vsub.f32 1.0, %v1289_v2 }
 0xf1f   :  { %v1291_v8 = vmul.f32 %v2304_v0, %v1290_v4 }
 0xf21   :  { %v1292_v14 = vadd.f32 %v2304_v0, %v1291_v8 }
 0xf23   :  { %v1296_v16 = vsel %vm1295_vm8, %v2304_v0, %v1292_v14 }
 0xf24   :  { %v1301_v17 = vsel %vm1298_vm9, %v1300_v15, %v1296_v16 }
 0xf25   :  { %v1329_v21 = vmul.f32 %v1327_v20, %v1301_v17 }
 0xf27   :  { %1331 = vrot.lane.b32.xlu2 %v1329_v21, %s2435_s30 }
 0xf81   :  { %v1332_v23 = vpop.permute.xlu2 %1331 }
 0xf82   :  { %v1334_v25 = vadd.f32 %v1332_v23, %v1179_v22 }
 0xf84   :  { %2305 = vtanh.f32 %v1334_v25 }
 0xf85   :  { %2307 = vpow2.f32 %v2185_v39  ;;  %v1380_v39 = vld [vmem:[#allocation2] sm:$0xc] }
 0xf8a   :  { %v2790_v26 = vpop.eup %2305 }
 0xf8b   :  { %v1337_v28 = vrot.slane %v2790_v26, 6  ;;  %v2308_v42 = vpop.eup %2307 }
 0xf8c   :  { %v1307_v44 = vadd.f32 1.0, %v2308_v42 }
 0xf8d   :  { %v1339_v32 = vsub.f32 %v2770_v41, %v1337_v28 }
 0xf8e   :  { %v1319_v57 = vand.u32 2147483648, %v1307_v44  ;;  %vm1313_vm11 = vweird.f32 %v1307_v44  ;;  %v1317_v58 = vand.u32 2147483647, %v1307_v44 }
 0xf8f   :  { %v1199_v35 = vpop.f32.mrf.mxu2  ;;  %v1341_v36 = vrot.slane %v1339_v32, 2 }
 0xf90   :  { %v1225_v29 = vadd.f32 %v1199_v35, %v2644_v12  ;;  %v1203_v33 = vrot.slane %v1199_v35, 6  ;;  %v1320_v62 = vor.u32 1.1754944e-38, %v1319_v57  ;;  %vm1318_vm2 = vcmp.eq.f32.partialorder %v1317_v58, 8.507059e+37 }
 0xf91   :  { %1342 = vrot.lane.b32.xlu1 %v1341_v36, %s2437_s2 }
 0xf92   :  { %v1227_v30 = vrot.slane %v1225_v29, 6  ;;  %v1205_v38 = vadd.f32 %v1203_v33, %v1177_v37 }
 0xf94   :  { %1228 = vrot.lane.b32.xlu0 %v1227_v30, %s2435_s30  ;;  %v2182_v40 = vmul.f32 -1.442695, %v1205_v38 }
 0xf96   :  { %2309 = vpow2.f32 %v2182_v40 }
 0xf97   :  { %2311 = vrcp.f32 %v1307_v44 }
 0xf9c   :  { %v2310_v43 = vpop.eup %2309 }
 0xf9d   :  { %v1209_v45 = vadd.f32 1.0, %v2310_v43  ;;  %v2312_v47 = vpop.eup %2311 }
 0xf9e   :  { %v1309_v49 = vmul.f32 %v2312_v47, %v1307_v44  ;;  %vm1314_vm10 = vweird.f32 %v2312_v47 }
 0xf9f   :  { %2313 = vrcp.f32 %v1209_v45  ;;  %vm1315_vm13 = vmor %vm1313_vm11, %vm1314_vm10  ;;  %v1221_v3 = vand.u32 2147483648, %v1209_v45  ;;  %vm1215_vm15 = vweird.f32 %v1209_v45  ;;  %v1219_v9 = vand.u32 2147483647, %v1209_v45 }
 0xfa0   :  { %v1310_v51 = vsub.f32 1.0, %v1309_v49 }
 0xfa1   :  { %v1222_v4 = vor.u32 1.1754944e-38, %v1221_v3  ;;  %vm1220_vm3 = vcmp.eq.f32.partialorder %v1219_v9, 8.507059e+37  ;;  %v1381_v9 = vld [vmem:[#allocation2 + $0x8] sm:$0xc] }
 0xfa2   :  { %v1311_v55 = vmul.f32 %v2312_v47, %v1310_v51 }
 0xfa4   :  { %v1312_v54 = vadd.f32 %v2312_v47, %v1311_v55 }
 0xfa5   :  { %v2314_v48 = vpop.eup %2313 }
 0xfa6   :  { %v1211_v50 = vmul.f32 %v2314_v48, %v1209_v45  ;;  %vm1216_vm12 = vweird.f32 %v2314_v48  ;;  %v1316_v5 = vsel %vm1315_vm13, %v2312_v47, %v1312_v54 }
 0xfa7   :  { %vm1217_vm1 = vmor %vm1215_vm15, %vm1216_vm12  ;;  %v1321_v0 = vsel %vm1318_vm2, %v1320_v62, %v1316_v5  ;;  %vm330_vm2 = vcmask 254976  }
 0xfa8   :  { %v1212_v53 = vsub.f32 1.0, %v1211_v50 }
 0xfaa   :  { %v1213_v56 = vmul.f32 %v2314_v48, %v1212_v53 }
 0xfac   :  { %v1214_v60 = vadd.f32 %v2314_v48, %v1213_v56 }
 0xfae   :  { %v1218_v63 = vsel %vm1217_vm1, %v2314_v48, %v1214_v60 }
 0xfaf   :  { %v1223_v13 = vsel %vm1220_vm3, %v1222_v4, %v1218_v63  ;;  %vm334_vm3 = vcmask 1024  }
0x1003   :  { %v1343_v2 = vpop.permute.xlu1 %1342 }
0x1004   :  { %v1345_v6 = vmul.f32 %v1343_v2, %v1321_v0 }
0x1006   :  { %v1229_v8 = vpop.permute.xlu0 %1228  ;;  %1347 = vrot.lane.b32.xlu0 %v1345_v6, %s2438_s0 }
0x1007   :  { %v1231_v14 = vmul.f32 %v1229_v8, %v1223_v13 }
0x1009   :  { %1233 = vrot.lane.b32.xlu2 %v1231_v14, %s2435_s30 }
0x1063   :  { %v1234_v15 = vpop.permute.xlu2 %1233 }
0x1064   :  { %v1236_v16 = vadd.f32 %v1234_v15, %v1177_v37  ;;  %v1379_v15 = vld [vmem:[#allocation2 + $0x10] sm:$0x30] }
0x1066   :  { %2315 = vtanh.f32 %v1236_v16 }
0x106c   :  { %v2316_v17 = vpop.eup %2315 }
0x106d   :  { %v1239_v20 = vrot.slane %v2316_v17, 2 }
0x106f   :  { %v1241_v21 = vsub.f32 %v2781_v59, %v1239_v20 }
0x1071   :  { %v1243_v22 = vrot.slane %v1241_v21, 6 }
0x1073   :  { %1244 = vrot.lane.b32.xlu1 %v1243_v22, %s2437_s2 }
0x1078   :  { %v1348_v23 = vpop.permute.xlu0 %1347 }
0x1079   :  { %v2802_v25 = vadd.f32 %v2790_v26, %v1348_v23 }
0x107b   :  { %v1458_v28 = vrot.slane %v2802_v25, 4 }
0x107d   :  { %1459 = vrot.lane.b32.xlu2 %v1458_v28, %s2437_s2 }
0x10d7   :  { %v1460_v32 = vpop.permute.xlu2 %1459 }
0x10d8   :  { %2188 = vmatmul.msk.f32.vlgmr.msrb.gmra.mxu1 %vm160_vm14, %v1460_v32 }
0x10e5   :  { %v1245_v35 = vpop.permute.xlu1 %1244 }
0x10e6   :  { %v1247_v29 = vmul.f32 %v1245_v35, %v1223_v13 }
0x10e8   :  { %1249 = vrot.lane.b32.xlu0 %v1247_v29, %s2438_s0 }
0x1155   :  { %v1480_v36 = vpop.f32.mrf.mxu1 }
0x1156   :  { %v1484_v30 = vrot.slane %v1480_v36, 6  ;;  %v1528_v33 = vadd.f32 %v1480_v36, %v2590_v19 }
0x1158   :  { %v1530_v34 = vrot.slane %v1528_v33, 6  ;;  %1485 = vrot.lane.b32.xlu2 %v1484_v30, %s2437_s2 }
0x115a   :  { %v1250_v26 = vpop.permute.xlu0 %1249  ;;  %1531 = vrot.lane.b32.xlu0 %v1530_v34, %s2438_s0 }
0x115b   :  { %v2810_v37 = vadd.f32 %v2316_v17, %v1250_v26 }
0x115d   :  { %v1382_v38 = vrot.slane %v2810_v37, 2 }
0x115f   :  { %1383 = vrot.lane.b32.xlu1 %v1382_v38, %s2435_s30 }
0x11b2   :  { %v1486_v40 = vpop.permute.xlu2 %1485 }
0x11b3   :  { %v1488_v42 = vadd.f32 %v1486_v40, %v1380_v39  ;;  %v1508_v20 = vadd.f32 %v1486_v40, %v1381_v9 }
0x11b5   :  { %v2189_v43 = vmul.f32 -1.442695, %v1488_v42  ;;  %v2190_v21 = vmul.f32 -1.442695, %v1508_v20 }
0x11b7   :  { %2317 = vpow2.f32 %v2189_v43 }
0x11bd   :  { %v2318_v44 = vpop.eup %2317 }
0x11be   :  { %v1492_v45 = vadd.f32 1.0, %v2318_v44 }
0x11c0   :  { %2319 = vrcp.f32 %v1492_v45  ;;  %v1504_v50 = vand.u32 2147483648, %v1492_v45  ;;  %v1502_v53 = vand.u32 2147483647, %v1492_v45  ;;  %vm1498_vm5 = vweird.f32 %v1492_v45 }
0x11c2   :  { %v1505_v56 = vor.u32 1.1754944e-38, %v1504_v50  ;;  %vm1503_vm7 = vcmp.eq.f32.partialorder %v1502_v53, 8.507059e+37 }
0x11c6   :  { %v2320_v47 = vpop.eup %2319 }
0x11c7   :  { %v1494_v48 = vmul.f32 %v2320_v47, %v1492_v45  ;;  %vm1499_vm4 = vweird.f32 %v2320_v47 }
0x11c8   :  { %vm1500_vm6 = vmor %vm1498_vm5, %vm1499_vm4  ;;  %vm768_vm4 = vcmask 519426   ;;  %vm336_vm5 = vcmask 779776  }
0x11c9   :  { %v1495_v49 = vsub.f32 1.0, %v1494_v48 }
0x11cb   :  { %v1496_v51 = vmul.f32 %v2320_v47, %v1495_v49 }
0x11cc   :  { %v1532_v57 = vpop.permute.xlu0 %1531 }
0x11cd   :  { %v1497_v55 = vadd.f32 %v2320_v47, %v1496_v51 }
0x11cf   :  { %v1501_v54 = vsel %vm1500_vm6, %v2320_v47, %v1497_v55  ;;  %vm542_vm6 = vcmask 3074  }
0x11d0   :  { %v1506_v58 = vsel %vm1503_vm7, %v1505_v56, %v1501_v54 }
0x11d1   :  { %v1384_v60 = vpop.permute.xlu1 %1383  ;;  %v1534_v3 = vmul.f32 %v1532_v57, %v1506_v58 }
0x11d2   :  { %2186 = vmatmul.msk.f32.vlgmr.msrb.gmra.mxu0 %vm160_vm14, %v1384_v60 }
0x11d3   :  { %1536 = vrot.lane.b32.xlu2 %v1534_v3, %s2435_s30 }
0x122d   :  { %v1537_v5 = vpop.permute.xlu2 %1536 }
0x122e   :  { %v1539_v62 = vadd.f32 %v1537_v5, %v1381_v9 }
0x1230   :  { %2321 = vtanh.f32 %v1539_v62 }
0x1236   :  { %v2817_v63 = vpop.eup %2321 }
0x1237   :  { %v1542_v6 = vrot.slane %v2817_v63, 6 }
0x1239   :  { %v1544_v8 = vsub.f32 %v2802_v25, %v1542_v6 }
0x123b   :  { %v1546_v13 = vrot.slane %v1544_v8, 2 }
0x124f   :  { %v1404_v0 = vpop.f32.mrf.mxu0 }
0x1250   :  { %v1430_v2 = vadd.f32 %v1404_v0, %v2644_v12  ;;  %v1408_v14 = vrot.slane %v1404_v0, 4 }
0x1252   :  { %v1432_v4 = vrot.slane %v1430_v2, 4  ;;  %v1410_v16 = vadd.f32 %v1408_v14, %v1379_v15 }
0x1254   :  { %1433 = vrot.lane.b32.xlu1 %v1432_v4, %s2435_s30  ;;  %v2187_v17 = vmul.f32 -1.442695, %v1410_v16 }
0x1256   :  { %2323 = vpow2.f32 %v2187_v17 }
0x1257   :  { %2325 = vpow2.f32 %v2190_v21  ;;  %v337_v21 = vsel %vm336_vm5, %v2663_v52, -inf }
0x125c   :  { %1547 = vrot.lane.b32.xlu1 %v1546_v13, %s2437_s2  ;;  %v2324_v22 = vpop.eup %2323 }
0x125d   :  { %v1414_v23 = vadd.f32 1.0, %v2324_v22  ;;  %v2326_v28 = vpop.eup %2325 }
0x125e   :  { %v1512_v32 = vadd.f32 1.0, %v2326_v28 }
0x125f   :  { %2327 = vrcp.f32 %v1414_v23  ;;  %v1426_v39 = vand.u32 2147483648, %v1414_v23  ;;  %vm1420_vm9 = vweird.f32 %v1414_v23  ;;  %v1424_v40 = vand.u32 2147483647, %v1414_v23 }
0x1260   :  { %2329 = vrcp.f32 %v1512_v32  ;;  %v1524_v50 = vand.u32 2147483648, %v1512_v32  ;;  %vm1518_vm13 = vweird.f32 %v1512_v32  ;;  %v1522_v51 = vand.u32 2147483647, %v1512_v32 }
0x1261   :  { %v1427_v44 = vor.u32 1.1754944e-38, %v1426_v39  ;;  %vm1425_vm11 = vcmp.eq.f32.partialorder %v1424_v40, 8.507059e+37 }
0x1262   :  { %v1525_v55 = vor.u32 1.1754944e-38, %v1524_v50  ;;  %vm1523_vm1 = vcmp.eq.f32.partialorder %v1522_v51, 8.507059e+37 }
0x1265   :  { %v2328_v35 = vpop.eup %2327 }
0x1266   :  { %v1416_v29 = vmul.f32 %v2328_v35, %v1414_v23  ;;  %v2330_v30 = vpop.eup %2329  ;;  %vm1421_vm8 = vweird.f32 %v2328_v35 }
0x1267   :  { %v1514_v34 = vmul.f32 %v2330_v30, %v1512_v32  ;;  %vm1422_vm10 = vmor %vm1420_vm9, %vm1421_vm8  ;;  %vm1519_vm12 = vweird.f32 %v2330_v30 }
0x1268   :  { %v1417_v36 = vsub.f32 1.0, %v1416_v29  ;;  %vm1520_vm15 = vmor %vm1518_vm13, %vm1519_vm12  ;;  %vm753_vm12 = vcmask 783876   ;;  %vm537_vm13 = vcmask 257026  }
0x1269   :  { %v1515_v38 = vsub.f32 1.0, %v1514_v34 }
0x126a   :  { %v1418_v33 = vmul.f32 %v2328_v35, %v1417_v36 }
0x126b   :  { %v1516_v43 = vmul.f32 %v2330_v30, %v1515_v38  ;;  %v1584_v38 = vld [vmem:[#allocation2 + $0x10] sm:$0xc0] }
0x126c   :  { %v1419_v26 = vadd.f32 %v2328_v35, %v1418_v33 }
0x126d   :  { %v1517_v49 = vadd.f32 %v2330_v30, %v1516_v43 }
0x126e   :  { %v1423_v42 = vsel %vm1422_vm10, %v2328_v35, %v1419_v26 }
0x126f   :  { %v1428_v47 = vsel %vm1425_vm11, %v1427_v44, %v1423_v42  ;;  %v1521_v53 = vsel %vm1520_vm15, %v2330_v30, %v1517_v49  ;;  %vm3084_vm11 = vcmask 517376   ;;  %vm559_vm15 = vcmask 5124  }
0x1270   :  { %v1526_v56 = vsel %vm1523_vm1, %v1525_v55, %v1521_v53  ;;  %vm544_vm1 = vcmask 781826  }
0x12c6   :  { %v1434_v45 = vpop.permute.xlu1 %1433 }
0x12c7   :  { %v1436_v48 = vmul.f32 %v1434_v45, %v1428_v47 }
0x12c9   :  { %1438 = vrot.lane.b32.xlu0 %v1436_v48, %s2435_s30 }
0x12ce   :  { %v1548_v54 = vpop.permute.xlu1 %1547 }
0x12cf   :  { %v1550_v57 = vmul.f32 %v1548_v54, %v1526_v56  ;;  %v974_v54 = vsel %vm3084_vm11, %v2744_v7, -inf  ;;  %vm352_vm11 = vcmask 523526  }
0x12d1   :  { %1552 = vrot.lane.b32.xlu0 %v1550_v57, %s2438_s0 }
0x133b   :  { %v1439_v58 = vpop.permute.xlu0 %1438 }
0x133c   :  { %v1441_v60 = vadd.f32 %v1439_v58, %v1379_v15 }
0x133e   :  { %2331 = vtanh.f32 %v1441_v60 }
0x1343   :  { %v1553_v0 = vpop.permute.xlu0 %1552 }
0x1344   :  { %v2332_v3 = vpop.eup %2331  ;;  %v2829_v2 = vadd.f32 %v2817_v63, %v1553_v0  ;;  %v331_v63 = vsel %vm330_vm2, %v2668_v11, 0.0 }
0x1345   :  { %v1444_v5 = vrot.slane %v2332_v3, 2 }
0x1346   :  { %v1663_v4 = vrot.slane %v2829_v2, 2  ;;  %v1579_v20 = vsel %vm768_vm4, %v2829_v2, -inf }
0x1347   :  { %v1446_v9 = vsub.f32 %v2810_v37, %v1444_v5 }
0x1349   :  { %v1448_v62 = vrot.slane %v1446_v9, 6  ;;  %v1585_v9 = vld [vmem:[#allocation2] sm:$0x3] }
0x134b   :  { %1449 = vrot.lane.b32.xlu2 %v1448_v62, %s2437_s2 }
0x1353   :  { %1664 = vrot.lane.b32.xlu2 %v1663_v4, %s2437_s2 }
0x135b   :  { %534 = vrot.lane.b32.xlu2 %v2697_v24, %s2435_s30 }
0x1363   :  { %1366 = vrot.lane.b32.xlu2 %v2802_v25, %s2437_s2 }
0x136b   :  { %1164 = vrot.lane.b32.xlu2 %v2770_v41, %s2437_s2 }
0x13a5   :  { %v1450_v6 = vpop.permute.xlu2 %1449 }
0x13a6   :  { %v1452_v8 = vmul.f32 %v1450_v6, %v1428_v47 }
0x13a8   :  { %1454 = vrot.lane.b32.xlu1 %v1452_v8, %s2438_s0 }
0x13ad   :  { %v1665_v13 = vpop.permute.xlu2 %1664 }
0x13ae   :  { %2193 = vmatmul.msk.f32.vlgmr.msrb.gmra.mxu3 %vm160_vm14, %v1665_v13 }
0x13b5   :  { %v535_v60 = vpop.permute.xlu2 %534 }
0x13bd   :  { %v2899_v6 = vpop.permute.xlu2 %1366 }
0x13d2   :  { %332 = vadd.xlane.f32.xlu1 %v331_v63  ;;  %v2907_v63 = vpop.permute.xlu2 %1164 }
0x141a   :  { %v1455_v14 = vpop.permute.xlu1 %1454 }
0x141b   :  { %v2843_v15 = vadd.f32 %v2332_v3, %v1455_v14  ;;  %v538_v3 = vsel %vm537_vm13, %v535_v60, 0.0 }
0x141d   :  { %v1587_v16 = vrot.slane %v2843_v15, 4  ;;  %v1565_v58 = vsel %vm753_vm12, %v2843_v15, -inf }
0x141f   :  { %1588 = vrot.lane.b32.xlu0 %v1587_v16, %s2435_s30 }
0x1427   :  { %1571 = vrot.lane.b32.xlu0 %v2829_v2, %s2437_s2 }
0x142f   :  { %745 = vrot.lane.b32.xlu0 %v2728_v61, %s2435_s30 }
0x1431   :  { %v1685_v17 = vpop.f32.mrf.mxu3 }
0x1432   :  { %1689 = vrot.lane.b32.xlu1 %v1685_v17, %s2437_s2  ;;  %v1732_v57 = vadd.f32 %v1685_v17, %v2590_v19  ;;  %v545_v19 = vsel %vm544_vm1, %v2697_v24, -inf }
0x1437   :  { %950 = vrot.lane.b32.xlu0 %v2758_v31, %s2435_s30 }
0x1445   :  { %v333_v11 = vpop.xlane.xlu1 %332 }
0x1446   :  { %335 = vst.msk [vmem:[#allocation3] sm:$0x3] %vm334_vm3, %v333_v11 }
0x145c   :  { %1580 = vmax.xlane.f32.xlu1 %v1579_v20 }
0x1461   :  { %338 = vmax.xlane.f32.xlu0 %v337_v21 }
0x1491   :  { %v1589_v22 = vpop.permute.xlu0 %1588 }
0x1492   :  { %2191 = vmatmul.msk.f32.vlgmr.msra.gmra.mxu2 %vm160_vm14, %v1589_v22  ;;  %vm561_vm14 = vcmask 521476  }
0x1493   :  { %v1374_v34 = vsel %vm561_vm14, %v2802_v25, -inf }
0x1499   :  { %v2860_v23 = vpop.permute.xlu0 %1571 }
0x14a1   :  { %v2862_v28 = vpop.permute.xlu0 %745 }
0x14a4   :  { %v2864_v32 = vpop.permute.xlu1 %1689 }
0x14a5   :  { %v1692_v62 = vadd.f32 %v2864_v32, %v1585_v9 }
0x14a7   :  { %v2194_v0 = vmul.f32 -1.442695, %v1692_v62 }
0x14a9   :  { %v2866_v35 = vpop.permute.xlu0 %950 }
0x14cf   :  { %v1581_v29 = vpop.xlane.xlu1 %1580 }
0x14d0   :  { %1583 = vst.msk [vmem:[#allocation6] sm:$0xc] %vm542_vm6, %v1581_v29 }
0x14d4   :  { %v339_v36 = vpop.xlane.xlu0 %338 }
0x14d5   :  { %340 = vst.msk [vmem:[#allocation4] sm:$0x3] %vm334_vm3, %v339_v36 }
0x1515   :  { %v1609_v52 = vpop.f32.mrf.mxu2 }
0x1516   :  { %v1635_v30 = vadd.f32 %v1609_v52, %v2644_v12  ;;  %v1613_v26 = vrot.slane %v1609_v52, 2 }
0x1518   :  { %v1637_v33 = vrot.slane %v1635_v30, 2  ;;  %v1615_v39 = vadd.f32 %v1613_v26, %v1584_v38 }
0x151a   :  { %1638 = vrot.lane.b32.xlu0 %v1637_v33, %s2435_s30  ;;  %v2192_v40 = vmul.f32 -1.442695, %v1615_v39 }
0x151c   :  { %2333 = vpow2.f32 %v2192_v40 }
0x1522   :  { %v2334_v12 = vpop.eup %2333 }
0x1523   :  { %v1619_v42 = vadd.f32 1.0, %v2334_v12 }
0x1525   :  { %2335 = vrcp.f32 %v1619_v42  ;;  %v1631_v48 = vand.u32 2147483648, %v1619_v42  ;;  %vm1625_vm8 = vweird.f32 %v1619_v42  ;;  %v1629_v49 = vand.u32 2147483647, %v1619_v42 }
0x1526   :  { %2337 = vpow2.f32 %v2194_v0 }
0x1527   :  { %v1632_v51 = vor.u32 1.1754944e-38, %v1631_v48  ;;  %vm1630_vm10 = vcmp.eq.f32.partialorder %v1629_v49, 8.507059e+37 }
0x152b   :  { %v2336_v43 = vpop.eup %2335 }
0x152c   :  { %v1621_v25 = vmul.f32 %v2336_v43, %v1619_v42  ;;  %vm1626_vm7 = vweird.f32 %v2336_v43  ;;  %v2338_v13 = vpop.eup %2337  ;;  %v1172_v42 = vsel %vm352_vm11, %v2770_v41, -inf }
0x152d   :  { %vm1627_vm9 = vmor %vm1625_vm8, %vm1626_vm7  ;;  %vm345_vm7 = vcmask 261126   ;;  %v1696_v24 = vadd.f32 1.0, %v2338_v13 }
0x152e   :  { %v1622_v44 = vsub.f32 1.0, %v1621_v25 }
0x152f   :  { %2339 = vrcp.f32 %v1696_v24  ;;  %v1708_v33 = vand.u32 2147483648, %v1696_v24 }
0x1530   :  { %v1623_v45 = vmul.f32 %v2336_v43, %v1622_v44 }
0x1532   :  { %v1624_v47 = vadd.f32 %v2336_v43, %v1623_v45  ;;  %v754_v45 = vsel %vm753_vm12, %v2728_v61, -inf  ;;  %v1586_v61 = vld [vmem:[#allocation2 + $0x8] sm:$0x3] }
0x1533   :  { %v1712_v0 = vadd.f32 %v2864_v32, %v1586_v61 }
0x1534   :  { %v1628_v50 = vsel %vm1627_vm9, %v2336_v43, %v1624_v47  ;;  %vm1702_vm9 = vweird.f32 %v1696_v24  ;;  %v353_v43 = vsel %vm352_vm11, %v2648_v27, -inf  ;;  %vm350_vm11 = vcmask 7174  }
0x1535   :  { %v2880_v53 = vsel %vm1630_vm10, %v1632_v51, %v1628_v50  ;;  %v2340_v14 = vpop.eup %2339 }
0x1536   :  { %v1698_v11 = vmul.f32 %v2340_v14, %v1696_v24  ;;  %vm1703_vm8 = vweird.f32 %v2340_v14 }
0x1537   :  { %vm1704_vm10 = vmor %vm1702_vm9, %vm1703_vm8  ;;  %vm1901_vm8 = vcmask 1046534   ;;  %vm1903_vm9 = vcmask 1047559  }
0x1538   :  { %v1699_v20 = vsub.f32 1.0, %v1698_v11 }
0x153a   :  { %v1700_v22 = vmul.f32 %v2340_v14, %v1699_v20 }
0x153c   :  { %v1701_v52 = vadd.f32 %v2340_v14, %v1700_v22 }
0x153e   :  { %v1705_v26 = vsel %vm1704_vm10, %v2340_v14, %v1701_v52  ;;  %vm2031_vm10 = vcmask 64512  }
0x1544   :  { %1375 = vmax.xlane.f32.xlu0 %v1374_v34  ;;  %v1706_v34 = vand.u32 2147483647, %v1696_v24 }
0x1546   :  { %vm1707_vm0 = vcmp.eq.f32.partialorder %v1706_v34, 8.507059e+37 }
0x1558   :  { %551 = vrot.lane.b32.xlu0 %v2682_v1, %s2437_s2 }
0x1560   :  { %1557 = vrot.lane.b32.xlu0 %v2843_v15, %s2435_s30 }
0x1568   :  { %342 = vrot.lane.b32.xlu0 %v2648_v27, %s2437_s2 }
0x158c   :  { %v1639_v55 = vpop.permute.xlu0 %1638 }
0x158d   :  { %v1641_v56 = vmul.f32 %v1639_v55, %v2880_v53 }
0x158f   :  { %1643 = vrot.lane.b32.xlu2 %v1641_v56, %s2435_s30  ;;  %v1158_v56 = vsel %vm336_vm5, %v2781_v59, -inf  ;;  %v1360_v59 = vsel %vm544_vm1, %v2810_v37, -inf  ;;  %vm1893_vm1 = vcmask 1042434  }
0x1592   :  { %975 = vmax.xlane.f32.xlu0 %v974_v54 }
0x1597   :  { %1734 = vrot.lane.b32.xlu2 %v1732_v57, %s2438_s0 }
0x159a   :  { %1566 = vmax.xlane.f32.xlu0 %v1565_v58 }
0x15a2   :  { %539 = vadd.xlane.f32.xlu0 %v538_v3  ;;  %v562_v3 = vsel %vm561_vm14, %v2682_v1, -inf }
0x15b7   :  { %v1376_v5 = vpop.xlane.xlu0 %1375 }
0x15b8   :  { %1378 = vst.msk [vmem:[#allocation6] sm:$0x30] %vm559_vm15, %v1376_v5  ;;  %v1574_v5 = vsel %vm537_vm13, %v2860_v23, 0.0  ;;  %v968_v23 = vsel %vm330_vm2, %v2750_v18, 0.0 }
0x15c0   :  { %546 = vmax.xlane.f32.xlu2 %v545_v19  ;;  %v1167_v19 = vsel %vm345_vm7, %v2907_v63, 0.0 }
0x15ca   :  { %v2894_v7 = vpop.permute.xlu0 %551 }
0x15d2   :  { %v2897_v4 = vpop.permute.xlu0 %1557 }
0x15d8   :  { %1352 = vrot.lane.b32.xlu2 %v2810_v37, %s2435_s30  ;;  %v953_v37 = vsel %vm345_vm7, %v2866_v35, 0.0  ;;  %v1153_v35 = vsel %vm330_vm2, %v2785_v10, 0.0 }
0x15da   :  { %v2903_v8 = vpop.permute.xlu0 %342 }
0x15db   :  { %358 = vst.msk [vmem:[#allocation7 - $0x6] sm:$0xc0] %vm345_vm7, %v2903_v8 }
0x15e9   :  { %v1644_v16 = vpop.permute.xlu2 %1643 }
0x15ea   :  { %v1646_v17 = vadd.f32 %v1644_v16, %v1584_v38  ;;  %v1709_v38 = vor.u32 1.1754944e-38, %v1708_v33 }
0x15ec   :  { %2341 = vtanh.f32 %v1646_v17  ;;  %v1710_v40 = vsel %vm1707_vm0, %v1709_v38, %v1705_v26  ;;  %vm958_vm0 = vcmask 785926  }
0x15ed   :  { %v959_v49 = vsel %vm958_vm0, %v2758_v31, -inf  ;;  %v769_v31 = vsel %vm768_vm4, %v2713_v46, -inf  ;;  %vm554_vm4 = vcmask 259076  }
0x15ee   :  { %v1369_v1 = vsel %vm554_vm4, %v2899_v6, 0.0  ;;  %v555_v18 = vsel %vm554_vm4, %v2894_v7, 0.0  ;;  %v2195_v6 = vmul.f32 -1.442695, %v1712_v0 }
0x15f1   :  { %v1735_v39 = vpop.permute.xlu2 %1734 }
0x15f2   :  { %v2909_v21 = vpop.eup %2341  ;;  %v1737_v12 = vmul.f32 %v1735_v39, %v1710_v40 }
0x15f3   :  { %v1649_v29 = vrot.slane %v2909_v21, 2 }
0x15f5   :  { %v1651_v36 = vsub.f32 %v2843_v15, %v1649_v29 }
0x15f7   :  { %v1653_v30 = vrot.slane %v1651_v36, 6 }
0x15f9   :  { %1654 = vrot.lane.b32.xlu1 %v1653_v30, %s2437_s2 }
0x1601   :  { %1173 = vmax.xlane.f32.xlu2 %v1172_v42  ;;  %1739 = vrot.lane.b32.xlu1 %v1737_v12, %s2435_s30 }
0x1605   :  { %v976_v15 = vpop.xlane.xlu0 %975 }
0x1606   :  { %978 = vst.msk [vmem:[#allocation6 + $0x8] sm:$0x3] %vm334_vm3, %v976_v15 }
0x1609   :  { %354 = vmax.xlane.f32.xlu2 %v353_v43  ;;  %v2439_v43 = vmov 0  }
0x160a   :  { %2214 = vset.pattern.permute.xlu0 %v2439_v43  ;;  %2213 = vset.pattern.permute.xlu1 %v2439_v43 }
0x160b   :  { %2215 = vset.pattern.permute.xlu2 %v2439_v43 }
0x160d   :  { %v1567_v25 = vpop.xlane.xlu0 %1566 }
0x160e   :  { %1569 = vst.msk [vmem:[#allocation4 + $0x8] sm:$0x30] %vm559_vm15, %v1567_v25 }
0x1615   :  { %v540_v44 = vpop.xlane.xlu0 %539 }
0x1616   :  { %543 = vst.msk [vmem:[#allocation3] sm:$0xc] %vm542_vm6, %v540_v44 }
0x162b   :  { %755 = vmax.xlane.f32.xlu1 %v754_v45 }
0x1633   :  { %v547_v41 = vpop.xlane.xlu2 %546 }
0x1634   :  { %549 = vst.msk [vmem:[#allocation4] sm:$0xc] %vm542_vm6, %v547_v41 }
0x163b   :  { %v1353_v27 = vpop.permute.xlu2 %1352 }
0x1644   :  { %760 = vrot.lane.b32.xlu1 %v2713_v46, %s2437_s2  ;;  %v748_v46 = vsel %vm554_vm4, %v2862_v28, 0.0  ;;  %v1355_v28 = vsel %vm537_vm13, %v1353_v27, 0.0 }
0x166b   :  { %v1655_v47 = vpop.permute.xlu1 %1654 }
0x166c   :  { %v1657_v48 = vmul.f32 %v1655_v47, %v2880_v53 }
0x166e   :  { %1659 = vrot.lane.b32.xlu0 %v1657_v48, %s2438_s0  ;;  %960 = vmax.xlane.f32.xlu1 %v959_v49 }
0x1673   :  { %v1740_v50 = vpop.permute.xlu1 %1739 }
0x1674   :  { %v1742_v51 = vadd.f32 %v1740_v50, %v1586_v61  ;;  %v1174_v55 = vpop.xlane.xlu2 %1173  ;;  %v1835_v50 = vld [vmem:[#allocation6 + $0x4] sm:$0x3] }
0x1675   :  { %1176 = vst.msk [vmem:[#allocation6] sm:$0xc0] %vm350_vm11, %v1174_v55 }
0x1676   :  { %2343 = vtanh.f32 %v1742_v51  ;;  %1159 = vmax.xlane.f32.xlu1 %v1158_v56 }
0x1677   :  { %2345 = vpow2.f32 %v2195_v6 }
0x167c   :  { %v2932_v54 = vpop.eup %2343  ;;  %v355_v53 = vpop.xlane.xlu2 %354 }
0x167d   :  { %357 = vst.msk [vmem:[#allocation6 + $0x8] sm:$0xc0] %vm350_vm11, %v355_v53  ;;  %v1745_v57 = vrot.slane %v2932_v54, 6  ;;  %v2346_v13 = vpop.eup %2345 }
0x167e   :  { %770 = vmax.xlane.f32.xlu1 %v769_v31  ;;  %v1716_v24 = vadd.f32 1.0, %v2346_v13  ;;  %v1786_v31 = vld [vmem:[#allocation3 + $0x2] sm:$0x3]  ;;  %v1836_v13 = vld [vmem:[#allocation6 + $0x6] sm:$0x3] }
0x167f   :  { %v1747_v58 = vsub.f32 %v2829_v2, %v1745_v57 }
0x1680   :  { %2347 = vrcp.f32 %v1716_v24  ;;  %v1728_v29 = vand.u32 2147483648, %v1716_v24  ;;  %vm1722_vm14 = vweird.f32 %v1716_v24  ;;  %v1726_v36 = vand.u32 2147483647, %v1716_v24 }
0x1681   :  { %v1749_v60 = vrot.slane %v1747_v58, 2 }
0x1682   :  { %v1729_v33 = vor.u32 1.1754944e-38, %v1728_v29 }
0x1683   :  { %1750 = vrot.lane.b32.xlu0 %v1749_v60, %s2437_s2 }
0x1686   :  { %1361 = vmax.xlane.f32.xlu1 %v1360_v59  ;;  %v2348_v63 = vpop.eup %2347 }
0x1687   :  { %v1718_v10 = vmul.f32 %v2348_v63, %v1716_v24  ;;  %vm1723_vm5 = vweird.f32 %v2348_v63 }
0x1688   :  { %vm1724_vm12 = vmor %vm1722_vm14, %vm1723_vm5 }
0x1689   :  { %v1719_v7 = vsub.f32 1.0, %v1718_v10 }
0x168b   :  { %v1720_v20 = vmul.f32 %v2348_v63, %v1719_v7 }
0x168d   :  { %v1721_v22 = vadd.f32 %v2348_v63, %v1720_v20 }
0x168e   :  { %563 = vmax.xlane.f32.xlu1 %v562_v3 }
0x168f   :  { %v1725_v30 = vsel %vm1724_vm12, %v2348_v63, %v1721_v22  ;;  %vm2134_vm12 = vcmask 33792  }
0x1696   :  { %1575 = vadd.xlane.f32.xlu1 %v1574_v5  ;;  %v1826_v5 = vld [vmem:[#allocation4 + $0x2] sm:$0x3] }
0x169e   :  { %749 = vadd.xlane.f32.xlu1 %v748_v46  ;;  %v756_v2 = vpop.xlane.xlu1 %755  ;;  %v1834_v46 = vld [vmem:[#allocation6 + $0x2] sm:$0x3] }
0x169f   :  { %758 = vst.msk [vmem:[#allocation4] sm:$0x30] %vm559_vm15, %v756_v2  ;;  %v1842_v2 = vmax.f32 %v1826_v5, %v1834_v46 }
0x16a6   :  { %954 = vadd.xlane.f32.xlu1 %v953_v37  ;;  %v1827_v61 = vld [vmem:[#allocation4 + $0x4] sm:$0x3]  ;;  %v1837_v37 = vld [vmem:[#allocation6 + $0x8] sm:$0x3] }
0x16a7   :  { %v1843_v51 = vmax.f32 %v1827_v61, %v1835_v50 }
0x16ad   :  { %1370 = vadd.xlane.f32.xlu0 %v1369_v1 }
0x16ae   :  { %969 = vadd.xlane.f32.xlu1 %v968_v23 }
0x16b5   :  { %1168 = vadd.xlane.f32.xlu0 %v1167_v19  ;;  %v1831_v19 = vld [vmem:[#allocation4 + $0xc] sm:$0x3] }
0x16b6   :  { %v761_v9 = vpop.permute.xlu1 %760  ;;  %1356 = vadd.xlane.f32.xlu1 %v1355_v28  ;;  %v1560_v28 = vsel %vm554_vm4, %v2897_v4, 0.0  ;;  %vm3086_vm4 = vcmask 130048  }
0x16b7   :  { %v763_v62 = vsel %vm537_vm13, %v761_v9, 0.0  ;;  %vm1727_vm13 = vcmp.eq.f32.partialorder %v1726_v36, 8.507059e+37  ;;  %vm3087_vm5 = vmmov %vm3086_vm4 }
0x16b8   :  { %764 = vadd.xlane.f32.xlu2 %v763_v62  ;;  %v1730_v34 = vsel %vm1727_vm13, %v1729_v33, %v1725_v30  ;;  %vm3088_vm14 = vmmov %vm3086_vm4 }
0x16bd   :  { %1154 = vadd.xlane.f32.xlu0 %v1153_v35 }
0x16c5   :  { %556 = vadd.xlane.f32.xlu0 %v555_v18 }
0x16e0   :  { %v1660_v14 = vpop.permute.xlu0 %1659 }
0x16e1   :  { %v2965_v16 = vadd.f32 %v2909_v21, %v1660_v14  ;;  %v961_v17 = vpop.xlane.xlu1 %960  ;;  %v346_v21 = vsel %vm345_vm7, %v2903_v8, 0.0 }
0x16e2   :  { %963 = vst.msk [vmem:[#allocation4] sm:$0xc0] %vm350_vm11, %v961_v17 }
0x16e3   :  { %1760 = vrot.lane.b32.xlu2 %v2965_v16, %s2435_s30  ;;  %v1768_v32 = vsel %vm958_vm0, %v2965_v16, -inf  ;;  %vm2034_vm0 = vcmask 392192  }
0x16e4   :  { %1769 = vmax.xlane.f32.xlu1 %v1768_v32  ;;  %v1840_v32 = vld [vmem:[#allocation6 + $0xe] sm:$0x3] }
0x16e9   :  { %v1160_v11 = vpop.xlane.xlu1 %1159  ;;  %v1828_v6 = vld [vmem:[#allocation4 + $0x6] sm:$0x3] }
0x16ea   :  { %1162 = vst.msk [vmem:[#allocation4 + $0x8] sm:$0x3] %vm334_vm3, %v1160_v11  ;;  %v1844_v24 = vmax.f32 %v1828_v6, %v1836_v13 }
0x16ec   :  { %347 = vadd.xlane.f32.xlu1 %v346_v21 }
0x16f1   :  { %v771_v52 = vpop.xlane.xlu1 %770 }
0x16f2   :  { %773 = vst.msk [vmem:[#allocation6 + $0x8] sm:$0xc] %vm542_vm6, %v771_v52 }
0x16f5   :  { %v1751_v26 = vpop.permute.xlu0 %1750 }
0x16f6   :  { %v1753_v38 = vmul.f32 %v1751_v26, %v1730_v34 }
0x16f8   :  { %1755 = vrot.lane.b32.xlu2 %v1753_v38, %s2438_s0  ;;  %v1825_v38 = vld [vmem:[#allocation4] sm:$0x3] }
0x16f9   :  { %v1362_v39 = vpop.xlane.xlu1 %1361  ;;  %v1838_v14 = vld [vmem:[#allocation6 + $0xa] sm:$0x3] }
0x16fa   :  { %1364 = vst.msk [vmem:[#allocation4 + $0x8] sm:$0xc] %vm542_vm6, %v1362_v39 }
0x1701   :  { %v564_v8 = vpop.xlane.xlu1 %563  ;;  %v1830_v63 = vld [vmem:[#allocation4 + $0xa] sm:$0x3] }
0x1702   :  { %566 = vst.msk [vmem:[#allocation6 + $0x8] sm:$0x30] %vm559_vm15, %v564_v8  ;;  %v1846_v17 = vmax.f32 %v1830_v63, %v1838_v14 }
0x1709   :  { %v1576_v40 = vpop.xlane.xlu1 %1575  ;;  %v1839_v23 = vld [vmem:[#allocation6 + $0xc] sm:$0x3] }
0x170a   :  { %1578 = vst.msk [vmem:[#allocation5] sm:$0xc] %vm542_vm6, %v1576_v40  ;;  %v1847_v9 = vmax.f32 %v1831_v19, %v1839_v23  ;;  %v2023_v40 = vrot.slane %v2965_v16, 6 }
0x1711   :  { %v750_v12 = vpop.xlane.xlu1 %749  ;;  %v1794_v56 = vld [vmem:[#allocation5 + $0x2] sm:$0x3] }
0x1712   :  { %752 = vst.msk [vmem:[#allocation3] sm:$0x30] %vm559_vm15, %v750_v12  ;;  %v1802_v58 = vadd.f32 %v1794_v56, %v1786_v31  ;;  %v1881_v56 = vlaneseq  ;;  %v1785_v31 = vld [vmem:[#allocation3] sm:$0x3] }
0x1714   :  { %v1818_v59 = vmul.f32 0.015625, %v1802_v58 }
0x1719   :  { %v955_v42 = vpop.xlane.xlu1 %954 }
0x171a   :  { %957 = vst.msk [vmem:[#allocation3] sm:$0xc0] %vm350_vm11, %v955_v42  ;;  %v1787_v42 = vld [vmem:[#allocation3 + $0x4] sm:$0x3] }
0x1720   :  { %v1371_v15 = vpop.xlane.xlu0 %1370 }
0x1721   :  { %1373 = vst.msk [vmem:[#allocation5] sm:$0x30] %vm559_vm15, %v1371_v15  ;;  %v970_v25 = vpop.xlane.xlu1 %969  ;;  %v1788_v35 = vld [vmem:[#allocation3 + $0x6] sm:$0x3] }
0x1722   :  { %972 = vst.msk [vmem:[#allocation5 + $0x8] sm:$0x3] %vm334_vm3, %v970_v25 }
0x1728   :  { %v1169_v44 = vpop.xlane.xlu0 %1168  ;;  %v1795_v12 = vld [vmem:[#allocation5 + $0x4] sm:$0x3] }
0x1729   :  { %1171 = vst.msk [vmem:[#allocation5] sm:$0xc0] %vm350_vm11, %v1169_v44  ;;  %v1357_v45 = vpop.xlane.xlu1 %1356  ;;  %v1797_v22 = vld [vmem:[#allocation5 + $0x8] sm:$0x3]  ;;  %v1803_v15 = vadd.f32 %v1795_v12, %v1787_v42 }
0x172a   :  { %1359 = vst.msk [vmem:[#allocation3 + $0x8] sm:$0xc] %vm542_vm6, %v1357_v45 }
0x172b   :  { %v765_v41 = vpop.xlane.xlu2 %764  ;;  %v1819_v43 = vmul.f32 0.015625, %v1803_v15 }
0x172c   :  { %767 = vst.msk [vmem:[#allocation5 + $0x8] sm:$0xc] %vm542_vm6, %v765_v41  ;;  %vm3085_vm6 = vcmask 517376  }
0x1730   :  { %v1155_v47 = vpop.xlane.xlu0 %1154  ;;  %v1796_v62 = vld [vmem:[#allocation5 + $0x6] sm:$0x3] }
0x1731   :  { %1157 = vst.msk [vmem:[#allocation3 + $0x8] sm:$0x3] %vm334_vm3, %v1155_v47  ;;  %v1804_v0 = vadd.f32 %v1796_v62, %v1788_v35  ;;  %v1790_v44 = vld [vmem:[#allocation3 + $0xa] sm:$0x3] }
0x1733   :  { %v1820_v18 = vmul.f32 0.015625, %v1804_v0  ;;  %v1798_v25 = vld [vmem:[#allocation5 + $0xa] sm:$0x3] }
0x1734   :  { %v1806_v45 = vadd.f32 %v1798_v25, %v1790_v44  ;;  %v2045_v25 = vld [vmem:[%s3076_s7 + $0x48] sm:$0xff]  ;;  %v2044_v44 = vld [vmem:[%s3076_s7 + $0x40] sm:$0xff] }
0x1735   :  { %2060 = vmatpush.msra.mxu0 %v2045_v25 }
0x1736   :  { %v1822_v41 = vmul.f32 0.015625, %v1806_v45  ;;  %v2043_v45 = vld [vmem:[%s3076_s7 + $0x38] sm:$0xff] }
0x1737   :  { %2061 = vmatpush.msra.mxu0 %v2044_v44 }
0x1738   :  { %v557_v27 = vpop.xlane.xlu0 %556  ;;  %v1789_v21 = vld [vmem:[#allocation3 + $0x8] sm:$0x3] }
0x1739   :  { %560 = vst.msk [vmem:[#allocation5 + $0x8] sm:$0x30] %vm559_vm15, %v557_v27  ;;  %v1805_v29 = vadd.f32 %v1797_v22, %v1789_v21  ;;  %2062 = vmatpush.msra.mxu0 %v2043_v45 }
0x173b   :  { %v1821_v36 = vmul.f32 0.015625, %v1805_v29 }
0x173d   :  { %v1761_v48 = vpop.permute.xlu2 %1760 }
0x173e   :  { %v1763_v49 = vsel %vm345_vm7, %v1761_v48, 0.0  ;;  %vm1899_vm7 = vcmask 1045509  }
0x173f   :  { %1764 = vadd.xlane.f32.xlu0 %v1763_v49 }
0x1752   :  { %v1756_v55 = vpop.permute.xlu2 %1755 }
0x1753   :  { %v1758_v53 = vadd.f32 %v2932_v54, %v1756_v55  ;;  %1953 = vperm.xlu0 %2214, %v1843_v51   ;;  %v1829_v54 = vld [vmem:[#allocation4 + $0x8] sm:$0x3] }
0x1754   :  { %v1845_v1 = vmax.f32 %v1829_v54, %v1837_v37 }
0x1755   :  { %1774 = vrot.lane.b32.xlu2 %v1758_v53, %s2437_s2  ;;  %v1781_v57 = vsel %vm3085_vm6, %v1758_v53, -inf  ;;  %v1882_v53 = vand.u32 127, %v1881_v56 }
0x1756   :  { %1782 = vmax.xlane.f32.xlu1 %v1781_v57 }
0x1757   :  { %v1770_v60 = vpop.xlane.xlu1 %1769 }
0x1758   :  { %1772 = vst.msk [vmem:[#allocation4 + $0x8] sm:$0xc0] %vm350_vm11, %v1770_v60 }
0x175b   :  { %1861 = vperm.xlu0 %2214, %v1818_v59  }
0x175f   :  { %v348_v3 = vpop.xlane.xlu1 %347  ;;  %v1832_v10 = vld [vmem:[#allocation4 + $0xe] sm:$0x3] }
0x1760   :  { %351 = vst.msk [vmem:[#allocation5 + $0x8] sm:$0xc0] %vm350_vm11, %v348_v3  ;;  %v1848_v7 = vmax.f32 %v1832_v10, %v1840_v32 }
0x1767   :  { %v1800_v30 = vld [vmem:[#allocation5 + $0xe] sm:$0x3] }
0x176f   :  { %1950 = vperm.xlu1 %2213, %v1842_v2  }
0x1777   :  { %1959 = vperm.xlu1 %2213, %v1845_v1  }
0x177e   :  { %1561 = vadd.xlane.f32.xlu2 %v1560_v28  ;;  %v1799_v28 = vld [vmem:[#allocation5 + $0xc] sm:$0x3] }
0x177f   :  { %1965 = vperm.xlu1 %2213, %v1847_v9  }
0x1787   :  { %1867 = vperm.xlu1 %2213, %v1820_v18  }
0x1796   :  { %1956 = vperm.xlu2 %2215, %v1844_v24  }
0x179e   :  { %1962 = vperm.xlu2 %2215, %v1846_v17  }
0x17a6   :  { %1968 = vperm.xlu2 %2215, %v1848_v7  }
0x17af   :  { %v1775_v4 = vpop.permute.xlu2 %1774 }
0x17b0   :  { %v1777_v11 = vsel %vm330_vm2, %v1775_v4, 0.0  ;;  %vm1891_vm2 = vcmask 1041409  }
0x17b1   :  { %1778 = vadd.xlane.f32.xlu0 %v1777_v11 }
0x17b2   :  { %v1765_v20 = vpop.xlane.xlu0 %1764 }
0x17b3   :  { %1767 = vst.msk [vmem:[#allocation3 + $0x8] sm:$0xc0] %vm350_vm11, %v1765_v20  ;;  %vm2050_vm11 = vcmask 654336  }
0x17ba   :  { %v1792_v52 = vld [vmem:[#allocation3 + $0xe] sm:$0x3] }
0x17bb   :  { %v1808_v33 = vadd.f32 %v1800_v30, %v1792_v52 }
0x17bd   :  { %v1824_v26 = vmul.f32 0.015625, %v1808_v33 }
0x17c5   :  { %1870 = vperm.xlu0 %2214, %v1821_v36   ;;  %v1954_v27 = vpop.permute.xlu0 %1953 }
0x17c6   :  { %v1972_v46 = vperm.slane %v1954_v27, %v1882_v53  ;;  %v2040_v27 = vld [vmem:[%s3076_s7 + $0x20] sm:$0xff] }
0x17c9   :  { %v1783_v34 = vpop.xlane.xlu1 %1782 }
0x17ca   :  { %1784 = vst.msk [vmem:[#allocation6] sm:$0x3] %vm334_vm3, %v1783_v34 }
0x17cd   :  { %1879 = vperm.xlu0 %2214, %v1824_v26   ;;  %v1862_v49 = vpop.permute.xlu0 %1861 }
0x17ce   :  { %v1884_v4 = vperm.slane %v1862_v49, %v1882_v53  ;;  %v2038_v49 = vld [vmem:[%s3076_s7 + $0x10] sm:$0xff] }
0x17d1   :  { %v1833_v39 = vld [vmem:[#allocation6] sm:$0x3] }
0x17d2   :  { %v1841_v8 = vmax.f32 %v1825_v38, %v1833_v39 }
0x17d4   :  { %1947 = vperm.xlu2 %2215, %v1841_v8  }
0x17d5   :  { %2024 = vrot.lane.b32.xlu0 %v2023_v40, %s2440_s3 }
0x17dc   :  { %1864 = vperm.xlu2 %2215, %v1819_v43   ;;  %v2018_v43 = vld [vmem:[#allocation7] sm:$0x3] }
0x17e1   :  { %v1951_v61 = vpop.permute.xlu1 %1950 }
0x17e2   :  { %v1971_v59 = vperm.slane %v1951_v61, %v1882_v53  ;;  %v2036_v61 = vld [vmem:[%s3076_s7] sm:$0xff] }
0x17e4   :  { %1873 = vperm.xlu2 %2215, %v1822_v41   ;;  %v2042_v41 = vld [vmem:[%s3076_s7 + $0x30] sm:$0xff] }
0x17e5   :  { %2063 = vmatpush.msra.mxu0 %v2042_v41 }
0x17e9   :  { %v1960_v55 = vpop.permute.xlu1 %1959 }
0x17ea   :  { %v1974_v23 = vperm.slane %v1960_v55, %v1882_v53 }
0x17f1   :  { %v1562_v47 = vpop.xlane.xlu2 %1561  ;;  %v1966_v54 = vpop.permute.xlu1 %1965 }
0x17f2   :  { %1564 = vst.msk [vmem:[#allocation3 + $0x8] sm:$0x30] %vm559_vm15, %v1562_v47  ;;  %vm1895_vm15 = vcmask 1043459   ;;  %v1976_v0 = vperm.slane %v1966_v54, %v1882_v53  ;;  %v2041_v47 = vld [vmem:[%s3076_s7 + $0x28] sm:$0xff]  ;;  %v2105_v54 = vld [vmem:[%s3080_s11] sm:$0xff] }
0x17f3   :  { %2064 = vmatpush.msra.mxu0 %v2041_v47 }
0x17f5   :  { %2065 = vmatpush.msra.mxu0 %v2040_v27 }
0x17f9   :  { %v1957_v48 = vpop.permute.xlu2 %1956  ;;  %v1791_v2 = vld [vmem:[#allocation3 + $0xc] sm:$0x3]  ;;  %v1868_v17 = vpop.permute.xlu1 %1867 }
0x17fa   :  { %v1973_v37 = vperm.slane %v1957_v48, %v1882_v53  ;;  %v1807_v35 = vadd.f32 %v1799_v28, %v1791_v2  ;;  %v1886_v21 = vperm.slane %v1868_v17, %v1882_v53  ;;  %v2039_v48 = vld [vmem:[%s3076_s7 + $0x18] sm:$0xff]  ;;  %v2106_v2 = vld [vmem:[%s3080_s11 + $0x8] sm:$0xff]  ;;  %v2220_v28 = vld [vmem:[%s3081_s12] ss:$0 sm:$0xff] }
0x17fb   :  { %2066 = vmatpush.msra.mxu0 %v2039_v48  ;;  %2128 = vmatpush.msrb.mxu2 %v2106_v2 }
0x17fc   :  { %v1823_v14 = vmul.f32 0.015625, %v1807_v35 }
0x17fd   :  { %2067 = vmatpush.msra.mxu0 %v2038_v49  ;;  %2129 = vmatpush.msrb.mxu2 %v2105_v54 }
0x1801   :  { %v1963_v16 = vpop.permute.xlu2 %1962 }
0x1802   :  { %v1975_v9 = vperm.slane %v1963_v16, %v1882_v53  ;;  %v2037_v16 = vld [vmem:[%s3076_s7 + $0x8] sm:$0xff] }
0x1803   :  { %2068 = vmatpush.msra.mxu0 %v2037_v16 }
0x1805   :  { %2069 = vmatpush.msra.mxu0 %v2036_v61 }
0x1809   :  { %v1969_v51 = vpop.permute.xlu2 %1968 }
0x180a   :  { %v1977_v6 = vperm.slane %v1969_v51, %v1882_v53 }
0x1824   :  { %v1779_v50 = vpop.xlane.xlu0 %1778 }
0x1825   :  { %1780 = vst.msk [vmem:[#allocation5] sm:$0x3] %vm334_vm3, %v1779_v50  ;;  %vm1897_vm3 = vcmask 1044484  }
0x182c   :  { %v1793_v57 = vld [vmem:[#allocation5] sm:$0x3] }
0x182d   :  { %v1801_v58 = vadd.f32 %v1793_v57, %v1785_v31 }
0x182e   :  { %v1948_v60 = vpop.permute.xlu2 %1947 }
0x182f   :  { %v1970_v3 = vperm.slane %v1948_v60, %v1882_v53  ;;  %v1817_v5 = vmul.f32 0.015625, %v1801_v58  ;;  %v2076_v58 = vld [vmem:[#allocation11 + $0x8] sm:$0xff]  ;;  %v2075_v60 = vld [vmem:[#allocation11] sm:$0xff] }
0x1830   :  { %2098 = vmatpush.msra.mxu1 %v2076_v58 }
0x1831   :  { %v1978_v1 = vsel %vm1891_vm2, %v1971_v59, %v1970_v3  ;;  %1858 = vperm.xlu1 %2213, %v1817_v5   ;;  %v2218_v59 = vld [vmem:[%s3077_s8] ss:$0 sm:$0xff] }
0x1832   :  { %v1979_v19 = vsel %vm1893_vm1, %v1972_v46, %v1978_v1  ;;  %2099 = vmatpush.msra.mxu1 %v2075_v60 }
0x1833   :  { %v1980_v62 = vsel %vm1895_vm15, %v1973_v37, %v1979_v19  ;;  %v2219_v37 = vld [vmem:[%s3079_s10] ss:$0 sm:$0xff] }
0x1834   :  { %v1981_v18 = vsel %vm1897_vm3, %v1974_v23, %v1980_v62 }
0x1835   :  { %v1982_v13 = vsel %vm1899_vm7, %v1975_v9, %v1981_v18 }
0x1836   :  { %v1983_v24 = vsel %vm1901_vm8, %v1976_v0, %v1982_v13  ;;  %v1865_v10 = vpop.permute.xlu2 %1864 }
0x1837   :  { %v1984_v63 = vsel %vm1903_vm9, %v1977_v6, %v1983_v24  ;;  %v1871_v32 = vpop.permute.xlu0 %1870  ;;  %v1885_v20 = vperm.slane %v1865_v10, %v1882_v53 }
0x1838   :  { %1986 = vxpose.xlu2.b32.start.end [1/1] (short) (narrow) %v1984_v63, 8  ;;  %v1887_v36 = vperm.slane %v1871_v32, %v1882_v53 }
0x1839   :  { %1876 = vperm.xlu1 %2213, %v1823_v14  }
0x183e   :  { %v1874_v52 = vpop.permute.xlu2 %1873 }
0x183f   :  { %v1880_v33 = vpop.permute.xlu0 %1879  ;;  %v1888_v26 = vperm.slane %v1874_v52, %v1882_v53 }
0x1840   :  { %v1890_v8 = vperm.slane %v1880_v33, %v1882_v53 }
0x1847   :  { %v2025_v50 = vpop.permute.xlu0 %2024 }
0x18a3   :  { %v1859_v7 = vpop.permute.xlu1 %1858 }
0x18a4   :  { %v1883_v11 = vperm.slane %v1859_v7, %v1882_v53 }
0x18a6   :  { %v1892_v22 = vsel %vm1891_vm2, %v1884_v4, %v1883_v11 }
0x18a7   :  { %v1894_v29 = vsel %vm1893_vm1, %v1885_v20, %v1892_v22 }
0x18a8   :  { %v1896_v30 = vsel %vm1895_vm15, %v1886_v21, %v1894_v29 }
0x18a9   :  { %v1898_v34 = vsel %vm1897_vm3, %v1887_v36, %v1896_v30 }
0x18aa   :  { %v1900_v40 = vsel %vm1899_vm7, %v1888_v26, %v1898_v34 }
0x18ab   :  { %v1877_v38 = vpop.permute.xlu1 %1876 }
0x18ac   :  { %v1889_v39 = vperm.slane %v1877_v38, %v1882_v53 }
0x18ae   :  { %v1902_v12 = vsel %vm1901_vm8, %v1889_v39, %v1900_v40 }
0x18af   :  { %v1904_v42 = vsel %vm1903_vm9, %v1890_v8, %v1902_v12 }
0x18b0   :  { %1906 = vxpose.xlu0.b32.start.end [1/1] (short) (narrow) %v1904_v42, 8 }
0x18d1   :  { %v2002_v15 = vpop.trf.xlu2 }
0x18d2   :  { %2020 = vrot.lane.b32.xlu1 %v2002_v15, %s2433_s17 }
0x18da   :  { %2028 = vrot.lane.b32.xlu1 %v2018_v43, %s2441_s5 }
0x1944   :  { %v2021_v51 = vpop.permute.xlu1 %2020 }
0x194c   :  { %v2029_v53 = vpop.permute.xlu1 %2028 }
0x1954   :  { %v1922_v55 = vpop.trf.xlu0 }
0x1955   :  { %v2032_v56 = vsel %vm2031_vm10, %v1922_v55, %v2021_v51 }
0x1956   :  { %v2033_v31 = vsel %vm3086_vm4, %v2032_v56, %v2025_v50 }
0x1957   :  { %v2035_v57 = vsel %vm2034_vm0, %v2033_v31, %v2029_v53 }
0x1958   :  { %2196 = vmatmul.msk.f32.vlgmr.msra.gmra.mxu0 %vm2050_vm11, %v2035_v57 }
0x19d5   :  { %v2071_v3 = vpop.f32.mrf.mxu0 }
0x19d6   :  { %v2072_v5 = vadd.f32 %v2218_v59, %v2071_v3 }
0x19d8   :  { %2349 = vtanh.f32 %v2072_v5 }
0x19de   :  { %v2350_v46 = vpop.eup %2349 }
0x19df   :  { %2197 = vmatmul.msk.f32.vlgmr.msra.gmra.mxu1 %vm3087_vm5, %v2350_v46 }
0x1a5c   :  { %v2101_v1 = vpop.f32.mrf.mxu1 }
0x1a5d   :  { %v2102_v23 = vadd.f32 %v2219_v37, %v2101_v1 }
0x1a5f   :  { %2351 = vtanh.f32 %v2102_v23 }
0x1a65   :  { %v2352_v19 = vpop.eup %2351 }
0x1a66   :  { %2198 = vmatmul.msk.f32.vlgmr.msrb.gmra.mxu2 %vm3088_vm14, %v2352_v19 }
0x1ae9   :  { %v2131_v9 = vpop.f32.mrf.mxu2 }
0x1aea   :  { %v2132_v62 = vadd.f32 %v2220_v28, %v2131_v9 }
0x1aec   :  { %2135 = vst.msk [vmem:[#allocation13] sm:$0x3] %vm2134_vm12, %v2132_v62 }
0x1aed   :  { %2146 = dma.vmem_to_hbm [thread:$0]  %s2142_s6, 32, %s2144_s18, [#allocation10]  }
0x1aee   :  { %2429 = dma.done.wait [#allocation10], 32  }
0x1aef   :  { %2430 = vsyncadd [#allocation10], 4294967264 }
0x1af0   :  { %2151 = vsyncpa [#allocation9], 1 }
0x1af1   :  { %2152 = vsyncpa [#allocation12], 1 }
0x1af2   :  { %2153 = vsyncpa [#allocation10], 1 }

</bundles_post_ra>
